<compile_context>
chip_gen: v7x
topology: tpu7x:2x2x1
jax: 0.10.0
libtpu: 0.0.40
codegen_flags: <defaults>
</compile_context>

<pallas_src>
import functools
import math

import jax
import jax.numpy as jnp
from jax.experimental import pallas as pl
from jax.experimental.pallas import tpu as pltpu

H_DIM_EMB = 32
INPUT_DIM = 300
H_DIM_FEAT = 128
VOCAB = 3774
OUT_PAD = 128           # lane-dense output slab width (true output dim is 1)
TB_DEFAULT = 128        # batch tile (multiple of 8 for f32, 16 for bf16)


# ----------------------------- Pallas kernel -----------------------------

def _swish(v):
    # swish(x) = x * sigmoid(x); approx reciprocal keeps the divide on the EUP.
    return v * pl.reciprocal(1.0 + jnp.exp(-v), approx=True)


def mlp_kernel(x_ref, emb_ref,
               we_ref, be_ref,
               wf0_ref, wf12_ref, bf_ref,
               wc0e_ref, wc_ref, bc_ref,
               out_ref):
    f32 = jnp.float32
    bf16 = jnp.bfloat16

    def lin(h, w, b):
        # bf16 MXU operands, f32 accumulate, f32 bias add.
        return jnp.dot(h.astype(bf16), w, preferred_element_type=f32) + b

    # --- embedding branch: 3 x Linear(32->32) + swish ---
    e = emb_ref[...]                       # (TB, 32) bf16
    for l in range(3):
        e = _swish(lin(e, we_ref[l], be_ref[l]))

    # --- numeric-feature branch: Linear(300->128) + 2 x Linear(128->128) ---
    h = _swish(lin(x_ref[...], wf0_ref[...], bf_ref[0]))
    for l in range(2):
        h = _swish(lin(h, wf12_ref[l], bf_ref[l + 1]))

    # --- concat branch: concat([e, h]) @ Wc0 == e @ Wc0[:32] + h @ Wc0[32:] ---
    c = (jnp.dot(e.astype(bf16), wc0e_ref[...], preferred_element_type=f32)
         + jnp.dot(h.astype(bf16), wc_ref[0], preferred_element_type=f32)
         + bc_ref[0])
    c = _swish(c)
    c = _swish(lin(c, wc_ref[1], bc_ref[1]))   # 128 -> 64  (zero-padded to 128 lanes)
    c = _swish(lin(c, wc_ref[2], bc_ref[2]))   # 64  -> 32  (zero-padded to 128 lanes)

    # --- output head: Linear(32 -> 1); lanes 1..127 are zero padding ---
    out_ref[...] = lin(c, wc_ref[3], bc_ref[3])


# ----------------------------- parameters -----------------------------

def _linear(key, fan_in, fan_out):
    """PyTorch-style nn.Linear init; weight returned as [in, out]."""
    kw, kb = jax.random.split(key)
    bound = 1.0 / math.sqrt(fan_in)
    w = jax.random.uniform(kw, (fan_in, fan_out), jnp.float32, -bound, bound)
    b = jax.random.uniform(kb, (1, fan_out), jnp.float32, -bound, bound)
    return w, b


def init_params(key):
    keys = jax.random.split(key, 12)
    p = {}
    p["embed"] = jax.random.normal(keys[0], (VOCAB, H_DIM_EMB), jnp.float32)
    # fc_emb: Linear(32,32) x 3
    p["we0"], p["be0"] = _linear(keys[1], H_DIM_EMB, 32)
    p["we1"], p["be1"] = _linear(keys[2], 32, 32)
    p["we2"], p["be2"] = _linear(keys[3], 32, 32)
    # fc_feat: Linear(300,128), Linear(128,128) x 2
    p["wf0"], p["bf0"] = _linear(keys[4], INPUT_DIM, H_DIM_FEAT)
    p["wf1"], p["bf1"] = _linear(keys[5], H_DIM_FEAT, H_DIM_FEAT)
    p["wf2"], p["bf2"] = _linear(keys[6], H_DIM_FEAT, H_DIM_FEAT)
    # fc_cat: Linear(160,128), Linear(128,64), Linear(64,32)
    p["wc0"], p["bc0"] = _linear(keys[7], 32 + H_DIM_FEAT, H_DIM_FEAT)
    p["wc1"], p["bc1"] = _linear(keys[8], 128, 64)
    p["wc2"], p["bc2"] = _linear(keys[9], 64, 32)
    # l_out: Linear(32, 1)
    p["wo"], p["bo"] = _linear(keys[10], 32, 1)
    return p


def pack_params(p):
    """Pack the many small tensors into a few resident operands (bf16 weights)."""
    bf16, f32 = jnp.bfloat16, jnp.float32
    packed = {}
    packed["embed"] = p["embed"].astype(bf16)                                    # gathered in XLA glue
    packed["w_emb"] = jnp.stack([p["we0"], p["we1"], p["we2"]]).astype(bf16)     # (3,32,32)
    packed["b_emb"] = jnp.stack([p["be0"], p["be1"], p["be2"]]).astype(f32)      # (3,1,32)
    packed["w_feat0"] = p["wf0"].astype(bf16)                                    # (300,128)
    packed["w_feat12"] = jnp.stack([p["wf1"], p["wf2"]]).astype(bf16)            # (2,128,128)
    packed["b_feat"] = jnp.stack([p["bf0"], p["bf1"], p["bf2"]]).astype(f32)     # (3,1,128)
    packed["w_cat0e"] = p["wc0"][:H_DIM_EMB, :].astype(bf16)                     # (32,128)
    wc0f = p["wc0"][H_DIM_EMB:, :]                                               # (128,128)
    wc1p = jnp.pad(p["wc1"], ((0, 0), (0, 128 - 64)))                            # (128,128)
    wc2p = jnp.pad(p["wc2"], ((0, 128 - 64), (0, 128 - 32)))                     # (128,128)
    wop = jnp.pad(p["wo"], ((0, 128 - 32), (0, 128 - 1)))                        # (128,128)
    packed["w_cat"] = jnp.stack([wc0f, wc1p, wc2p, wop]).astype(bf16)            # (4,128,128)
    bc1p = jnp.pad(p["bc1"], ((0, 0), (0, 128 - 64)))
    bc2p = jnp.pad(p["bc2"], ((0, 0), (0, 128 - 32)))
    bop = jnp.pad(p["bo"], ((0, 0), (0, 128 - 1)))
    packed["b_cat"] = jnp.stack([p["bc0"], bc1p, bc2p, bop]).astype(f32)         # (4,1,128)
    return packed


_PACKED_ORDER = ["w_emb", "b_emb", "w_feat0", "w_feat12", "b_feat",
                 "w_cat0e", "w_cat", "b_cat"]


# ----------------------------- wrapper -----------------------------

@functools.partial(jax.jit, static_argnames=("tb",))
def mlp_forward(x, inv_id, packed, tb=TB_DEFAULT):
    B = x.shape[0]
    n_tiles = pl.cdiv(B, tb)
    Bp = n_tiles * tb

    # glue: embedding gather from the bf16 table (halves inv_emb DMA bytes).
    inv_emb = packed["embed"][inv_id]                    # (B, 32) bf16
    xb = x.astype(jnp.bfloat16)
    if Bp != B:                                          # pad batch to a tile multiple
        xb = jnp.pad(xb, ((0, Bp - B), (0, 0)))
        inv_emb = jnp.pad(inv_emb, ((0, Bp - B), (0, 0)))

    weights = [packed[k] for k in _PACKED_ORDER]

    def resident_spec(arr):
        nd = arr.ndim
        return pl.BlockSpec(arr.shape, lambda i, _nd=nd: (0,) * _nd)

    in_specs = (
        [pl.BlockSpec((tb, INPUT_DIM), lambda i: (i, 0)),    # x batch tile
         pl.BlockSpec((tb, H_DIM_EMB), lambda i: (i, 0))]    # inv_emb batch tile
        + [resident_spec(w) for w in weights]                # weights: constant maps -> resident
    )
    out_spec = pl.BlockSpec((tb, OUT_PAD), lambda i: (i, 0))  # lane-dense output slab

    out = pl.pallas_call(
        mlp_kernel,
        out_shape=jax.ShapeDtypeStruct((Bp, OUT_PAD), jnp.float32),
        grid=(n_tiles,),
        in_specs=in_specs,
        out_specs=out_spec,
        compiler_params=pltpu.CompilerParams(
            dimension_semantics=("parallel",),        # megacore sharding on v7x
            vmem_limit_bytes=32 * 1024 * 1024,
        ),
    )(xb, inv_emb, *weights)

    return out[:B, :1]                                  # true output is column 0


# ----------------------------- reference (pure JAX) -----------------------------

def mlp_ref(x, inv_id, p, matmul_dtype=jnp.float32):
    def sw(v):
        return v * jax.nn.sigmoid(v)

    def lin(h, w, b):
        return jnp.dot(h.astype(matmul_dtype), w.astype(matmul_dtype),
                       preferred_element_type=jnp.float32) + b

    e = p["embed"][inv_id]
    if matmul_dtype == jnp.bfloat16:
        e = e.astype(jnp.bfloat16)          # kernel gathers from a bf16 table
    e = sw(lin(e, p["we0"], p["be0"]))
    e = sw(lin(e, p["we1"], p["be1"]))
    e = sw(lin(e, p["we2"], p["be2"]))
    h = sw(lin(x, p["wf0"], p["bf0"]))
    h = sw(lin(h, p["wf1"], p["bf1"]))
    h = sw(lin(h, p["wf2"], p["bf2"]))
    c = jnp.concatenate([e, h], axis=-1)
    c = sw(lin(c, p["wc0"], p["bc0"]))
    c = sw(lin(c, p["wc1"], p["bc1"]))
    c = sw(lin(c, p["wc2"], p["bc2"]))
    return lin(c, p["wo"], p["bo"])


# ----------------------------- main -----------------------------

if __name__ == "__main__":
    key = jax.random.PRNGKey(0)
    k_param, k_x, k_id = jax.random.split(key, 3)

    params = init_params(k_param)
    packed = pack_params(params)

    B = 256                                             # 2 batch tiles of 128
    x = jax.random.normal(k_x, (B, INPUT_DIM), jnp.float32)
    inv_id = jax.random.randint(k_id, (B,), 0, VOCAB, jnp.int32)

    out = jax.block_until_ready(mlp_forward(x, inv_id, packed))
    assert out.shape == (B, 1)

    ref_bf = jax.block_until_ready(mlp_ref(x, inv_id, params, jnp.bfloat16))
    ref_32 = jax.block_until_ready(mlp_ref(x, inv_id, params, jnp.float32))

    err_bf = float(jnp.max(jnp.abs(out - ref_bf)))
    err_32 = float(jnp.max(jnp.abs(out - ref_32)))
    # tight vs bf16-matched reference (only approx reciprocal differs)
    assert jnp.allclose(out, ref_bf, atol=2e-2, rtol=2e-2), f"bf16-ref mismatch {err_bf}"
    # loose vs exact f32 reference (bf16 MXU operands drift slightly)
    assert jnp.allclose(out, ref_32, atol=6e-2, rtol=6e-2), f"f32-ref mismatch {err_32}"

    print("KERNEL_OK")
</pallas_src>

<mosaic_0001>
module attributes {stable_mosaic.version = 11 : i64} {
  func.func @mlp_kernel(%arg0: i32, %arg1: memref<128x300xbf16, #tpu.memory_space<vmem>>, %arg2: memref<128x32xbf16, #tpu.memory_space<vmem>>, %arg3: memref<3x32x32xbf16, #tpu.memory_space<vmem>>, %arg4: memref<3x1x32xf32, #tpu.memory_space<vmem>>, %arg5: memref<300x128xbf16, #tpu.memory_space<vmem>>, %arg6: memref<2x128x128xbf16, #tpu.memory_space<vmem>>, %arg7: memref<3x1x128xf32, #tpu.memory_space<vmem>>, %arg8: memref<32x128xbf16, #tpu.memory_space<vmem>>, %arg9: memref<4x128x128xbf16, #tpu.memory_space<vmem>>, %arg10: memref<4x1x128xf32, #tpu.memory_space<vmem>>, %arg11: memref<128x128xf32, #tpu.memory_space<vmem>>) attributes {dimension_semantics = [#tpu.dimension_semantics<parallel>], iteration_bounds = array<i64: 2>, scalar_prefetch = 0 : i64, scratch_operands = 0 : i64, tpu.core_type = #tpu.core_type<tc>, window_params = [{transform_indices = @transform_0, window_bounds = array<i64: 128, 300>}, {transform_indices = @transform_1, window_bounds = array<i64: 128, 32>}, {pipeline_mode = #tpu.pipeline_mode<synchronous>, transform_indices = @transform_2, window_bounds = array<i64: 3, 32, 32>}, {pipeline_mode = #tpu.pipeline_mode<synchronous>, transform_indices = @transform_3, window_bounds = array<i64: 3, 1, 32>}, {pipeline_mode = #tpu.pipeline_mode<synchronous>, transform_indices = @transform_4, window_bounds = array<i64: 300, 128>}, {pipeline_mode = #tpu.pipeline_mode<synchronous>, transform_indices = @transform_5, window_bounds = array<i64: 2, 128, 128>}, {pipeline_mode = #tpu.pipeline_mode<synchronous>, transform_indices = @transform_6, window_bounds = array<i64: 3, 1, 128>}, {pipeline_mode = #tpu.pipeline_mode<synchronous>, transform_indices = @transform_7, window_bounds = array<i64: 32, 128>}, {pipeline_mode = #tpu.pipeline_mode<synchronous>, transform_indices = @transform_8, window_bounds = array<i64: 4, 128, 128>}, {pipeline_mode = #tpu.pipeline_mode<synchronous>, transform_indices = @transform_9, window_bounds = array<i64: 4, 1, 128>}, {transform_indices = @transform_10, window_bounds = array<i64: 128, 128>}]} {
    %c0 = arith.constant 0 : index
    %c0_0 = arith.constant 0 : index
    %0 = vector.load %arg2[%c0, %c0_0] : memref<128x32xbf16, #tpu.memory_space<vmem>>, vector<128x32xbf16>
    %c0_1 = arith.constant 0 : index
    %c0_2 = arith.constant 0 : index
    %c0_3 = arith.constant 0 : index
    %1 = vector.load %arg3[%c0_1, %c0_2, %c0_3] : memref<3x32x32xbf16, #tpu.memory_space<vmem>>, vector<1x32x32xbf16>
    %2 = vector.shape_cast %1 : vector<1x32x32xbf16> to vector<32x32xbf16>
    %c0_4 = arith.constant 0 : index
    %c0_5 = arith.constant 0 : index
    %c0_6 = arith.constant 0 : index
    %3 = vector.load %arg4[%c0_4, %c0_5, %c0_6] : memref<3x1x32xf32, #tpu.memory_space<vmem>>, vector<1x1x32xf32>
    %4 = vector.shape_cast %3 : vector<1x1x32xf32> to vector<1x32xf32>
    %cst = arith.constant dense<0.000000e+00> : vector<128x32xf32>
    %5 = tpu.matmul %0, %2, %cst {dimension_numbers = #tpu.dot_dimension_numbers<[1], [0], [0], [1], [0, 0, 1, 1], [], []>} : vector<128x32xbf16>, vector<32x32xbf16>, vector<128x32xf32> -> vector<128x32xf32>
    %6 = vector.broadcast %4 : vector<1x32xf32> to vector<128x32xf32>
    %7 = arith.addf %5, %6 : vector<128x32xf32>
    %cst_7 = arith.constant 0.000000e+00 : f32
    %8 = vector.broadcast %cst_7 : f32 to vector<128x32xf32>
    %9 = arith.subf %8, %7 : vector<128x32xf32>
    %10 = math.exp %9 : vector<128x32xf32>
    %cst_8 = arith.constant 1.000000e+00 : f32
    %11 = vector.broadcast %cst_8 : f32 to vector<128x32xf32>
    %12 = arith.addf %11, %10 : vector<128x32xf32>
    %13 = tpu.reciprocal %12 {approx = true} : vector<128x32xf32> -> vector<128x32xf32>
    %14 = arith.mulf %7, %13 : vector<128x32xf32>
    %c1 = arith.constant 1 : index
    %c0_9 = arith.constant 0 : index
    %c0_10 = arith.constant 0 : index
    %15 = vector.load %arg3[%c1, %c0_9, %c0_10] : memref<3x32x32xbf16, #tpu.memory_space<vmem>>, vector<1x32x32xbf16>
    %16 = vector.shape_cast %15 : vector<1x32x32xbf16> to vector<32x32xbf16>
    %c1_11 = arith.constant 1 : index
    %c0_12 = arith.constant 0 : index
    %c0_13 = arith.constant 0 : index
    %17 = vector.load %arg4[%c1_11, %c0_12, %c0_13] : memref<3x1x32xf32, #tpu.memory_space<vmem>>, vector<1x1x32xf32>
    %18 = vector.shape_cast %17 : vector<1x1x32xf32> to vector<1x32xf32>
    %19 = arith.truncf %14 : vector<128x32xf32> to vector<128x32xbf16>
    %cst_14 = arith.constant dense<0.000000e+00> : vector<128x32xf32>
    %20 = tpu.matmul %19, %16, %cst_14 {dimension_numbers = #tpu.dot_dimension_numbers<[1], [0], [0], [1], [0, 0, 1, 1], [], []>} : vector<128x32xbf16>, vector<32x32xbf16>, vector<128x32xf32> -> vector<128x32xf32>
    %21 = vector.broadcast %18 : vector<1x32xf32> to vector<128x32xf32>
    %22 = arith.addf %20, %21 : vector<128x32xf32>
    %cst_15 = arith.constant 0.000000e+00 : f32
    %23 = vector.broadcast %cst_15 : f32 to vector<128x32xf32>
    %24 = arith.subf %23, %22 : vector<128x32xf32>
    %25 = math.exp %24 : vector<128x32xf32>
    %cst_16 = arith.constant 1.000000e+00 : f32
    %26 = vector.broadcast %cst_16 : f32 to vector<128x32xf32>
    %27 = arith.addf %26, %25 : vector<128x32xf32>
    %28 = tpu.reciprocal %27 {approx = true} : vector<128x32xf32> -> vector<128x32xf32>
    %29 = arith.mulf %22, %28 : vector<128x32xf32>
    %c2 = arith.constant 2 : index
    %c0_17 = arith.constant 0 : index
    %c0_18 = arith.constant 0 : index
    %30 = vector.load %arg3[%c2, %c0_17, %c0_18] : memref<3x32x32xbf16, #tpu.memory_space<vmem>>, vector<1x32x32xbf16>
    %31 = vector.shape_cast %30 : vector<1x32x32xbf16> to vector<32x32xbf16>
    %c2_19 = arith.constant 2 : index
    %c0_20 = arith.constant 0 : index
    %c0_21 = arith.constant 0 : index
    %32 = vector.load %arg4[%c2_19, %c0_20, %c0_21] : memref<3x1x32xf32, #tpu.memory_space<vmem>>, vector<1x1x32xf32>
    %33 = vector.shape_cast %32 : vector<1x1x32xf32> to vector<1x32xf32>
    %34 = arith.truncf %29 : vector<128x32xf32> to vector<128x32xbf16>
    %cst_22 = arith.constant dense<0.000000e+00> : vector<128x32xf32>
    %35 = tpu.matmul %34, %31, %cst_22 {dimension_numbers = #tpu.dot_dimension_numbers<[1], [0], [0], [1], [0, 0, 1, 1], [], []>} : vector<128x32xbf16>, vector<32x32xbf16>, vector<128x32xf32> -> vector<128x32xf32>
    %36 = vector.broadcast %33 : vector<1x32xf32> to vector<128x32xf32>
    %37 = arith.addf %35, %36 : vector<128x32xf32>
    %cst_23 = arith.constant 0.000000e+00 : f32
    %38 = vector.broadcast %cst_23 : f32 to vector<128x32xf32>
    %39 = arith.subf %38, %37 : vector<128x32xf32>
    %40 = math.exp %39 : vector<128x32xf32>
    %cst_24 = arith.constant 1.000000e+00 : f32
    %41 = vector.broadcast %cst_24 : f32 to vector<128x32xf32>
    %42 = arith.addf %41, %40 : vector<128x32xf32>
    %43 = tpu.reciprocal %42 {approx = true} : vector<128x32xf32> -> vector<128x32xf32>
    %44 = arith.mulf %37, %43 : vector<128x32xf32>
    %c0_25 = arith.constant 0 : index
    %c0_26 = arith.constant 0 : index
    %45 = vector.load %arg1[%c0_25, %c0_26] : memref<128x300xbf16, #tpu.memory_space<vmem>>, vector<128x300xbf16>
    %c0_27 = arith.constant 0 : index
    %c0_28 = arith.constant 0 : index
    %46 = vector.load %arg5[%c0_27, %c0_28] : memref<300x128xbf16, #tpu.memory_space<vmem>>, vector<300x128xbf16>
    %c0_29 = arith.constant 0 : index
    %c0_30 = arith.constant 0 : index
    %c0_31 = arith.constant 0 : index
    %47 = vector.load %arg7[%c0_29, %c0_30, %c0_31] : memref<3x1x128xf32, #tpu.memory_space<vmem>>, vector<1x1x128xf32>
    %48 = vector.shape_cast %47 : vector<1x1x128xf32> to vector<1x128xf32>
    %cst_32 = arith.constant dense<0.000000e+00> : vector<128x128xf32>
    %49 = tpu.matmul %45, %46, %cst_32 {dimension_numbers = #tpu.dot_dimension_numbers<[1], [0], [0], [1], [0, 0, 1, 1], [], []>} : vector<128x300xbf16>, vector<300x128xbf16>, vector<128x128xf32> -> vector<128x128xf32>
    %50 = vector.broadcast %48 : vector<1x128xf32> to vector<128x128xf32>
    %51 = arith.addf %49, %50 : vector<128x128xf32>
    %cst_33 = arith.constant 0.000000e+00 : f32
    %52 = vector.broadcast %cst_33 : f32 to vector<128x128xf32>
    %53 = arith.subf %52, %51 : vector<128x128xf32>
    %54 = math.exp %53 : vector<128x128xf32>
    %cst_34 = arith.constant 1.000000e+00 : f32
    %55 = vector.broadcast %cst_34 : f32 to vector<128x128xf32>
    %56 = arith.addf %55, %54 : vector<128x128xf32>
    %57 = tpu.reciprocal %56 {approx = true} : vector<128x128xf32> -> vector<128x128xf32>
    %58 = arith.mulf %51, %57 : vector<128x128xf32>
    %c0_35 = arith.constant 0 : index
    %c0_36 = arith.constant 0 : index
    %c0_37 = arith.constant 0 : index
    %59 = vector.load %arg6[%c0_35, %c0_36, %c0_37] : memref<2x128x128xbf16, #tpu.memory_space<vmem>>, vector<1x128x128xbf16>
    %60 = vector.shape_cast %59 : vector<1x128x128xbf16> to vector<128x128xbf16>
    %c1_38 = arith.constant 1 : index
    %c0_39 = arith.constant 0 : index
    %c0_40 = arith.constant 0 : index
    %61 = vector.load %arg7[%c1_38, %c0_39, %c0_40] : memref<3x1x128xf32, #tpu.memory_space<vmem>>, vector<1x1x128xf32>
    %62 = vector.shape_cast %61 : vector<1x1x128xf32> to vector<1x128xf32>
    %63 = arith.truncf %58 : vector<128x128xf32> to vector<128x128xbf16>
    %cst_41 = arith.constant dense<0.000000e+00> : vector<128x128xf32>
    %64 = tpu.matmul %63, %60, %cst_41 {dimension_numbers = #tpu.dot_dimension_numbers<[1], [0], [0], [1], [0, 0, 1, 1], [], []>} : vector<128x128xbf16>, vector<128x128xbf16>, vector<128x128xf32> -> vector<128x128xf32>
    %65 = vector.broadcast %62 : vector<1x128xf32> to vector<128x128xf32>
    %66 = arith.addf %64, %65 : vector<128x128xf32>
    %cst_42 = arith.constant 0.000000e+00 : f32
    %67 = vector.broadcast %cst_42 : f32 to vector<128x128xf32>
    %68 = arith.subf %67, %66 : vector<128x128xf32>
    %69 = math.exp %68 : vector<128x128xf32>
    %cst_43 = arith.constant 1.000000e+00 : f32
    %70 = vector.broadcast %cst_43 : f32 to vector<128x128xf32>
    %71 = arith.addf %70, %69 : vector<128x128xf32>
    %72 = tpu.reciprocal %71 {approx = true} : vector<128x128xf32> -> vector<128x128xf32>
    %73 = arith.mulf %66, %72 : vector<128x128xf32>
    %c1_44 = arith.constant 1 : index
    %c0_45 = arith.constant 0 : index
    %c0_46 = arith.constant 0 : index
    %74 = vector.load %arg6[%c1_44, %c0_45, %c0_46] : memref<2x128x128xbf16, #tpu.memory_space<vmem>>, vector<1x128x128xbf16>
    %75 = vector.shape_cast %74 : vector<1x128x128xbf16> to vector<128x128xbf16>
    %c2_47 = arith.constant 2 : index
    %c0_48 = arith.constant 0 : index
    %c0_49 = arith.constant 0 : index
    %76 = vector.load %arg7[%c2_47, %c0_48, %c0_49] : memref<3x1x128xf32, #tpu.memory_space<vmem>>, vector<1x1x128xf32>
    %77 = vector.shape_cast %76 : vector<1x1x128xf32> to vector<1x128xf32>
    %78 = arith.truncf %73 : vector<128x128xf32> to vector<128x128xbf16>
    %cst_50 = arith.constant dense<0.000000e+00> : vector<128x128xf32>
    %79 = tpu.matmul %78, %75, %cst_50 {dimension_numbers = #tpu.dot_dimension_numbers<[1], [0], [0], [1], [0, 0, 1, 1], [], []>} : vector<128x128xbf16>, vector<128x128xbf16>, vector<128x128xf32> -> vector<128x128xf32>
    %80 = vector.broadcast %77 : vector<1x128xf32> to vector<128x128xf32>
    %81 = arith.addf %79, %80 : vector<128x128xf32>
    %cst_51 = arith.constant 0.000000e+00 : f32
    %82 = vector.broadcast %cst_51 : f32 to vector<128x128xf32>
    %83 = arith.subf %82, %81 : vector<128x128xf32>
    %84 = math.exp %83 : vector<128x128xf32>
    %cst_52 = arith.constant 1.000000e+00 : f32
    %85 = vector.broadcast %cst_52 : f32 to vector<128x128xf32>
    %86 = arith.addf %85, %84 : vector<128x128xf32>
    %87 = tpu.reciprocal %86 {approx = true} : vector<128x128xf32> -> vector<128x128xf32>
    %88 = arith.mulf %81, %87 : vector<128x128xf32>
    %89 = arith.truncf %44 : vector<128x32xf32> to vector<128x32xbf16>
    %c0_53 = arith.constant 0 : index
    %c0_54 = arith.constant 0 : index
    %90 = vector.load %arg8[%c0_53, %c0_54] : memref<32x128xbf16, #tpu.memory_space<vmem>>, vector<32x128xbf16>
    %cst_55 = arith.constant dense<0.000000e+00> : vector<128x128xf32>
    %91 = tpu.matmul %89, %90, %cst_55 {dimension_numbers = #tpu.dot_dimension_numbers<[1], [0], [0], [1], [0, 0, 1, 1], [], []>} : vector<128x32xbf16>, vector<32x128xbf16>, vector<128x128xf32> -> vector<128x128xf32>
    %92 = arith.truncf %88 : vector<128x128xf32> to vector<128x128xbf16>
    %c0_56 = arith.constant 0 : index
    %c0_57 = arith.constant 0 : index
    %c0_58 = arith.constant 0 : index
    %93 = vector.load %arg9[%c0_56, %c0_57, %c0_58] : memref<4x128x128xbf16, #tpu.memory_space<vmem>>, vector<1x128x128xbf16>
    %94 = vector.shape_cast %93 : vector<1x128x128xbf16> to vector<128x128xbf16>
    %cst_59 = arith.constant dense<0.000000e+00> : vector<128x128xf32>
    %95 = tpu.matmul %92, %94, %cst_59 {dimension_numbers = #tpu.dot_dimension_numbers<[1], [0], [0], [1], [0, 0, 1, 1], [], []>} : vector<128x128xbf16>, vector<128x128xbf16>, vector<128x128xf32> -> vector<128x128xf32>
    %96 = arith.addf %91, %95 : vector<128x128xf32>
    %c0_60 = arith.constant 0 : index
    %c0_61 = arith.constant 0 : index
    %c0_62 = arith.constant 0 : index
    %97 = vector.load %arg10[%c0_60, %c0_61, %c0_62] : memref<4x1x128xf32, #tpu.memory_space<vmem>>, vector<1x1x128xf32>
    %98 = vector.shape_cast %97 : vector<1x1x128xf32> to vector<1x128xf32>
    %99 = vector.broadcast %98 : vector<1x128xf32> to vector<128x128xf32>
    %100 = arith.addf %96, %99 : vector<128x128xf32>
    %cst_63 = arith.constant 0.000000e+00 : f32
    %101 = vector.broadcast %cst_63 : f32 to vector<128x128xf32>
    %102 = arith.subf %101, %100 : vector<128x128xf32>
    %103 = math.exp %102 : vector<128x128xf32>
    %cst_64 = arith.constant 1.000000e+00 : f32
    %104 = vector.broadcast %cst_64 : f32 to vector<128x128xf32>
    %105 = arith.addf %104, %103 : vector<128x128xf32>
    %106 = tpu.reciprocal %105 {approx = true} : vector<128x128xf32> -> vector<128x128xf32>
    %107 = arith.mulf %100, %106 : vector<128x128xf32>
    %c1_65 = arith.constant 1 : index
    %c0_66 = arith.constant 0 : index
    %c0_67 = arith.constant 0 : index
    %108 = vector.load %arg9[%c1_65, %c0_66, %c0_67] : memref<4x128x128xbf16, #tpu.memory_space<vmem>>, vector<1x128x128xbf16>
    %109 = vector.shape_cast %108 : vector<1x128x128xbf16> to vector<128x128xbf16>
    %c1_68 = arith.constant 1 : index
    %c0_69 = arith.constant 0 : index
    %c0_70 = arith.constant 0 : index
    %110 = vector.load %arg10[%c1_68, %c0_69, %c0_70] : memref<4x1x128xf32, #tpu.memory_space<vmem>>, vector<1x1x128xf32>
    %111 = vector.shape_cast %110 : vector<1x1x128xf32> to vector<1x128xf32>
    %112 = arith.truncf %107 : vector<128x128xf32> to vector<128x128xbf16>
    %cst_71 = arith.constant dense<0.000000e+00> : vector<128x128xf32>
    %113 = tpu.matmul %112, %109, %cst_71 {dimension_numbers = #tpu.dot_dimension_numbers<[1], [0], [0], [1], [0, 0, 1, 1], [], []>} : vector<128x128xbf16>, vector<128x128xbf16>, vector<128x128xf32> -> vector<128x128xf32>
    %114 = vector.broadcast %111 : vector<1x128xf32> to vector<128x128xf32>
    %115 = arith.addf %113, %114 : vector<128x128xf32>
    %cst_72 = arith.constant 0.000000e+00 : f32
    %116 = vector.broadcast %cst_72 : f32 to vector<128x128xf32>
    %117 = arith.subf %116, %115 : vector<128x128xf32>
    %118 = math.exp %117 : vector<128x128xf32>
    %cst_73 = arith.constant 1.000000e+00 : f32
    %119 = vector.broadcast %cst_73 : f32 to vector<128x128xf32>
    %120 = arith.addf %119, %118 : vector<128x128xf32>
    %121 = tpu.reciprocal %120 {approx = true} : vector<128x128xf32> -> vector<128x128xf32>
    %122 = arith.mulf %115, %121 : vector<128x128xf32>
    %c2_74 = arith.constant 2 : index
    %c0_75 = arith.constant 0 : index
    %c0_76 = arith.constant 0 : index
    %123 = vector.load %arg9[%c2_74, %c0_75, %c0_76] : memref<4x128x128xbf16, #tpu.memory_space<vmem>>, vector<1x128x128xbf16>
    %124 = vector.shape_cast %123 : vector<1x128x128xbf16> to vector<128x128xbf16>
    %c2_77 = arith.constant 2 : index
    %c0_78 = arith.constant 0 : index
    %c0_79 = arith.constant 0 : index
    %125 = vector.load %arg10[%c2_77, %c0_78, %c0_79] : memref<4x1x128xf32, #tpu.memory_space<vmem>>, vector<1x1x128xf32>
    %126 = vector.shape_cast %125 : vector<1x1x128xf32> to vector<1x128xf32>
    %127 = arith.truncf %122 : vector<128x128xf32> to vector<128x128xbf16>
    %cst_80 = arith.constant dense<0.000000e+00> : vector<128x128xf32>
    %128 = tpu.matmul %127, %124, %cst_80 {dimension_numbers = #tpu.dot_dimension_numbers<[1], [0], [0], [1], [0, 0, 1, 1], [], []>} : vector<128x128xbf16>, vector<128x128xbf16>, vector<128x128xf32> -> vector<128x128xf32>
    %129 = vector.broadcast %126 : vector<1x128xf32> to vector<128x128xf32>
    %130 = arith.addf %128, %129 : vector<128x128xf32>
    %cst_81 = arith.constant 0.000000e+00 : f32
    %131 = vector.broadcast %cst_81 : f32 to vector<128x128xf32>
    %132 = arith.subf %131, %130 : vector<128x128xf32>
    %133 = math.exp %132 : vector<128x128xf32>
    %cst_82 = arith.constant 1.000000e+00 : f32
    %134 = vector.broadcast %cst_82 : f32 to vector<128x128xf32>
    %135 = arith.addf %134, %133 : vector<128x128xf32>
    %136 = tpu.reciprocal %135 {approx = true} : vector<128x128xf32> -> vector<128x128xf32>
    %137 = arith.mulf %130, %136 : vector<128x128xf32>
    %c3 = arith.constant 3 : index
    %c0_83 = arith.constant 0 : index
    %c0_84 = arith.constant 0 : index
    %138 = vector.load %arg9[%c3, %c0_83, %c0_84] : memref<4x128x128xbf16, #tpu.memory_space<vmem>>, vector<1x128x128xbf16>
    %139 = vector.shape_cast %138 : vector<1x128x128xbf16> to vector<128x128xbf16>
    %c3_85 = arith.constant 3 : index
    %c0_86 = arith.constant 0 : index
    %c0_87 = arith.constant 0 : index
    %140 = vector.load %arg10[%c3_85, %c0_86, %c0_87] : memref<4x1x128xf32, #tpu.memory_space<vmem>>, vector<1x1x128xf32>
    %141 = vector.shape_cast %140 : vector<1x1x128xf32> to vector<1x128xf32>
    %142 = arith.truncf %137 : vector<128x128xf32> to vector<128x128xbf16>
    %cst_88 = arith.constant dense<0.000000e+00> : vector<128x128xf32>
    %143 = tpu.matmul %142, %139, %cst_88 {dimension_numbers = #tpu.dot_dimension_numbers<[1], [0], [0], [1], [0, 0, 1, 1], [], []>} : vector<128x128xbf16>, vector<128x128xbf16>, vector<128x128xf32> -> vector<128x128xf32>
    %144 = vector.broadcast %141 : vector<1x128xf32> to vector<128x128xf32>
    %145 = arith.addf %143, %144 : vector<128x128xf32>
    %c0_89 = arith.constant 0 : index
    %c0_90 = arith.constant 0 : index
    %146 = vector.load %arg11[%c0_89, %c0_90] : memref<128x128xf32, #tpu.memory_space<vmem>>, vector<128x128xf32>
    tpu.vector_store %arg11[%c0_89, %c0_90], %145 {strides = array<i32>} : memref<128x128xf32, #tpu.memory_space<vmem>>, vector<128x128xf32>,
    return
  }
  func.func @transform_0(%arg0: i32) -> (i32, i32) {
    %c0_i32 = arith.constant 0 : i32
    %c0_i32_0 = arith.constant 0 : i32
    return %arg0, %c0_i32 : i32, i32
  }
  func.func @transform_1(%arg0: i32) -> (i32, i32) {
    %c0_i32 = arith.constant 0 : i32
    %c0_i32_0 = arith.constant 0 : i32
    return %arg0, %c0_i32 : i32, i32
  }
  func.func @transform_2(%arg0: i32) -> (i32, i32, i32) {
    %c0_i32 = arith.constant 0 : i32
    %c0_i32_0 = arith.constant 0 : i32
    %c0_i32_1 = arith.constant 0 : i32
    %c0_i32_2 = arith.constant 0 : i32
    return %c0_i32, %c0_i32_0, %c0_i32_1 : i32, i32, i32
  }
  func.func @transform_3(%arg0: i32) -> (i32, i32, i32) {
    %c0_i32 = arith.constant 0 : i32
    %c0_i32_0 = arith.constant 0 : i32
    %c0_i32_1 = arith.constant 0 : i32
    %c0_i32_2 = arith.constant 0 : i32
    return %c0_i32, %c0_i32_0, %c0_i32_1 : i32, i32, i32
  }
  func.func @transform_4(%arg0: i32) -> (i32, i32) {
    %c0_i32 = arith.constant 0 : i32
    %c0_i32_0 = arith.constant 0 : i32
    %c0_i32_1 = arith.constant 0 : i32
    return %c0_i32, %c0_i32_0 : i32, i32
  }
  func.func @transform_5(%arg0: i32) -> (i32, i32, i32) {
    %c0_i32 = arith.constant 0 : i32
    %c0_i32_0 = arith.constant 0 : i32
    %c0_i32_1 = arith.constant 0 : i32
    %c0_i32_2 = arith.constant 0 : i32
    return %c0_i32, %c0_i32_0, %c0_i32_1 : i32, i32, i32
  }
  func.func @transform_6(%arg0: i32) -> (i32, i32, i32) {
    %c0_i32 = arith.constant 0 : i32
    %c0_i32_0 = arith.constant 0 : i32
    %c0_i32_1 = arith.constant 0 : i32
    %c0_i32_2 = arith.constant 0 : i32
    return %c0_i32, %c0_i32_0, %c0_i32_1 : i32, i32, i32
  }
  func.func @transform_7(%arg0: i32) -> (i32, i32) {
    %c0_i32 = arith.constant 0 : i32
    %c0_i32_0 = arith.constant 0 : i32
    %c0_i32_1 = arith.constant 0 : i32
    return %c0_i32, %c0_i32_0 : i32, i32
  }
  func.func @transform_8(%arg0: i32) -> (i32, i32, i32) {
    %c0_i32 = arith.constant 0 : i32
    %c0_i32_0 = arith.constant 0 : i32
    %c0_i32_1 = arith.constant 0 : i32
    %c0_i32_2 = arith.constant 0 : i32
    return %c0_i32, %c0_i32_0, %c0_i32_1 : i32, i32, i32
  }
  func.func @transform_9(%arg0: i32) -> (i32, i32, i32) {
    %c0_i32 = arith.constant 0 : i32
    %c0_i32_0 = arith.constant 0 : i32
    %c0_i32_1 = arith.constant 0 : i32
    %c0_i32_2 = arith.constant 0 : i32
    return %c0_i32, %c0_i32_0, %c0_i32_1 : i32, i32, i32
  }
  func.func @transform_10(%arg0: i32) -> (i32, i32) {
    %c0_i32 = arith.constant 0 : i32
    %c0_i32_0 = arith.constant 0 : i32
    return %arg0, %c0_i32 : i32, i32
  }
}

</mosaic_0001>

<bundles_post_ra>
// kernel: mlp_forward.1
= control target key start
LH: loop header
LB: loop body
LE: loop exit
PB: predicated region body
PF: predicated region fallthrough
CT: control target
= control target key end

     0   :  { %s5143_s13 = smov 0   ;;  %s6362_s0 = inlined_call_operand.vmem [shape: bf16[256,300], index: 0, kind: input, shape index: {}]   ;;  %s6363_s1 = inlined_call_operand.vmem [shape: bf16[256,32], index: 1, kind: input, shape index: {}]   ;;  %s6364_s2 = inlined_call_operand.vmem [shape: bf16[3,32,32], index: 2, kind: input, shape index: {}]   ;;  %s6365_s3 = inlined_call_operand.vmem [shape: f32[3,1,32], index: 3, kind: input, shape index: {}]   ;;  %s6366_s4 = inlined_call_operand.vmem [shape: bf16[300,128], index: 4, kind: input, shape index: {}]   ;;  %s6367_s5 = inlined_call_operand.vmem [shape: bf16[2,128,128], index: 5, kind: input, shape index: {}]   ;;  %s6368_s6 = inlined_call_operand.vmem [shape: f32[3,1,128], index: 6, kind: input, shape index: {}]   ;;  %s6369_s7 = inlined_call_operand.vmem [shape: bf16[32,128], index: 7, kind: input, shape index: {}]   ;;  %s6370_s8 = inlined_call_operand.vmem [shape: bf16[4,128,128], index: 8, kind: input, shape index: {}]   ;;  %s6371_s9 = inlined_call_operand.vmem [shape: f32[4,1,128], index: 9, kind: input, shape index: {}]   ;;  %s6372_s10 = inlined_call_operand.vmem [shape: f32[256,128], index: 10, kind: output, shape index: {}]  }
   0x1 LB: > { %s3605_s14 = sadd.s32 4294967295, %s5086_s13   ;;  %p3609_p0 = scmp.ge.s32.totalorder %s5086_s13, 1  ;;  %s5086_s13 = sphi %s5143_s13, %s20_s13  }
   0x2   : > { %p325_p1 = scmp.lt.s32.totalorder %s5086_s13, 3 }
   0x4   : > { %p326_p2 = pnand %p3609_p0, %p325_p1 }
   0x5   : > { %v4389_v0 = vld [vmem:[%s6364_s2] sm:$0xff] (!%p326_p2)   ;;  %s3610_s17 = sshll.u32 (!%p326_p2), %s3605_s14, 4  ;;  %v4390_v1 = vld [vmem:[%s6364_s2 + $0x8] sm:$0xff] (!%p326_p2)   ;;  %vm468_vm0 = vcmask (!%p326_p2), 261120   ;;  %v4399_v10 = vld [vmem:[%s6364_s2 + $0x10] sm:$0xff] (!%p326_p2)   ;;  %vm1521_vm1 = vcmask (!%p326_p2), 1045504  }
   0x6   : > { %329 = sbr.rel (%p326_p2) target bundleno = 2343 (0x927), region = 60  ;;  %p370_p3 = scmp.lt.s32.totalorder (!%p326_p2), %s3610_s17, 31  ;;  %4065 = vmatprep.subr.bf16.mxu0 (!%p326_p2), %v4389_v0  ;;  %4359 = vmatprep.subr.bf16.mxu1 (!%p326_p2), %v4389_v0  ;;  %v4400_v11 = vld [vmem:[%s6364_s2 + $0x18] sm:$0xff] (!%p326_p2)   ;;  %v5186_v12 = vld [vmem:[%s6365_s3] ss:$0 sm:$0xff] (!%p326_p2)  ;;  %vm1496_vm2 = vcmask (!%p326_p2), 359424  }
   0x7   : > { %4066 = vmatpush3.bf16.msra.mxu0 (!%p326_p2), %v4389_v0  ;;  %4361 = vmatpush3.bf16.msra.mxu1 (!%p326_p2), %v4389_v0 }
   0x8   : > { %4067 = vmatprep.subr.bf16.mxu0 (!%p326_p2), %v4390_v1  ;;  %4360 = vmatprep.subr.bf16.mxu1 (!%p326_p2), %v4390_v1 }
   0xb   : > { %4068 = vmatpush3.bf16.msra.mxu0 (!%p326_p2), %v4390_v1  ;;  %4362 = vmatpush3.bf16.msra.mxu1 (!%p326_p2), %v4390_v1 }
   0xc   : > { %4085 = vmatprep.subr.bf16.mxu1 (!%p326_p2), %v4399_v10 }
   0xd   : > { %s6374_s17 = smov (!%p370_p3, %s3610_s17), 31 }
   0xe   : > { %s3613_s20 = sshll.u32 %s6374_s17, 2  ;;  %s4380_s24 = smul.u32 12, %s6374_s17 }
   0xf   : > { %s380_s23 = scalar_lea.vmem %s6363_s1, %s3613_s20  ;;  %s3615_s12 = sshll.u32 %s6374_s17, 3 }
  0x10   : > { %v4391_v2 = vld [vmem:[%s380_s23] sm:$0xff]   ;;  %v4393_v4 = vld [vmem:[%s380_s23 + $0x8] sm:$0xff]   ;;  %v4395_v6 = vld [vmem:[%s380_s23 + $0x10] sm:$0xff]   ;;  %s5175_s27 = scalar_lea.vmem %s6362_s0, %s4380_s24  ;;  %s6341_s19 = scalar_lea.vmem %s6372_s10, %s3615_s12 }
  0x11   : > { %v4392_v3 = vld [vmem:[%s380_s23 + $0x20] sm:$0xff]   ;;  %4069 = vmatprep.mubr.msk.bf16.mxu0 %vm468_vm0, %v4391_v2  ;;  %v4394_v5 = vld [vmem:[%s380_s23 + $0x28] sm:$0xff]   ;;  %v4396_v7 = vld [vmem:[%s380_s23 + $0x30] sm:$0xff]  }
  0x12   : > { %4077 = vmatprep.mubr.msk.bf16.mxu1 %vm468_vm0, %v4392_v3  ;;  %4070 = vmatmul.mubr.msk.bf16.vlgmr.msra.gmra.mrb[0].mxu0 %vm468_vm0, %v4393_v4  ;;  %v4397_v8 = vld [vmem:[%s380_s23 + $0x18] sm:$0xff]  }
  0x13   : > { %4078 = vmatmul.mubr.msk.bf16.vlgmr.msra.gmra.mrb[0].mxu1 %vm468_vm0, %v4394_v5  ;;  %4073 = vmatprep.mubr.msk.bf16.mxu0 %vm468_vm0, %v4395_v6  ;;  %v4398_v9 = vld [vmem:[%s380_s23 + $0x38] sm:$0xff]  }
  0x14   : > { %4081 = vmatprep.mubr.msk.bf16.mxu1 %vm468_vm0, %v4396_v7  ;;  %4086 = vmatpush3.bf16.msra.mxu1 %v4399_v10 }
  0x15   : > { %4087 = vmatprep.subr.bf16.mxu1 %v4400_v11 }
  0x18   : > { %4088 = vmatpush3.bf16.msra.mxu1 %v4400_v11 }
  0x1a   : > { %4074 = vmatmul.mubr.msk.bf16.gmra.mrb[4].mxu0 %vm468_vm0, %v4397_v8 }
  0x1b   : > { %4082 = vmatmul.mubr.msk.bf16.gmra.mrb[4].mxu1 %vm468_vm0, %v4398_v9 }
  0xe5   : > { %v4071_v13 = vpop.f32.mrb[0].mxu0 }
  0xe6   : > { %v5189_v14 = vadd.f32 %v4071_v13, %v5186_v12  ;;  %v4079_v15 = vpop.f32.mrb[0].mxu1  ;;  %v527_v16 = vpop.f32.mrb[1].mxu0 }
  0xe7   : > { %v5192_v17 = vadd.f32 %v4079_v15, %v5186_v12  ;;  %v5195_v18 = vadd.f32 %v5186_v12, %v527_v16  ;;  %v559_v19 = vpop.f32.mrb[1].mxu1  ;;  %v4072_v20 = vpop.f32.mrb[2].mxu0 }
  0xe8   : > { %v592_v21 = vsub.f32 0.0, %v5189_v14  ;;  %v5199_v22 = vadd.f32 %v5186_v12, %v559_v19  ;;  %v5202_v23 = vadd.f32 %v4072_v20, %v5186_v12  ;;  %v4080_v24 = vpop.f32.mrb[2].mxu1  ;;  %v530_v25 = vpop.f32.mrb[3].mxu0 }
  0xe9   : > { %v600_v26 = vsub.f32 0.0, %v5192_v17  ;;  %v590_v27 = vsub.f32 0.0, %v5195_v18  ;;  %v5207_v28 = vadd.f32 %v4080_v24, %v5186_v12  ;;  %v5210_v29 = vadd.f32 %v5186_v12, %v530_v25  ;;  %v562_v30 = vpop.f32.mrb[3].mxu1 }
  0xea   : > { %v610_v31 = vmul.f32 1.442695, %v592_v21  ;;  %v598_v32 = vsub.f32 0.0, %v5199_v22  ;;  %v593_v33 = vsub.f32 0.0, %v5202_v23  ;;  %v5215_v34 = vadd.f32 %v5186_v12, %v562_v30 }
  0xeb   : > { %v626_v35 = vmul.f32 1.442695, %v600_v26  ;;  %v606_v36 = vmul.f32 1.442695, %v590_v27  ;;  %v601_v37 = vsub.f32 0.0, %v5207_v28  ;;  %v591_v38 = vsub.f32 0.0, %v5210_v29 }
  0xec   : > { %4504 = vpow2.f32 %v610_v31  ;;  %v622_v39 = vmul.f32 1.442695, %v598_v32  ;;  %v612_v40 = vmul.f32 1.442695, %v593_v33  ;;  %v599_v41 = vsub.f32 0.0, %v5215_v34 }
  0xed   : > { %4506 = vpow2.f32 %v626_v35  ;;  %v628_v42 = vmul.f32 1.442695, %v601_v37  ;;  %v4075_v43 = vpop.f32.mrb[4].mxu0  ;;  %v608_v44 = vmul.f32 1.442695, %v591_v38 }
  0xee   : > { %4508 = vpow2.f32 %v606_v36  ;;  %v5221_v45 = vadd.f32 %v4075_v43, %v5186_v12  ;;  %v4083_v46 = vpop.f32.mrb[4].mxu1  ;;  %v543_v47 = vpop.f32.mrb[5].mxu0  ;;  %v624_v48 = vmul.f32 1.442695, %v599_v41 }
  0xef   : > { %4510 = vpow2.f32 %v622_v39  ;;  %v5224_v49 = vadd.f32 %v4083_v46, %v5186_v12  ;;  %v5227_v50 = vadd.f32 %v5186_v12, %v543_v47  ;;  %v575_v51 = vpop.f32.mrb[5].mxu1  ;;  %v4076_v52 = vpop.f32.mrb[6].mxu0 }
  0xf0   : > { %4512 = vpow2.f32 %v612_v40  ;;  %v596_v53 = vsub.f32 0.0, %v5221_v45  ;;  %v5231_v54 = vadd.f32 %v4076_v52, %v5186_v12  ;;  %v4084_v55 = vpop.f32.mrb[6].mxu1  ;;  %v546_v56 = vpop.f32.mrb[7].mxu0  ;;  %v5237_v1 = vadd.f32 %v5186_v12, %v575_v51 }
  0xf1   : > { %4514 = vpow2.f32 %v628_v42  ;;  %v604_v57 = vsub.f32 0.0, %v5224_v49  ;;  %v594_v58 = vsub.f32 0.0, %v5227_v50  ;;  %v578_v59 = vpop.f32.mrb[7].mxu1  ;;  %v5241_v13 = vadd.f32 %v4084_v55, %v5186_v12 }
  0xf2   : > { %4516 = vpow2.f32 %v608_v44  ;;  %v618_v60 = vmul.f32 1.442695, %v596_v53  ;;  %v597_v61 = vsub.f32 0.0, %v5231_v54  ;;  %v602_v9 = vsub.f32 0.0, %v5237_v1 }
  0xf3   : > { %4518 = vpow2.f32 %v624_v48  ;;  %v634_v62 = vmul.f32 1.442695, %v604_v57  ;;  %v614_v63 = vmul.f32 1.442695, %v594_v58  ;;  %v5244_v19 = vadd.f32 %v5186_v12, %v546_v56 }
  0xf4   : > { %4520 = vpow2.f32 %v618_v60  ;;  %v620_v0 = vmul.f32 1.442695, %v597_v61  ;;  %v5247_v24 = vadd.f32 %v5186_v12, %v578_v59  ;;  %v630_v27 = vmul.f32 1.442695, %v602_v9 }
  0xf5   : > { %4522 = vpow2.f32 %v634_v62  ;;  %v605_v32 = vsub.f32 0.0, %v5241_v13  ;;  %v595_v35 = vsub.f32 0.0, %v5244_v19 }
  0xf6   : > { %v4505_v2 = vpop.eup %4504  ;;  %4524 = vpow2.f32 %v614_v63  ;;  %v603_v37 = vsub.f32 0.0, %v5247_v24 }
  0xf7   : > { %v4507_v3 = vpop.eup %4506  ;;  %v640_v4 = vadd.f32 1.0, %v4505_v2  ;;  %4526 = vpow2.f32 %v620_v0  ;;  %v636_v39 = vmul.f32 1.442695, %v605_v32  ;;  %v616_v42 = vmul.f32 1.442695, %v595_v35 }
  0xf8   : > { %v4509_v5 = vpop.eup %4508  ;;  %v648_v6 = vadd.f32 1.0, %v4507_v3  ;;  %v632_v44 = vmul.f32 1.442695, %v603_v37  ;;  %v4408_v37 = vld [vmem:[%s6366_s4 + $0x18] sm:$0xff]  }
  0xf9   : > { %v4511_v7 = vpop.eup %4510  ;;  %4528 = vrcp.f32 %v640_v4  ;;  %v638_v8 = vadd.f32 1.0, %v4509_v5 }
  0xfa   : > { %v4513_v10 = vpop.eup %4512  ;;  %4530 = vrcp.f32 %v648_v6  ;;  %v646_v11 = vadd.f32 1.0, %v4511_v7 }
  0xfb   : > { %v4515_v15 = vpop.eup %4514  ;;  %4532 = vrcp.f32 %v638_v8  ;;  %v641_v16 = vadd.f32 1.0, %v4513_v10 }
  0xfc   : > { %v4517_v20 = vpop.eup %4516  ;;  %4534 = vrcp.f32 %v646_v11  ;;  %v649_v21 = vadd.f32 1.0, %v4515_v15 }
  0xfd   : > { %v4519_v25 = vpop.eup %4518  ;;  %4536 = vrcp.f32 %v641_v16  ;;  %v639_v26 = vadd.f32 1.0, %v4517_v20 }
  0xfe   : > { %v4521_v30 = vpop.eup %4520  ;;  %4538 = vrcp.f32 %v649_v21  ;;  %v647_v31 = vadd.f32 1.0, %v4519_v25 }
  0xff   : > { %4540 = vrcp.f32 %v639_v26  ;;  %v644_v33 = vadd.f32 1.0, %v4521_v30  ;;  %v4523_v36 = vpop.eup %4522 }
 0x100   : > { %4542 = vrcp.f32 %v647_v31  ;;  %v4525_v38 = vpop.eup %4524 }
 0x101   : > { %4544 = vpow2.f32 %v630_v27  ;;  %v4527_v12 = vpop.eup %4526  ;;  %v642_v5 = vadd.f32 1.0, %v4525_v38  ;;  %v4409_v38 = vld [vmem:[%s6366_s4 + $0x60] sm:$0xff]  }
 0x102   : > { %4546 = vrcp.f32 %v644_v33  ;;  %v645_v41 = vadd.f32 1.0, %v4527_v12  ;;  %v4410_v12 = vld [vmem:[%s6366_s4 + $0x20] sm:$0xff]  }
 0x103   : > { %v4529_v40 = vpop.eup %4528 }
 0x104   : > { %v4531_v43 = vpop.eup %4530  ;;  %4548 = vrcp.f32 %v645_v41  ;;  %v672_v52 = vmul.f32 %v4529_v40, %v5189_v14  ;;  %v4413_v40 = vld [vmem:[%s6366_s4 + $0x28] sm:$0xff]   ;;  %v4414_v41 = vld [vmem:[%s6366_s4 + $0x70] sm:$0xff]  }
 0x105   : > { %v4533_v46 = vpop.eup %4532  ;;  %4550 = vpow2.f32 %v636_v39  ;;  %v680_v56 = vmul.f32 %v4531_v43, %v5192_v17  ;;  %v4411_v39 = vld [vmem:[%s6366_s4 + $0x68] sm:$0xff]   ;;  %v4416_v43 = vld [vmem:[%s6366_s4 + $0x78] sm:$0xff]  }
 0x106   : > { %v4535_v47 = vpop.eup %4534  ;;  %4552 = vpow2.f32 %v616_v42  ;;  %v670_v59 = vmul.f32 %v4533_v46, %v5195_v18  ;;  %v4415_v42 = vld [vmem:[%s6366_s4 + $0x30] sm:$0xff]   ;;  %v4412_v46 = vld [vmem:[%s6364_s2 + $0x20] sm:$0xff]  }
 0x107   : > { %v4537_v48 = vpop.eup %4536  ;;  %4554 = vpow2.f32 %v632_v44  ;;  %v678_v63 = vmul.f32 %v4535_v47, %v5199_v22  ;;  %v4418_v44 = vld [vmem:[%s6366_s4 + $0x38] sm:$0xff]   ;;  %v4421_v47 = vld [vmem:[%s5175_s27 + $0x4] ss:$12 sps:$4 sm:$0xff]   ;;  %4105 = vmatprep.subr.bf16.mxu0 %v4412_v46 }
 0x108   : > { %v4539_v51 = vpop.eup %4538  ;;  %v673_v53 = vmul.f32 %v4537_v48, %v5202_v23  ;;  %v652_v23 = vadd.f32 1.0, %v4523_v36  ;;  %v4407_v36 = vld [vmem:[%s6366_s4 + $0x58] sm:$0xff]   ;;  %v4419_v48 = vld [vmem:[%s5175_s27] ss:$12 sps:$4 sm:$0xff]   ;;  %4106 = vmatpush3.bf16.msra.mxu0 %v4412_v46 }
 0x109   : > { %v4541_v55 = vpop.eup %4540  ;;  %v681_v57 = vmul.f32 %v4539_v51, %v5207_v28  ;;  %v4417_v51 = vld [vmem:[%s6364_s2 + $0x28] sm:$0xff]  }
 0x10a   : > { %v4543_v58 = vpop.eup %4542  ;;  %v694_v60 = vpack.c.bf16 %v673_v53, %v672_v52  ;;  %v671_v61 = vmul.f32 %v4541_v55, %v5210_v29  ;;  %4556 = vrcp.f32 %v652_v23  ;;  %4107 = vmatprep.subr.bf16.mxu0 %v4417_v51  ;;  %v4423_v52 = vld [vmem:[%s5175_s27 + $0x1c] ss:$12 sps:$4 sm:$0xff]   ;;  %v4425_v53 = vld [vmem:[%s5175_s27 + $0x18] ss:$12 sps:$4 sm:$0xff]   ;;  %v4426_v55 = vld [vmem:[%s5175_s27 + $0x34] ss:$12 sps:$4 sm:$0xff]  }
 0x10b   : > { %v4545_v62 = vpop.eup %4544  ;;  %v698_v0 = vpack.c.bf16 %v681_v57, %v680_v56  ;;  %v679_v14 = vmul.f32 %v4543_v58, %v5215_v34  ;;  %4558 = vrcp.f32 %v642_v5  ;;  %v4428_v56 = vld [vmem:[%s5175_s27 + $0x30] ss:$12 sps:$4 sm:$0xff]   ;;  %v4430_v57 = vld [vmem:[%s5175_s27 + $0x4c] ss:$12 sps:$4 sm:$0xff]   ;;  %v4432_v58 = vld [vmem:[%s5175_s27 + $0x48] ss:$12 sps:$4 sm:$0xff]  }
 0x10c   : > { %v693_v2 = vpack.c.bf16 %v671_v61, %v670_v59  ;;  %v4547_v3 = vpop.eup %4546  ;;  %v650_v17 = vadd.f32 1.0, %v4545_v62  ;;  %4108 = vmatpush3.bf16.msra.mxu0 %v4417_v51  ;;  %v5341_v59 = vld [vmem:[%s6366_s4 + $0x80] sm:$0xff]   ;;  %v4439_v62 = vld [vmem:[%s5175_s27 + $0x7c] ss:$12 sps:$4 sm:$0xff]  }
 0x10d   : > { %v697_v4 = vpack.c.bf16 %v679_v14, %v678_v63  ;;  %v676_v29 = vmul.f32 %v4547_v3, %v5221_v45  ;;  %4125 = vmatprep.subr.bf16.mxu0 %v5341_v59  ;;  %v4436_v61 = vld [vmem:[%s5175_s27 + $0x60] ss:$12 sps:$4 sm:$0xff]   ;;  %v4441_v63 = vld [vmem:[%s5175_s27 + $0x78] ss:$12 sps:$4 sm:$0xff]   ;;  %v4446_v14 = vld [vmem:[%s5175_s27 + $0x90] ss:$12 sps:$4 sm:$0xff]  }
 0x10e   : > { %4089 = vmatprep.mubr.msk.bf16.mxu1 %vm468_vm0, %v693_v2  ;;  %v4549_v28 = vpop.eup %4548  ;;  %4560 = vrcp.f32 %v650_v17  ;;  %v4449_v2 = vld [vmem:[%s5175_s27 + $0xac] ss:$12 sps:$4 sm:$0xff]   ;;  %v4451_v23 = vld [vmem:[%s5175_s27 + $0xa8] ss:$12 sps:$4 sm:$0xff]   ;;  %v5355_v3 = vld [vmem:[%s6365_s3 + $0x1] ss:$0 sm:$0xff] }
 0x10f   : > { %4090 = vmatmul.mubr.msk.bf16.vlgmr.msra.gmra.mrb[8].mxu1 %vm468_vm0, %v694_v60  ;;  %v4551_v18 = vpop.eup %4550  ;;  %v677_v22 = vmul.f32 %v4549_v28, %v5231_v54  ;;  %v4434_v60 = vld [vmem:[%s5175_s27 + $0x64] ss:$12 sps:$4 sm:$0xff]  }
 0x110   : > { %v4553_v6 = vpop.eup %4552  ;;  %v653_v34 = vadd.f32 1.0, %v4551_v18 }
 0x111   : > { %v4555_v7 = vpop.eup %4554  ;;  %v696_v8 = vpack.c.bf16 %v677_v22, %v676_v29  ;;  %v643_v9 = vadd.f32 1.0, %v4553_v6 }
 0x112   : > { %4562 = vrcp.f32 %v653_v34  ;;  %v651_v10 = vadd.f32 1.0, %v4555_v7 }
 0x113   : > { %4564 = vrcp.f32 %v643_v9 }
 0x114   : > { %4566 = vrcp.f32 %v651_v10  ;;  %v4557_v11 = vpop.eup %4556 }
 0x115   : > { %v4559_v15 = vpop.eup %4558  ;;  %v684_v45 = vmul.f32 %v4557_v11, %v5224_v49  ;;  %v4401_v49 = vld [vmem:[%s6366_s4 + $0x40] sm:$0xff]  }
 0x116   : > { %v674_v26 = vmul.f32 %v4559_v15, %v5227_v50  ;;  %v4402_v50 = vld [vmem:[%s6366_s4] sm:$0xff]   ;;  %3884 = vmatprep.subr.bf16.mxu1 %v4401_v49 }
 0x117   : > { %3885 = vmatpush3.bf16.msra.mxu1 %v4402_v50 }
 0x118   : > { %v4561_v16 = vpop.eup %4560 }
 0x119   : > { %v682_v30 = vmul.f32 %v4561_v16, %v5237_v1  ;;  %v4403_v1 = vld [vmem:[%s6366_s4 + $0x48] sm:$0xff]  }
 0x11a   : > { %3886 = vmatprep.subr.bf16.mxu1 %v4403_v1 }
 0x11c   : > { %v4563_v20 = vpop.eup %4562 }
 0x11d   : > { %v4565_v21 = vpop.eup %4564  ;;  %v685_v54 = vmul.f32 %v4563_v20, %v5241_v13  ;;  %v4404_v13 = vld [vmem:[%s6366_s4 + $0x8] sm:$0xff]  }
 0x11e   : > { %v4567_v25 = vpop.eup %4566  ;;  %v675_v27 = vmul.f32 %v4565_v21, %v5244_v19  ;;  %3887 = vmatpush3.bf16.msra.mxu1 %v4404_v13  ;;  %v4405_v19 = vld [vmem:[%s6366_s4 + $0x50] sm:$0xff]  }
 0x11f   : > { %v700_v31 = vpack.c.bf16 %v685_v54, %v684_v45  ;;  %v683_v32 = vmul.f32 %v4567_v25, %v5247_v24  ;;  %v4406_v24 = vld [vmem:[%s6366_s4 + $0x10] sm:$0xff]   ;;  %3888 = vmatprep.subr.bf16.mxu1 %v4405_v19 }
 0x120   : > { %v695_v33 = vpack.c.bf16 %v675_v27, %v674_v26 }
 0x121   : > { %v699_v35 = vpack.c.bf16 %v683_v32, %v682_v30 }
 0x122   : > { %4093 = vmatprep.mubr.msk.bf16.mxu1 %vm468_vm0, %v695_v33  ;;  %3889 = vmatpush3.bf16.msra.mxu1 %v4406_v24 }
 0x123   : > { %4094 = vmatmul.mubr.msk.bf16.gmra.mrb[12].mxu1 %vm468_vm0, %v696_v8  ;;  %3890 = vmatprep.subr.bf16.mxu1 %v4407_v36 }
 0x124   : > { %4097 = vmatprep.mubr.msk.bf16.mxu1 %vm468_vm0, %v697_v4 }
 0x126   : > { %3891 = vmatpush3.bf16.msra.mxu1 %v4408_v37 }
 0x127   : > { %3892 = vmatprep.subr.bf16.mxu1 %v4409_v38 }
 0x12a   : > { %3893 = vmatpush3.bf16.msra.mxu1 %v4410_v12 }
 0x12b   : > { %4098 = vmatmul.mubr.msk.bf16.gmra.mrb[16].mxu1 %vm468_vm0, %v698_v0  ;;  %3894 = vmatprep.subr.bf16.mxu1 %v4411_v39  ;;  %v4444_v0 = vld [vmem:[%s5175_s27 + $0x94] ss:$12 sps:$4 sm:$0xff]  }
 0x12c   : > { %4101 = vmatprep.mubr.msk.bf16.mxu1 %vm468_vm0, %v699_v35 }
 0x12e   : > { %3895 = vmatpush3.bf16.msra.mxu1 %v4413_v40 }
 0x12f   : > { %3896 = vmatprep.subr.bf16.mxu1 %v4414_v41 }
 0x132   : > { %3897 = vmatpush3.bf16.msra.mxu1 %v4415_v42 }
 0x133   : > { %4102 = vmatmul.mubr.msk.bf16.gmra.mrb[20].mxu1 %vm468_vm0, %v700_v31  ;;  %3898 = vmatprep.subr.bf16.mxu1 %v4416_v43 }
 0x134   : > { %1557 = vmatprep.mubr.bf16.mxu1 %v4421_v47 }
 0x136   : > { %3899 = vmatpush3.bf16.msra.mxu1 %v4418_v44 }
 0x13b   : > { %1558 = vmatmul.mubr.bf16.vlgmr.msra.gmra.mrb[24].mxu1 %v4419_v48 }
 0x13c   : > { %1565 = vmatprep.mubr.bf16.mxu1 %v4423_v52 }
 0x143   : > { %1566 = vmatmul.mubr.bf16.gmra.mrb[28].mxu1 %v4425_v53 }
 0x144   : > { %1573 = vmatprep.mubr.bf16.mxu1 %v4426_v55 }
 0x14b   : > { %1574 = vmatmul.mubr.bf16.gmra.mrb[32].mxu1 %v4428_v56 }
 0x14c   : > { %1581 = vmatprep.mubr.bf16.mxu1 %v4430_v57 }
 0x153   : > { %1582 = vmatmul.mubr.bf16.gmra.mrb[36].mxu1 %v4432_v58 }
 0x154   : > { %1589 = vmatprep.mubr.bf16.mxu1 %v4434_v60 }
 0x15b   : > { %1590 = vmatmul.mubr.bf16.gmra.mrb[40].mxu1 %v4436_v61 }
 0x15c   : > { %1597 = vmatprep.mubr.bf16.mxu1 %v4439_v62 }
 0x163   : > { %1598 = vmatmul.mubr.bf16.gmra.mrb[44].mxu1 %v4441_v63 }
 0x164   : > { %1605 = vmatprep.mubr.bf16.mxu1 %v4444_v0 }
 0x16b   : > { %1606 = vmatmul.mubr.bf16.gmra.mrb[48].mxu1 %v4446_v14 }
 0x16c   : > { %1613 = vmatprep.mubr.bf16.mxu1 %v4449_v2 }
 0x173   : > { %1614 = vmatmul.mubr.bf16.gmra.mrb[52].mxu1 %v4451_v23 }
 0x1e2   : > { %v4091_v4 = vpop.f32.mrb[8].mxu1 }
 0x1e3   : > { %v5358_v5 = vadd.f32 %v4091_v4, %v5355_v3  ;;  %v777_v17 = vpop.f32.mrb[9].mxu1 }
 0x1e4   : > { %v5361_v28 = vadd.f32 %v5355_v3, %v777_v17  ;;  %v4092_v18 = vpop.f32.mrb[10].mxu1 }
 0x1e5   : > { %v842_v29 = vsub.f32 0.0, %v5358_v5  ;;  %v789_v22 = vadd.f32 %v4092_v18, %v5355_v3  ;;  %v780_v6 = vpop.f32.mrb[11].mxu1 }
 0x1e6   : > { %v840_v34 = vsub.f32 0.0, %v5361_v28  ;;  %v781_v7 = vadd.f32 %v5355_v3, %v780_v6 }
 0x1e7   : > { %v860_v8 = vmul.f32 1.442695, %v842_v29  ;;  %v843_v9 = vsub.f32 0.0, %v789_v22 }
 0x1e8   : > { %v856_v10 = vmul.f32 1.442695, %v840_v34  ;;  %v841_v11 = vsub.f32 0.0, %v781_v7 }
 0x1e9   : > { %4568 = vpow2.f32 %v860_v8  ;;  %v862_v15 = vmul.f32 1.442695, %v843_v9 }
 0x1ea   : > { %4570 = vpow2.f32 %v856_v10  ;;  %v858_v16 = vmul.f32 1.442695, %v841_v11 }
 0x1eb   : > { %4572 = vpow2.f32 %v862_v15 }
 0x1ec   : > { %4574 = vpow2.f32 %v858_v16 }
 0x1f3   : > { %v4569_v20 = vpop.eup %4568 }
 0x1f4   : > { %v4571_v21 = vpop.eup %4570  ;;  %v890_v45 = vadd.f32 1.0, %v4569_v20 }
 0x1f5   : > { %v4573_v54 = vpop.eup %4572  ;;  %v888_v25 = vadd.f32 1.0, %v4571_v21 }
 0x1f6   : > { %v4575_v26 = vpop.eup %4574  ;;  %4576 = vrcp.f32 %v890_v45  ;;  %v891_v27 = vadd.f32 1.0, %v4573_v54  ;;  %v4095_v31 = vpop.f32.mrb[12].mxu1 }
 0x1f7   : > { %4578 = vrcp.f32 %v888_v25  ;;  %v889_v30 = vadd.f32 1.0, %v4575_v26  ;;  %v5368_v32 = vadd.f32 %v4095_v31, %v5355_v3  ;;  %v793_v33 = vpop.f32.mrb[13].mxu1 }
 0x1f8   : > { %4580 = vrcp.f32 %v891_v27  ;;  %v5371_v35 = vadd.f32 %v5355_v3, %v793_v33  ;;  %v4096_v49 = vpop.f32.mrb[14].mxu1  ;;  %v4433_v27 = vld [vmem:[%s6366_s4 + $0x90] sm:$0x3f]  }
 0x1f9   : > { %4582 = vrcp.f32 %v889_v30  ;;  %v846_v50 = vsub.f32 0.0, %v5368_v32  ;;  %v5375_v1 = vadd.f32 %v4096_v49, %v5355_v3  ;;  %v796_v13 = vpop.f32.mrb[15].mxu1 }
 0x1fa   : > { %v844_v19 = vsub.f32 0.0, %v5371_v35  ;;  %v5379_v24 = vadd.f32 %v5355_v3, %v796_v13  ;;  %v1523_v13 = vsel %vm1521_vm1, %v4433_v27, 0 }
 0x1fb   : > { %v868_v36 = vmul.f32 1.442695, %v846_v50  ;;  %v847_v37 = vsub.f32 0.0, %v5375_v1 }
 0x1fc   : > { %v864_v38 = vmul.f32 1.442695, %v844_v19  ;;  %v845_v12 = vsub.f32 0.0, %v5379_v24 }
 0x1fd   : > { %4584 = vpow2.f32 %v868_v36  ;;  %v870_v39 = vmul.f32 1.442695, %v847_v37 }
 0x1fe   : > { %4586 = vpow2.f32 %v864_v38  ;;  %v866_v40 = vmul.f32 1.442695, %v845_v12  ;;  %v4099_v41 = vpop.f32.mrb[16].mxu1 }
 0x1ff   : > { %4588 = vpow2.f32 %v870_v39  ;;  %v5384_v43 = vadd.f32 %v4099_v41, %v5355_v3  ;;  %v809_v44 = vpop.f32.mrb[17].mxu1 }
 0x200   : > { %v4577_v42 = vpop.eup %4576  ;;  %4590 = vpow2.f32 %v866_v40  ;;  %v5387_v47 = vadd.f32 %v5355_v3, %v809_v44  ;;  %v4100_v48 = vpop.f32.mrb[18].mxu1 }
 0x201   : > { %v4579_v46 = vpop.eup %4578  ;;  %v850_v52 = vsub.f32 0.0, %v5384_v43  ;;  %v5391_v53 = vadd.f32 %v4100_v48, %v5355_v3  ;;  %v812_v55 = vpop.f32.mrb[19].mxu1  ;;  %v922_v57 = vmul.f32 %v4577_v42, %v5358_v5 }
 0x202   : > { %v4581_v51 = vpop.eup %4580  ;;  %v848_v60 = vsub.f32 0.0, %v5387_v47  ;;  %v5396_v61 = vadd.f32 %v5355_v3, %v812_v55  ;;  %v920_v62 = vmul.f32 %v4579_v46, %v5361_v28 }
 0x203   : > { %v4583_v56 = vpop.eup %4582  ;;  %v923_v58 = vmul.f32 %v4581_v51, %v789_v22  ;;  %v876_v0 = vmul.f32 1.442695, %v850_v52  ;;  %v851_v14 = vsub.f32 0.0, %v5391_v53  ;;  %v4429_v22 = vld [vmem:[%s6366_s4 + $0x88] sm:$0xff]  }
 0x204   : > { %v921_v63 = vmul.f32 %v4583_v56, %v781_v7  ;;  %v872_v23 = vmul.f32 1.442695, %v848_v60  ;;  %v849_v4 = vsub.f32 0.0, %v5396_v61 }
 0x205   : > { %v944_v2 = vpack.c.bf16 %v923_v58, %v922_v57  ;;  %4592 = vpow2.f32 %v876_v0  ;;  %v878_v18 = vmul.f32 1.442695, %v851_v14 }
 0x206   : > { %v943_v17 = vpack.c.bf16 %v921_v63, %v920_v62  ;;  %4594 = vpow2.f32 %v872_v23  ;;  %v874_v5 = vmul.f32 1.442695, %v849_v4  ;;  %v4103_v29 = vpop.f32.mrb[20].mxu1 }
 0x207   : > { %v4585_v6 = vpop.eup %4584  ;;  %4596 = vpow2.f32 %v878_v18  ;;  %v5405_v28 = vadd.f32 %v4103_v29, %v5355_v3  ;;  %v825_v34 = vpop.f32.mrb[21].mxu1 }
 0x208   : > { %4109 = vmatprep.mubr.msk.bf16.mxu0 %vm468_vm0, %v943_v17  ;;  %v4587_v7 = vpop.eup %4586  ;;  %v894_v8 = vadd.f32 1.0, %v4585_v6  ;;  %4598 = vpow2.f32 %v874_v5  ;;  %v5409_v9 = vadd.f32 %v5355_v3, %v825_v34  ;;  %v4104_v10 = vpop.f32.mrb[22].mxu1 }
 0x209   : > { %4110 = vmatmul.mubr.msk.bf16.vlgmr.msra.gmra.mrb[8].mxu0 %vm468_vm0, %v944_v2  ;;  %v4589_v11 = vpop.eup %4588  ;;  %v892_v15 = vadd.f32 1.0, %v4587_v7  ;;  %v854_v16 = vsub.f32 0.0, %v5405_v28  ;;  %v5414_v20 = vadd.f32 %v4104_v10, %v5355_v3  ;;  %v828_v21 = vpop.f32.mrb[23].mxu1 }
 0x20a   : > { %4126 = vmatpush3.bf16.msra.mxu0 %v5341_v59  ;;  %v4591_v45 = vpop.eup %4590  ;;  %4600 = vrcp.f32 %v894_v8  ;;  %v895_v54 = vadd.f32 1.0, %v4589_v11  ;;  %v852_v25 = vsub.f32 0.0, %v5409_v9  ;;  %v5419_v26 = vadd.f32 %v5355_v3, %v828_v21  ;;  %v4442_v21 = vld [vmem:[%s5175_s27 + $0x38] ss:$12 sps:$4 sm:$0xff]  }
 0x20b   : > { %4127 = vmatprep.subr.bf16.mxu0 %v4429_v22  ;;  %4602 = vrcp.f32 %v892_v15  ;;  %v893_v30 = vadd.f32 1.0, %v4591_v45  ;;  %v884_v31 = vmul.f32 1.442695, %v854_v16  ;;  %v855_v33 = vsub.f32 0.0, %v5414_v20  ;;  %v4437_v16 = vld [vmem:[%s5175_s27 + $0x8] ss:$12 sps:$4 sm:$0xff]  }
 0x20c   : > { %4604 = vrcp.f32 %v895_v54  ;;  %v880_v59 = vmul.f32 1.442695, %v852_v25  ;;  %v853_v49 = vsub.f32 0.0, %v5419_v26  ;;  %v4448_v45 = vld [vmem:[%s5175_s27 + $0x80] ss:$12 sps:$4 sm:$0xff]  }
 0x20d   : > { %4606 = vrcp.f32 %v893_v30  ;;  %v886_v50 = vmul.f32 1.442695, %v855_v33  ;;  %v4452_v54 = vld [vmem:[%s5175_s27 + $0x98] ss:$12 sps:$4 sm:$0xff]   ;;  %v4453_v25 = vld [vmem:[%s5175_s27 + $0xb0] ss:$12 sps:$4 sm:$0xff]  }
 0x20e   : > { %4128 = vmatpush3.bf16.msra.mxu0 %v4429_v22  ;;  %4608 = vpow2.f32 %v884_v31  ;;  %v882_v3 = vmul.f32 1.442695, %v853_v49 }
 0x20f   : > { %4379 = vmatprep.subr.msk.bf16.mxu0 %vm1521_vm1, %v4433_v27  ;;  %v4593_v19 = vpop.eup %4592  ;;  %4610 = vpow2.f32 %v880_v59 }
 0x210   : > { %v4595_v36 = vpop.eup %4594  ;;  %v898_v37 = vadd.f32 1.0, %v4593_v19  ;;  %4612 = vpow2.f32 %v886_v50 }
 0x211   : > { %v4597_v38 = vpop.eup %4596  ;;  %v896_v12 = vadd.f32 1.0, %v4595_v36  ;;  %4614 = vpow2.f32 %v882_v3 }
 0x212   : > { %4130 = vmatpush3.bf16.msra.mxu0 %v1523_v13  ;;  %v4599_v39 = vpop.eup %4598  ;;  %4616 = vrcp.f32 %v898_v37  ;;  %v899_v40 = vadd.f32 1.0, %v4597_v38 }
 0x213   : > { %4618 = vrcp.f32 %v896_v12  ;;  %v897_v41 = vadd.f32 1.0, %v4599_v39 }
 0x214   : > { %v4601_v42 = vpop.eup %4600  ;;  %4620 = vrcp.f32 %v899_v40 }
 0x215   : > { %v4603_v44 = vpop.eup %4602  ;;  %4622 = vrcp.f32 %v897_v41  ;;  %v926_v51 = vmul.f32 %v4601_v42, %v5368_v32 }
 0x216   : > { %v4605_v46 = vpop.eup %4604  ;;  %v924_v56 = vmul.f32 %v4603_v44, %v5371_v35 }
 0x217   : > { %v4607_v48 = vpop.eup %4606  ;;  %v927_v52 = vmul.f32 %v4605_v46, %v5375_v1 }
 0x218   : > { %v4609_v55 = vpop.eup %4608  ;;  %v925_v57 = vmul.f32 %v4607_v48, %v5379_v24 }
 0x219   : > { %v4611_v58 = vpop.eup %4610  ;;  %v946_v60 = vpack.c.bf16 %v927_v52, %v926_v51  ;;  %v902_v62 = vadd.f32 1.0, %v4609_v55 }
 0x21a   : > { %v4613_v63 = vpop.eup %4612  ;;  %v945_v0 = vpack.c.bf16 %v925_v57, %v924_v56  ;;  %v900_v14 = vadd.f32 1.0, %v4611_v58 }
 0x21b   : > { %v4615_v2 = vpop.eup %4614  ;;  %4624 = vrcp.f32 %v902_v62  ;;  %v903_v23 = vadd.f32 1.0, %v4613_v63 }
 0x21c   : > { %v4617_v4 = vpop.eup %4616  ;;  %4626 = vrcp.f32 %v900_v14  ;;  %v901_v17 = vadd.f32 1.0, %v4615_v2  ;;  %4113 = vmatprep.mubr.msk.bf16.mxu0 %vm468_vm0, %v945_v0 }
 0x21d   : > { %v4619_v32 = vpop.eup %4618  ;;  %4628 = vrcp.f32 %v903_v23  ;;  %4114 = vmatmul.mubr.msk.bf16.gmra.mrb[12].mxu0 %vm468_vm0, %v946_v60  ;;  %v930_v24 = vmul.f32 %v4617_v4, %v5384_v43  ;;  %v4454_v23 = vld [vmem:[%s6367_s5] sm:$0xff]  }
 0x21e   : > { %v4621_v35 = vpop.eup %4620  ;;  %4630 = vrcp.f32 %v901_v17  ;;  %v928_v5 = vmul.f32 %v4619_v32, %v5387_v47  ;;  %4147 = vmatprep.subr.bf16.mxu0 %v4454_v23  ;;  %v4455_v32 = vld [vmem:[%s6367_s5 + $0x8] sm:$0xff]  }
 0x21f   : > { %v4623_v1 = vpop.eup %4622  ;;  %v931_v18 = vmul.f32 %v4621_v35, %v5391_v53 }
 0x220   : > { %v929_v29 = vmul.f32 %v4623_v1, %v5396_v61 }
 0x221   : > { %v948_v22 = vpack.c.bf16 %v931_v18, %v930_v24 }
 0x222   : > { %v947_v6 = vpack.c.bf16 %v929_v29, %v928_v5  ;;  %v4456_v5 = vld [vmem:[%s6367_s5 + $0x10] sm:$0xff]  }
 0x224   : > { %4117 = vmatprep.mubr.msk.bf16.mxu0 %vm468_vm0, %v947_v6  ;;  %v4457_v6 = vld [vmem:[%s6367_s5 + $0x18] sm:$0xff]  }
 0x225   : > { %v4625_v34 = vpop.eup %4624  ;;  %4118 = vmatmul.mubr.msk.bf16.gmra.mrb[16].mxu0 %vm468_vm0, %v948_v22 }
 0x226   : > { %v4627_v7 = vpop.eup %4626  ;;  %v934_v43 = vmul.f32 %v4625_v34, %v5405_v28  ;;  %v4438_v28 = vld [vmem:[%s5175_s27 + $0x20] ss:$12 sps:$4 sm:$0xff]  }
 0x227   : > { %v4629_v8 = vpop.eup %4628  ;;  %v932_v53 = vmul.f32 %v4627_v7, %v5409_v9  ;;  %v4443_v9 = vld [vmem:[%s5175_s27 + $0x50] ss:$12 sps:$4 sm:$0xff]  }
 0x228   : > { %v4631_v10 = vpop.eup %4630  ;;  %v935_v47 = vmul.f32 %v4629_v8, %v5414_v20  ;;  %v4447_v20 = vld [vmem:[%s5175_s27 + $0x68] ss:$12 sps:$4 sm:$0xff]  }
 0x229   : > { %v933_v61 = vmul.f32 %v4631_v10, %v5419_v26  ;;  %v3900_v26 = vpop.f32.mrb[24].mxu1 }
 0x22a   : > { %v950_v11 = vpack.c.bf16 %v935_v47, %v934_v43  ;;  %v3901_v27 = vpop.f32.mrb[25].mxu1  ;;  %v4458_v47 = vld [vmem:[%s6367_s5 + $0x20] sm:$0xff]  }
 0x22b   : > { %v949_v15 = vpack.c.bf16 %v933_v61, %v932_v53  ;;  %v5462_v30 = vadd.f32 %v3901_v27, %v3900_v26  ;;  %v3903_v31 = vpop.f32.mrb[26].mxu1  ;;  %v4459_v61 = vld [vmem:[%s6367_s5 + $0x28] sm:$0xff]  }
 0x22c   : > { %v3904_v33 = vpop.f32.mrb[27].mxu1 }
 0x22d   : > { %4121 = vmatprep.mubr.msk.bf16.mxu0 %vm468_vm0, %v949_v15  ;;  %v5464_v59 = vadd.f32 %v3904_v33, %v3903_v31  ;;  %v3906_v49 = vpop.f32.mrb[28].mxu1  ;;  %v4461_v15 = vld [vmem:[%s6367_s5 + $0x38] sm:$0xff]  }
 0x22e   : > { %4122 = vmatmul.mubr.msk.bf16.gmra.mrb[20].mxu0 %vm468_vm0, %v950_v11  ;;  %v3907_v50 = vpop.f32.mrb[29].mxu1  ;;  %v4460_v11 = vld [vmem:[%s6367_s5 + $0x30] sm:$0xff]  }
 0x22f   : > { %4131 = vmatprep.mubr.msk.bf16.mxu0 %vm1496_vm2, %v4437_v16  ;;  %v3909_v3 = vpop.f32.mrb[30].mxu1  ;;  %v5466_v19 = vadd.f32 %v3907_v50, %v3906_v49  ;;  %v4462_v16 = vld [vmem:[%s6367_s5 + $0x40] sm:$0xff]  }
 0x230   : > { %v3910_v13 = vpop.f32.mrb[31].mxu1  ;;  %4179 = vmatprep.subr.bf16.mxu1 %v4462_v16 }
 0x231   : > { %v5468_v36 = vadd.f32 %v3910_v13, %v3909_v3  ;;  %v3912_v37 = vpop.f32.mrb[32].mxu1  ;;  %4180 = vmatpush3.bf16.msra.mxu1 %v4462_v16 }
 0x232   : > { %v3913_v38 = vpop.f32.mrb[33].mxu1 }
 0x233   : > { %v3915_v12 = vpop.f32.mrb[34].mxu1  ;;  %v5470_v40 = vadd.f32 %v3913_v38, %v3912_v37 }
 0x234   : > { %v3916_v39 = vpop.f32.mrb[35].mxu1 }
 0x235   : > { %v5472_v41 = vadd.f32 %v3916_v39, %v3915_v12  ;;  %v3918_v42 = vpop.f32.mrb[36].mxu1 }
 0x236   : > { %4132 = vmatmul.mubr.msk.bf16.vlgmr.msra.gmra.mrb[24].mxu0 %vm1496_vm2, %v4438_v28  ;;  %v3919_v44 = vpop.f32.mrb[37].mxu1  ;;  %v4463_v28 = vld [vmem:[%s6367_s5 + $0x48] sm:$0xff]  }
 0x237   : > { %4135 = vmatprep.mubr.msk.bf16.mxu0 %vm1496_vm2, %v4442_v21  ;;  %v3921_v46 = vpop.f32.mrb[38].mxu1  ;;  %v5474_v51 = vadd.f32 %v3919_v44, %v3918_v42  ;;  %4148 = vmatpush3.bf16.msra.mxu0 %v4454_v23  ;;  %v4464_v21 = vld [vmem:[%s6367_s5 + $0x50] sm:$0xff]  }
 0x238   : > { %v3922_v48 = vpop.f32.mrb[39].mxu1  ;;  %4149 = vmatprep.subr.bf16.mxu0 %v4455_v32  ;;  %4181 = vmatprep.subr.bf16.mxu1 %v4463_v28 }
 0x239   : > { %v5476_v52 = vadd.f32 %v3922_v48, %v3921_v46  ;;  %v3924_v55 = vpop.f32.mrb[40].mxu1  ;;  %4182 = vmatpush3.bf16.msra.mxu1 %v4463_v28 }
 0x23a   : > { %v3925_v56 = vpop.f32.mrb[41].mxu1  ;;  %4183 = vmatprep.subr.bf16.mxu1 %v4464_v21 }
 0x23b   : > { %v3927_v57 = vpop.f32.mrb[42].mxu1  ;;  %v5478_v60 = vadd.f32 %v3925_v56, %v3924_v55  ;;  %4150 = vmatpush3.bf16.msra.mxu0 %v4455_v32 }
 0x23c   : > { %v3928_v58 = vpop.f32.mrb[43].mxu1  ;;  %4151 = vmatprep.subr.bf16.mxu0 %v4456_v5 }
 0x23d   : > { %v5480_v62 = vadd.f32 %v3928_v58, %v3927_v57  ;;  %v3930_v63 = vpop.f32.mrb[44].mxu1  ;;  %4184 = vmatpush3.bf16.msra.mxu1 %v4464_v21 }
 0x23e   : > { %4136 = vmatmul.mubr.msk.bf16.gmra.mrb[28].mxu0 %vm1496_vm2, %v4443_v9  ;;  %v3931_v0 = vpop.f32.mrb[45].mxu1  ;;  %v4465_v9 = vld [vmem:[%s6367_s5 + $0x58] sm:$0xff]  }
 0x23f   : > { %4139 = vmatprep.mubr.msk.bf16.mxu0 %vm1496_vm2, %v4447_v20  ;;  %v3933_v14 = vpop.f32.mrb[46].mxu1  ;;  %v5485_v4 = vadd.f32 %v3931_v0, %v3930_v63  ;;  %4152 = vmatpush3.bf16.msra.mxu0 %v4456_v5  ;;  %v5533_v20 = vld [vmem:[%s6365_s3 + $0x2] ss:$0 sm:$0xff] }
 0x240   : > { %v3934_v2 = vpop.f32.mrb[47].mxu1  ;;  %4153 = vmatprep.subr.bf16.mxu0 %v4457_v6  ;;  %4185 = vmatprep.subr.bf16.mxu1 %v4465_v9 }
 0x241   : > { %v5487_v17 = vadd.f32 %v3934_v2, %v3933_v14  ;;  %v3936_v35 = vpop.f32.mrb[48].mxu1  ;;  %4186 = vmatpush3.bf16.msra.mxu1 %v4465_v9 }
 0x242   : > { %v3937_v1 = vpop.f32.mrb[49].mxu1 }
 0x243   : > { %v3939_v24 = vpop.f32.mrb[50].mxu1  ;;  %v5495_v29 = vadd.f32 %v3937_v1, %v3936_v35  ;;  %4154 = vmatpush3.bf16.msra.mxu0 %v4457_v6 }
 0x244   : > { %v3940_v18 = vpop.f32.mrb[51].mxu1  ;;  %4155 = vmatprep.subr.bf16.mxu0 %v4458_v47 }
 0x245   : > { %v5497_v22 = vadd.f32 %v3940_v18, %v3939_v24 }
 0x246   : > { %4140 = vmatmul.mubr.msk.bf16.gmra.mrb[32].mxu0 %vm1496_vm2, %v4448_v45  ;;  %v3942_v34 = vpop.f32.mrb[52].mxu1 }
 0x247   : > { %4143 = vmatprep.mubr.msk.bf16.mxu0 %vm1496_vm2, %v4452_v54  ;;  %v3943_v7 = vpop.f32.mrb[53].mxu1  ;;  %4156 = vmatpush3.bf16.msra.mxu0 %v4458_v47 }
 0x248   : > { %v3945_v8 = vpop.f32.mrb[54].mxu1  ;;  %v5502_v10 = vadd.f32 %v3943_v7, %v3942_v34  ;;  %4157 = vmatprep.subr.bf16.mxu0 %v4459_v61 }
 0x249   : > { %v3946_v43 = vpop.f32.mrb[55].mxu1 }
 0x24a   : > { %v5507_v53 = vadd.f32 %v3946_v43, %v3945_v8 }
 0x24b   : > { %4158 = vmatpush3.bf16.msra.mxu0 %v4459_v61 }
 0x24c   : > { %4159 = vmatprep.subr.bf16.mxu0 %v4460_v11 }
 0x24e   : > { %4144 = vmatmul.mubr.msk.bf16.gmra.mrb[36].mxu0 %vm1496_vm2, %v4453_v25 }
 0x24f   : > { %4160 = vmatpush3.bf16.msra.mxu0 %v4460_v11 }
 0x250   : > { %4161 = vmatprep.subr.bf16.mxu0 %v4461_v15 }
 0x253   : > { %4162 = vmatpush3.bf16.msra.mxu0 %v4461_v15 }
 0x2dc   : > { %v4111_v45 = vpop.f32.mrb[8].mxu0 }
 0x2dd   : > { %v5536_v54 = vadd.f32 %v4111_v45, %v5533_v20  ;;  %v1027_v25 = vpop.f32.mrb[9].mxu0 }
 0x2de   : > { %v5539_v26 = vadd.f32 %v5533_v20, %v1027_v25  ;;  %v4112_v27 = vpop.f32.mrb[10].mxu0 }
 0x2df   : > { %v1092_v31 = vsub.f32 0.0, %v5536_v54  ;;  %v1039_v33 = vadd.f32 %v4112_v27, %v5533_v20  ;;  %v1030_v49 = vpop.f32.mrb[11].mxu0 }
 0x2e0   : > { %v1090_v50 = vsub.f32 0.0, %v5539_v26  ;;  %v1031_v3 = vadd.f32 %v5533_v20, %v1030_v49 }
 0x2e1   : > { %v1110_v13 = vmul.f32 1.442695, %v1092_v31  ;;  %v1093_v37 = vsub.f32 0.0, %v1039_v33 }
 0x2e2   : > { %v1106_v38 = vmul.f32 1.442695, %v1090_v50  ;;  %v1091_v12 = vsub.f32 0.0, %v1031_v3 }
 0x2e3   : > { %4632 = vpow2.f32 %v1110_v13  ;;  %v1112_v39 = vmul.f32 1.442695, %v1093_v37 }
 0x2e4   : > { %4634 = vpow2.f32 %v1106_v38  ;;  %v1108_v42 = vmul.f32 1.442695, %v1091_v12 }
 0x2e5   : > { %4636 = vpow2.f32 %v1112_v39 }
 0x2e6   : > { %4638 = vpow2.f32 %v1108_v42 }
 0x2ed   : > { %v4633_v44 = vpop.eup %4632 }
 0x2ee   : > { %v4635_v46 = vpop.eup %4634  ;;  %v1140_v48 = vadd.f32 1.0, %v4633_v44 }
 0x2ef   : > { %v4637_v55 = vpop.eup %4636  ;;  %v1138_v56 = vadd.f32 1.0, %v4635_v46 }
 0x2f0   : > { %v4639_v57 = vpop.eup %4638  ;;  %4640 = vrcp.f32 %v1140_v48  ;;  %v1141_v58 = vadd.f32 1.0, %v4637_v55  ;;  %v4115_v0 = vpop.f32.mrb[12].mxu0 }
 0x2f1   : > { %4642 = vrcp.f32 %v1138_v56  ;;  %v1139_v63 = vadd.f32 1.0, %v4639_v57  ;;  %v5546_v14 = vadd.f32 %v4115_v0, %v5533_v20  ;;  %v1043_v2 = vpop.f32.mrb[13].mxu0 }
 0x2f2   : > { %4644 = vrcp.f32 %v1141_v58  ;;  %v5549_v23 = vadd.f32 %v5533_v20, %v1043_v2  ;;  %v4116_v32 = vpop.f32.mrb[14].mxu0 }
 0x2f3   : > { %4646 = vrcp.f32 %v1139_v63  ;;  %v1096_v35 = vsub.f32 0.0, %v5546_v14  ;;  %v5553_v1 = vadd.f32 %v4116_v32, %v5533_v20  ;;  %v1046_v24 = vpop.f32.mrb[15].mxu0 }
 0x2f4   : > { %v1094_v18 = vsub.f32 0.0, %v5549_v23  ;;  %v5557_v5 = vadd.f32 %v5533_v20, %v1046_v24 }
 0x2f5   : > { %v1118_v6 = vmul.f32 1.442695, %v1096_v35  ;;  %v1097_v34 = vsub.f32 0.0, %v5553_v1 }
 0x2f6   : > { %v1114_v7 = vmul.f32 1.442695, %v1094_v18  ;;  %v1095_v8 = vsub.f32 0.0, %v5557_v5 }
 0x2f7   : > { %4648 = vpow2.f32 %v1118_v6  ;;  %v1120_v43 = vmul.f32 1.442695, %v1097_v34 }
 0x2f8   : > { %4650 = vpow2.f32 %v1114_v7  ;;  %v1116_v47 = vmul.f32 1.442695, %v1095_v8  ;;  %v4119_v61 = vpop.f32.mrb[16].mxu0 }
 0x2f9   : > { %4652 = vpow2.f32 %v1120_v43  ;;  %v5562_v15 = vadd.f32 %v4119_v61, %v5533_v20  ;;  %v1059_v16 = vpop.f32.mrb[17].mxu0 }
 0x2fa   : > { %v4641_v11 = vpop.eup %4640  ;;  %4654 = vpow2.f32 %v1116_v47  ;;  %v5565_v21 = vadd.f32 %v5533_v20, %v1059_v16  ;;  %v4120_v9 = vpop.f32.mrb[18].mxu0 }
 0x2fb   : > { %v4643_v28 = vpop.eup %4642  ;;  %v1100_v25 = vsub.f32 0.0, %v5562_v15  ;;  %v5569_v27 = vadd.f32 %v4120_v9, %v5533_v20  ;;  %v1062_v31 = vpop.f32.mrb[19].mxu0  ;;  %v5572_v50 = vmul.f32 %v4641_v11, %v5536_v54  ;;  %v5608_v11 = vld [vmem:[%s6368_s6] ss:$0 sm:$0xff] }
 0x2fc   : > { %v4645_v45 = vpop.eup %4644  ;;  %v1098_v37 = vsub.f32 0.0, %v5565_v21  ;;  %v5578_v38 = vadd.f32 %v5533_v20, %v1062_v31  ;;  %v5581_v12 = vmul.f32 %v4643_v28, %v5539_v26  ;;  %v1568_v31 = vadd.f32 %v5466_v19, %v5608_v11 }
 0x2fd   : > { %v4647_v49 = vpop.eup %4646  ;;  %v5574_v13 = vmul.f32 %v4645_v45, %v1039_v33  ;;  %v1126_v42 = vmul.f32 1.442695, %v1100_v25  ;;  %v1101_v44 = vsub.f32 0.0, %v5569_v27  ;;  %v1576_v19 = vadd.f32 %v5470_v40, %v5608_v11 }
 0x2fe   : > { %v5583_v39 = vmul.f32 %v4647_v49, %v1031_v3  ;;  %v1122_v54 = vmul.f32 1.442695, %v1098_v37  ;;  %v1099_v33 = vsub.f32 0.0, %v5578_v38 }
 0x2ff   : > { %v2363_v46 = vpack.c.bf16 %v5574_v13, %v5572_v50  ;;  %4656 = vpow2.f32 %v1126_v42  ;;  %v1128_v55 = vmul.f32 1.442695, %v1101_v44  ;;  %v1571_v44 = vadd.f32 %v5468_v36, %v5608_v11  ;;  %v4480_v50 = vld [vmem:[%s6370_s8 + $0x40] sm:$0xff]   ;;  %v4481_v13 = vld [vmem:[%s6370_s8 + $0x48] sm:$0xff]  }
 0x300   : > { %v2362_v48 = vpack.c.bf16 %v5583_v39, %v5581_v12  ;;  %4658 = vpow2.f32 %v1122_v54  ;;  %v1124_v56 = vmul.f32 1.442695, %v1099_v33  ;;  %v1563_v54 = vadd.f32 %v5464_v59, %v5608_v11  ;;  %v4482_v12 = vld [vmem:[%s6370_s8 + $0x50] sm:$0xff]   ;;  %v4483_v39 = vld [vmem:[%s6370_s8 + $0x58] sm:$0xff]  }
 0x301   : > { %v4649_v26 = vpop.eup %4648  ;;  %4660 = vpow2.f32 %v1128_v55  ;;  %v4123_v3 = vpop.f32.mrb[20].mxu0  ;;  %v1579_v36 = vadd.f32 %v5472_v41, %v5608_v11  ;;  %v1584_v41 = vadd.f32 %v5474_v51, %v5608_v11 }
 0x302   : > { %v4651_v57 = vpop.eup %4650  ;;  %v1144_v58 = vadd.f32 1.0, %v4649_v26  ;;  %4662 = vpow2.f32 %v1124_v56  ;;  %v5592_v63 = vadd.f32 %v4123_v3, %v5533_v20  ;;  %v1075_v0 = vpop.f32.mrb[21].mxu0 }
 0x303   : > { %v4653_v2 = vpop.eup %4652  ;;  %v1142_v32 = vadd.f32 1.0, %v4651_v57  ;;  %v5595_v35 = vadd.f32 %v5533_v20, %v1075_v0  ;;  %v4124_v24 = vpop.f32.mrb[22].mxu0 }
 0x304   : > { %v4655_v18 = vpop.eup %4654  ;;  %4664 = vrcp.f32 %v1144_v58  ;;  %v1145_v6 = vadd.f32 1.0, %v4653_v2  ;;  %v1104_v34 = vsub.f32 0.0, %v5592_v63  ;;  %v5599_v7 = vadd.f32 %v4124_v24, %v5533_v20  ;;  %v1078_v8 = vpop.f32.mrb[23].mxu0 }
 0x305   : > { %4666 = vrcp.f32 %v1142_v32  ;;  %v1143_v43 = vadd.f32 1.0, %v4655_v18  ;;  %v1102_v47 = vsub.f32 0.0, %v5595_v35  ;;  %v5603_v61 = vadd.f32 %v5533_v20, %v1078_v8 }
 0x306   : > { %4668 = vrcp.f32 %v1145_v6  ;;  %v1134_v16 = vmul.f32 1.442695, %v1104_v34  ;;  %v1105_v28 = vsub.f32 0.0, %v5599_v7  ;;  %v1560_v20 = vadd.f32 %v5462_v30, %v5608_v11 }
 0x307   : > { %4670 = vrcp.f32 %v1143_v43  ;;  %v1130_v9 = vmul.f32 1.442695, %v1102_v47  ;;  %v1103_v45 = vsub.f32 0.0, %v5603_v61 }
 0x308   : > { %4672 = vpow2.f32 %v1134_v16  ;;  %v1136_v25 = vmul.f32 1.442695, %v1105_v28 }
 0x309   : > { %v4657_v49 = vpop.eup %4656  ;;  %4674 = vpow2.f32 %v1130_v9  ;;  %v1132_v37 = vmul.f32 1.442695, %v1103_v45  ;;  %v4133_v42 = vpop.f32.mrb[24].mxu0  ;;  %v1587_v9 = vadd.f32 %v5476_v52, %v5608_v11 }
 0x30a   : > { %v4659_v33 = vpop.eup %4658  ;;  %v1148_v55 = vadd.f32 1.0, %v4657_v49  ;;  %4676 = vpow2.f32 %v1136_v25  ;;  %v5620_v56 = vadd.f32 %v4133_v42, %v1568_v31  ;;  %v1656_v26 = vpop.f32.mrb[25].mxu0  ;;  %v1592_v31 = vadd.f32 %v5478_v60, %v5608_v11 }
 0x30b   : > { %v4661_v30 = vpop.eup %4660  ;;  %v1146_v3 = vadd.f32 1.0, %v4659_v33  ;;  %4678 = vpow2.f32 %v1132_v37  ;;  %v5624_v57 = vadd.f32 %v1656_v26, %v1560_v20  ;;  %v4134_v58 = vpop.f32.mrb[26].mxu0  ;;  %v5644_v20 = vadd.f32 %v5480_v62, %v5608_v11 }
 0x30c   : > { %v4663_v0 = vpop.eup %4662  ;;  %4680 = vrcp.f32 %v1148_v55  ;;  %v1149_v59 = vadd.f32 1.0, %v4661_v30  ;;  %v1721_v2 = vsub.f32 0.0, %v5620_v56  ;;  %v5629_v32 = vadd.f32 %v4134_v58, %v1571_v44  ;;  %v1659_v24 = vpop.f32.mrb[27].mxu0 }
 0x30d   : > { %4682 = vrcp.f32 %v1146_v3  ;;  %v1147_v18 = vadd.f32 1.0, %v4663_v0  ;;  %v1719_v40 = vsub.f32 0.0, %v5624_v57  ;;  %v5632_v6 = vadd.f32 %v1659_v24, %v1563_v54 }
 0x30e   : > { %v4665_v34 = vpop.eup %4664  ;;  %4684 = vrcp.f32 %v1149_v59  ;;  %v1739_v8 = vmul.f32 1.442695, %v1721_v2  ;;  %v1722_v43 = vsub.f32 0.0, %v5629_v32 }
 0x30f   : > { %v4667_v47 = vpop.eup %4666  ;;  %4686 = vrcp.f32 %v1147_v18  ;;  %v1735_v16 = vmul.f32 1.442695, %v1719_v40  ;;  %v1720_v28 = vsub.f32 0.0, %v5632_v6  ;;  %v5647_v51 = vmul.f32 %v4665_v34, %v5546_v14 }
 0x310   : > { %v4669_v45 = vpop.eup %4668  ;;  %4688 = vpow2.f32 %v1739_v8  ;;  %v1741_v25 = vmul.f32 1.442695, %v1722_v43  ;;  %v5653_v54 = vmul.f32 %v4667_v47, %v5549_v23 }
 0x311   : > { %v4671_v49 = vpop.eup %4670  ;;  %v5650_v37 = vmul.f32 %v4669_v45, %v5553_v1  ;;  %4690 = vpow2.f32 %v1735_v16  ;;  %v1737_v42 = vmul.f32 1.442695, %v1720_v28  ;;  %v4137_v52 = vpop.f32.mrb[28].mxu0  ;;  %v1600_v28 = vadd.f32 %v5485_v4, %v5608_v11 }
 0x312   : > { %v4673_v44 = vpop.eup %4672  ;;  %v5656_v60 = vmul.f32 %v4671_v49, %v5557_v5  ;;  %4692 = vpow2.f32 %v1741_v25  ;;  %v5658_v62 = vadd.f32 %v4137_v52, %v1584_v41  ;;  %v1672_v33 = vpop.f32.mrb[29].mxu0  ;;  %v1616_v25 = vadd.f32 %v5502_v10, %v5608_v11 }
 0x313   : > { %v4675_v55 = vpop.eup %4674  ;;  %v2365_v14 = vpack.c.bf16 %v5650_v37, %v5647_v51  ;;  %v1152_v1 = vadd.f32 1.0, %v4673_v44  ;;  %4694 = vpow2.f32 %v1737_v42  ;;  %v5662_v26 = vadd.f32 %v1672_v33, %v1576_v19  ;;  %v4138_v30 = vpop.f32.mrb[30].mxu0  ;;  %v4486_v51 = vld [vmem:[%s6370_s8 + $0x70] sm:$0xff]   ;;  %v4487_v37 = vld [vmem:[%s6370_s8 + $0x78] sm:$0xff]  }
 0x314   : > { %v4677_v3 = vpop.eup %4676  ;;  %v2364_v23 = vpack.c.bf16 %v5656_v60, %v5653_v54  ;;  %v1150_v58 = vadd.f32 1.0, %v4675_v55  ;;  %v1725_v5 = vsub.f32 0.0, %v5658_v62  ;;  %v5667_v0 = vadd.f32 %v4138_v30, %v1587_v9  ;;  %v1675_v59 = vpop.f32.mrb[31].mxu0  ;;  %v6034_v54 = vld [vmem:[%s6371_s9] ss:$0 sm:$0xff] }
 0x315   : > { %v4679_v2 = vpop.eup %4678  ;;  %4696 = vrcp.f32 %v1152_v1  ;;  %v1153_v24 = vadd.f32 1.0, %v4677_v3  ;;  %v1723_v18 = vsub.f32 0.0, %v5662_v26  ;;  %v5670_v40 = vadd.f32 %v1675_v59, %v1579_v36 }
 0x316   : > { %v4681_v19 = vpop.eup %4680  ;;  %4698 = vrcp.f32 %v1150_v58  ;;  %v1151_v34 = vadd.f32 1.0, %v4679_v2  ;;  %v1747_v8 = vmul.f32 1.442695, %v1725_v5  ;;  %v1726_v43 = vsub.f32 0.0, %v5667_v0 }
 0x317   : > { %v4683_v41 = vpop.eup %4682  ;;  %4700 = vrcp.f32 %v1153_v24  ;;  %v1743_v47 = vmul.f32 1.442695, %v1723_v18  ;;  %v1724_v16 = vsub.f32 0.0, %v5670_v40  ;;  %v1603_v36 = vadd.f32 %v5487_v17, %v5608_v11 }
 0x318   : > { %v4685_v9 = vpop.eup %4684  ;;  %4702 = vrcp.f32 %v1151_v34  ;;  %v1749_v45 = vmul.f32 1.442695, %v1726_v43  ;;  %v5681_v42 = vmul.f32 %v4681_v19, %v5562_v15  ;;  %v5687_v55 = vmul.f32 %v4683_v41, %v5565_v21 }
 0x319   : > { %v4687_v49 = vpop.eup %4686  ;;  %v5684_v52 = vmul.f32 %v4685_v9, %v5569_v27  ;;  %4704 = vpow2.f32 %v1747_v8  ;;  %v1745_v44 = vmul.f32 1.442695, %v1724_v16  ;;  %v4141_v33 = vpop.f32.mrb[32].mxu0 }
 0x31a   : > { %v4689_v4 = vpop.eup %4688  ;;  %v5690_v1 = vmul.f32 %v4687_v49, %v5578_v38  ;;  %4706 = vpow2.f32 %v1743_v47  ;;  %v5692_v17 = vadd.f32 %v4141_v33, %v1600_v28  ;;  %v1688_v10 = vpop.f32.mrb[33].mxu0 }
 0x31b   : > { %v4691_v30 = vpop.eup %4690  ;;  %v2367_v15 = vpack.c.bf16 %v5684_v52, %v5681_v42  ;;  %v1769_v27 = vadd.f32 1.0, %v4689_v4  ;;  %4708 = vpow2.f32 %v1749_v45  ;;  %v5696_v3 = vadd.f32 %v1688_v10, %v1592_v31  ;;  %v4142_v58 = vpop.f32.mrb[34].mxu0 }
 0x31c   : > { %v4693_v5 = vpop.eup %4692  ;;  %v2366_v21 = vpack.c.bf16 %v5690_v1, %v5687_v55  ;;  %v1767_v59 = vadd.f32 1.0, %v4691_v30  ;;  %4710 = vpow2.f32 %v1745_v44  ;;  %v1729_v38 = vsub.f32 0.0, %v5692_v17  ;;  %v1691_v2 = vpop.f32.mrb[35].mxu0 }
 0x31d   : > { %v4695_v24 = vpop.eup %4694  ;;  %4712 = vrcp.f32 %v1769_v27  ;;  %v1770_v18 = vadd.f32 1.0, %v4693_v5  ;;  %v1727_v19 = vsub.f32 0.0, %v5696_v3  ;;  %v5702_v34 = vadd.f32 %v4142_v58, %v1603_v36 }
 0x31e   : > { %4714 = vrcp.f32 %v1767_v59  ;;  %v1768_v31 = vadd.f32 1.0, %v4695_v24  ;;  %v1755_v8 = vmul.f32 1.442695, %v1729_v38  ;;  %v5705_v43 = vadd.f32 %v1691_v2, %v5644_v20 }
 0x31f   : > { %v4697_v41 = vpop.eup %4696  ;;  %4716 = vrcp.f32 %v1770_v18  ;;  %v1751_v47 = vmul.f32 1.442695, %v1727_v19  ;;  %v1730_v16 = vsub.f32 0.0, %v5702_v34  ;;  %v1608_v45 = vadd.f32 %v5495_v29, %v5608_v11 }
 0x320   : > { %v4699_v28 = vpop.eup %4698  ;;  %4718 = vrcp.f32 %v1768_v31  ;;  %v1728_v9 = vsub.f32 0.0, %v5705_v43  ;;  %v1611_v36 = vadd.f32 %v5497_v22, %v5608_v11  ;;  %v5714_v44 = vmul.f32 %v4697_v41, %v5592_v63 }
 0x321   : > { %v4701_v49 = vpop.eup %4700  ;;  %4720 = vpow2.f32 %v1755_v8  ;;  %v1757_v20 = vmul.f32 1.442695, %v1730_v16  ;;  %v4145_v33 = vpop.f32.mrb[36].mxu0  ;;  %v1619_v4 = vadd.f32 %v5507_v53, %v5608_v11  ;;  %v5724_v5 = vmul.f32 %v4699_v28, %v5595_v35 }
 0x322   : > { %v4703_v10 = vpop.eup %4702  ;;  %v5719_v30 = vmul.f32 %v4701_v49, %v5599_v7  ;;  %4722 = vpow2.f32 %v1751_v47  ;;  %v1753_v27 = vmul.f32 1.442695, %v1728_v9  ;;  %v5721_v29 = vadd.f32 %v4145_v33, %v1616_v25  ;;  %v1704_v58 = vpop.f32.mrb[37].mxu0 }
 0x323   : > { %v4705_v22 = vpop.eup %4704  ;;  %v5727_v63 = vmul.f32 %v4703_v10, %v5603_v61  ;;  %4724 = vpow2.f32 %v1757_v20  ;;  %v5729_v59 = vadd.f32 %v1704_v58, %v1608_v45  ;;  %v4146_v53 = vpop.f32.mrb[38].mxu0 }
 0x324   : > { %v4707_v11 = vpop.eup %4706  ;;  %v2369_v7 = vpack.c.bf16 %v5719_v30, %v5714_v44  ;;  %v1773_v38 = vadd.f32 1.0, %v4705_v22  ;;  %4726 = vpow2.f32 %v1753_v27  ;;  %v1733_v25 = vsub.f32 0.0, %v5721_v29  ;;  %v1707_v2 = vpop.f32.mrb[39].mxu0 }
 0x325   : > { %v4709_v24 = vpop.eup %4708  ;;  %v2368_v35 = vpack.c.bf16 %v5727_v63, %v5724_v5  ;;  %v1771_v18 = vadd.f32 1.0, %v4707_v11  ;;  %v1731_v61 = vsub.f32 0.0, %v5729_v59  ;;  %v5737_v19 = vadd.f32 %v4146_v53, %v1619_v4 }
 0x326   : > { %v4711_v31 = vpop.eup %4710  ;;  %4728 = vrcp.f32 %v1773_v38  ;;  %v1774_v8 = vadd.f32 1.0, %v4709_v24  ;;  %v1763_v41 = vmul.f32 1.442695, %v1733_v25  ;;  %v5739_v47 = vadd.f32 %v1707_v2, %v1611_v36 }
 0x327   : > { %v4713_v16 = vpop.eup %4712  ;;  %4730 = vrcp.f32 %v1771_v18  ;;  %v1772_v28 = vadd.f32 1.0, %v4711_v31  ;;  %v1759_v9 = vmul.f32 1.442695, %v1731_v61  ;;  %v1734_v45 = vsub.f32 0.0, %v5737_v19 }
 0x328   : > { %v4715_v49 = vpop.eup %4714  ;;  %4732 = vrcp.f32 %v1774_v8  ;;  %v1732_v20 = vsub.f32 0.0, %v5739_v47  ;;  %v1801_v27 = vmul.f32 %v4713_v16, %v5620_v56 }
 0x329   : > { %v4717_v33 = vpop.eup %4716  ;;  %4734 = vrcp.f32 %v1772_v28  ;;  %v1765_v4 = vmul.f32 1.442695, %v1734_v45  ;;  %v1799_v53 = vmul.f32 %v4715_v49, %v5624_v57 }
 0x32a   : > { %v4719_v10 = vpop.eup %4718  ;;  %v1802_v58 = vmul.f32 %v4717_v33, %v5629_v32  ;;  %4736 = vpow2.f32 %v1763_v41  ;;  %v1761_v36 = vmul.f32 1.442695, %v1732_v20 }
 0x32b   : > { %v4721_v22 = vpop.eup %4720  ;;  %v1800_v11 = vmul.f32 %v4719_v10, %v5632_v6  ;;  %4738 = vpow2.f32 %v1759_v9 }
 0x32c   : > { %v4723_v38 = vpop.eup %4722  ;;  %v1834_v25 = vpack.c.bf16 %v1802_v58, %v1801_v27  ;;  %v1777_v2 = vadd.f32 1.0, %v4721_v22  ;;  %4740 = vpow2.f32 %v1765_v4 }
 0x32d   : > { %v4725_v24 = vpop.eup %4724  ;;  %v1775_v18 = vadd.f32 1.0, %v4723_v38  ;;  %4742 = vpow2.f32 %v1761_v36  ;;  %v1833_v61 = vpack.c.bf16 %v1800_v11, %v1799_v53 }
 0x32e   : > { %v4727_v31 = vpop.eup %4726  ;;  %4744 = vrcp.f32 %v1777_v2  ;;  %v1778_v56 = vadd.f32 1.0, %v4725_v24 }
 0x32f   : > { %4746 = vrcp.f32 %v1775_v18  ;;  %v1776_v32 = vadd.f32 1.0, %v4727_v31  ;;  %4163 = vmatprep.mubr.bf16.mxu0 %v1833_v61 }
 0x330   : > { %v4729_v8 = vpop.eup %4728  ;;  %4748 = vrcp.f32 %v1778_v56  ;;  %4164 = vmatmul.mubr.bf16.vlgmr.msra.gmra.mrb[40].mxu0 %v1834_v25 }
 0x331   : > { %v4731_v57 = vpop.eup %4730  ;;  %4750 = vrcp.f32 %v1776_v32  ;;  %v1805_v16 = vmul.f32 %v4729_v8, %v5658_v62 }
 0x332   : > { %v4733_v6 = vpop.eup %4732  ;;  %v1803_v45 = vmul.f32 %v4731_v57, %v5662_v26 }
 0x333   : > { %v4735_v41 = vpop.eup %4734  ;;  %v1806_v28 = vmul.f32 %v4733_v6, %v5667_v0 }
 0x334   : > { %v4737_v9 = vpop.eup %4736  ;;  %v1804_v49 = vmul.f32 %v4735_v41, %v5670_v40 }
 0x335   : > { %v4739_v20 = vpop.eup %4738  ;;  %v1781_v33 = vadd.f32 1.0, %v4737_v9  ;;  %v1836_v4 = vpack.c.bf16 %v1806_v28, %v1805_v16 }
 0x336   : > { %v4741_v10 = vpop.eup %4740  ;;  %v1779_v27 = vadd.f32 1.0, %v4739_v20  ;;  %v1835_v58 = vpack.c.bf16 %v1804_v49, %v1803_v45 }
 0x337   : > { %v4743_v36 = vpop.eup %4742  ;;  %4752 = vrcp.f32 %v1781_v33  ;;  %v1782_v22 = vadd.f32 1.0, %v4741_v10 }
 0x338   : > { %v4745_v53 = vpop.eup %4744  ;;  %4754 = vrcp.f32 %v1779_v27  ;;  %v1780_v11 = vadd.f32 1.0, %v4743_v36  ;;  %4167 = vmatprep.mubr.bf16.mxu0 %v1835_v58 }
 0x339   : > { %v4747_v62 = vpop.eup %4746  ;;  %4756 = vrcp.f32 %v1782_v22  ;;  %4168 = vmatmul.mubr.bf16.gmra.mrb[44].mxu0 %v1836_v4  ;;  %v1809_v40 = vmul.f32 %v4745_v53, %v5692_v17 }
 0x33a   : > { %v4749_v0 = vpop.eup %4748  ;;  %4758 = vrcp.f32 %v1780_v11  ;;  %v1807_v25 = vmul.f32 %v4747_v62, %v5696_v3 }
 0x33b   : > { %v4751_v26 = vpop.eup %4750  ;;  %v1810_v38 = vmul.f32 %v4749_v0, %v5702_v34 }
 0x33c   : > { %v1808_v2 = vmul.f32 %v4751_v26, %v5705_v43  ;;  %v4466_v43 = vld [vmem:[%s6367_s5 + $0x60] sm:$0xff]  }
 0x33d   : > { %v1838_v24 = vpack.c.bf16 %v1810_v38, %v1809_v40  ;;  %4187 = vmatprep.subr.bf16.mxu1 %v4466_v43 }
 0x33e   : > { %v1837_v18 = vpack.c.bf16 %v1808_v2, %v1807_v25  ;;  %4188 = vmatpush3.bf16.msra.mxu1 %v4466_v43 }
 0x340   : > { %4171 = vmatprep.mubr.bf16.mxu0 %v1837_v18 }
 0x341   : > { %v4753_v61 = vpop.eup %4752  ;;  %4172 = vmatmul.mubr.bf16.gmra.mrb[48].mxu0 %v1838_v24 }
 0x342   : > { %v4755_v31 = vpop.eup %4754  ;;  %v1813_v8 = vmul.f32 %v4753_v61, %v5721_v29  ;;  %v4467_v29 = vld [vmem:[%s6367_s5 + $0x68] sm:$0xff]  }
 0x343   : > { %v4757_v56 = vpop.eup %4756  ;;  %v1811_v17 = vmul.f32 %v4755_v31, %v5729_v59  ;;  %4189 = vmatprep.subr.bf16.mxu1 %v4467_v29  ;;  %v4468_v59 = vld [vmem:[%s6367_s5 + $0x70] sm:$0xff]  }
 0x344   : > { %v4759_v32 = vpop.eup %4758  ;;  %v1814_v57 = vmul.f32 %v4757_v56, %v5737_v19  ;;  %4190 = vmatpush3.bf16.msra.mxu1 %v4467_v29  ;;  %v4469_v19 = vld [vmem:[%s6367_s5 + $0x78] sm:$0xff]  }
 0x345   : > { %v1812_v34 = vmul.f32 %v4759_v32, %v5739_v47  ;;  %4191 = vmatprep.subr.bf16.mxu1 %v4468_v59  ;;  %v5774_v47 = vld [vmem:[%s6368_s6 + $0x1] ss:$0 sm:$0xff] }
 0x346   : > { %v1840_v6 = vpack.c.bf16 %v1814_v57, %v1813_v8 }
 0x347   : > { %v1839_v3 = vpack.c.bf16 %v1812_v34, %v1811_v17 }
 0x348   : > { %4192 = vmatpush3.bf16.msra.mxu1 %v4468_v59 }
 0x349   : > { %4175 = vmatprep.mubr.bf16.mxu0 %v1839_v3  ;;  %4193 = vmatprep.subr.bf16.mxu1 %v4469_v19 }
 0x34a   : > { %4176 = vmatmul.mubr.bf16.gmra.mrb[52].mxu0 %v1840_v6 }
 0x34c   : > { %4194 = vmatpush3.bf16.msra.mxu1 %v4469_v19 }
 0x34d   : > { %4263 = vmatprep.subr.bf16.mxu1 %v4480_v50 }
 0x403   : > { %v4165_v41 = vpop.f32.mrb[40].mxu0 }
 0x404   : > { %v5777_v16 = vadd.f32 %v4165_v41, %v5774_v47  ;;  %v1929_v28 = vpop.f32.mrb[41].mxu0 }
 0x405   : > { %v5780_v9 = vadd.f32 %v5774_v47, %v1929_v28  ;;  %v4166_v45 = vpop.f32.mrb[42].mxu0 }
 0x406   : > { %v1994_v49 = vsub.f32 0.0, %v5777_v16  ;;  %v5784_v20 = vadd.f32 %v4166_v45, %v5774_v47  ;;  %v1932_v33 = vpop.f32.mrb[43].mxu0 }
 0x407   : > { %v1992_v4 = vsub.f32 0.0, %v5780_v9  ;;  %v5788_v10 = vadd.f32 %v5774_v47, %v1932_v33 }
 0x408   : > { %v2012_v27 = vmul.f32 1.442695, %v1994_v49  ;;  %v1995_v58 = vsub.f32 0.0, %v5784_v20 }
 0x409   : > { %v2008_v36 = vmul.f32 1.442695, %v1992_v4  ;;  %v1993_v22 = vsub.f32 0.0, %v5788_v10 }
 0x40a   : > { %4760 = vpow2.f32 %v2012_v27  ;;  %v2014_v53 = vmul.f32 1.442695, %v1995_v58 }
 0x40b   : > { %4762 = vpow2.f32 %v2008_v36  ;;  %v2010_v11 = vmul.f32 1.442695, %v1993_v22 }
 0x40c   : > { %4764 = vpow2.f32 %v2014_v53  ;;  %v4169_v62 = vpop.f32.mrb[44].mxu0 }
 0x40d   : > { %4766 = vpow2.f32 %v2010_v11  ;;  %v5793_v0 = vadd.f32 %v4169_v62, %v5774_v47  ;;  %v1945_v26 = vpop.f32.mrb[45].mxu0 }
 0x40e   : > { %v5796_v40 = vadd.f32 %v5774_v47, %v1945_v26  ;;  %v4170_v38 = vpop.f32.mrb[46].mxu0 }
 0x40f   : > { %v1998_v25 = vsub.f32 0.0, %v5793_v0  ;;  %v5800_v2 = vadd.f32 %v4170_v38, %v5774_v47  ;;  %v1948_v24 = vpop.f32.mrb[47].mxu0 }
 0x410   : > { %v1996_v18 = vsub.f32 0.0, %v5796_v40  ;;  %v5804_v61 = vadd.f32 %v5774_v47, %v1948_v24 }
 0x411   : > { %v2020_v31 = vmul.f32 1.442695, %v1998_v25  ;;  %v1999_v56 = vsub.f32 0.0, %v5800_v2 }
 0x412   : > { %v2016_v32 = vmul.f32 1.442695, %v1996_v18  ;;  %v1997_v8 = vsub.f32 0.0, %v5804_v61 }
 0x413   : > { %4768 = vpow2.f32 %v2020_v31  ;;  %v2022_v57 = vmul.f32 1.442695, %v1999_v56 }
 0x414   : > { %v4761_v17 = vpop.eup %4760  ;;  %4770 = vpow2.f32 %v2016_v32  ;;  %v2018_v34 = vmul.f32 1.442695, %v1997_v8  ;;  %v4173_v6 = vpop.f32.mrb[48].mxu0 }
 0x415   : > { %v4763_v3 = vpop.eup %4762  ;;  %v2042_v43 = vadd.f32 1.0, %v4761_v17  ;;  %4772 = vpow2.f32 %v2022_v57  ;;  %v5809_v29 = vadd.f32 %v4173_v6, %v5774_v47  ;;  %v1961_v59 = vpop.f32.mrb[49].mxu0 }
 0x416   : > { %v4765_v19 = vpop.eup %4764  ;;  %v2040_v41 = vadd.f32 1.0, %v4763_v3  ;;  %4774 = vpow2.f32 %v2018_v34  ;;  %v5812_v28 = vadd.f32 %v5774_v47, %v1961_v59  ;;  %v4174_v45 = vpop.f32.mrb[50].mxu0 }
 0x417   : > { %v4767_v49 = vpop.eup %4766  ;;  %4776 = vrcp.f32 %v2042_v43  ;;  %v2043_v33 = vadd.f32 1.0, %v4765_v19  ;;  %v2002_v4 = vsub.f32 0.0, %v5809_v29  ;;  %v5816_v27 = vadd.f32 %v4174_v45, %v5774_v47  ;;  %v1964_v58 = vpop.f32.mrb[51].mxu0 }
 0x418   : > { %4778 = vrcp.f32 %v2040_v41  ;;  %v2041_v36 = vadd.f32 1.0, %v4767_v49  ;;  %v2000_v22 = vsub.f32 0.0, %v5812_v28  ;;  %v5820_v53 = vadd.f32 %v5774_v47, %v1964_v58 }
 0x419   : > { %4780 = vrcp.f32 %v2043_v33  ;;  %v2028_v11 = vmul.f32 1.442695, %v2002_v4  ;;  %v2003_v62 = vsub.f32 0.0, %v5816_v27 }
 0x41a   : > { %4782 = vrcp.f32 %v2041_v36  ;;  %v2024_v26 = vmul.f32 1.442695, %v2000_v22  ;;  %v2001_v38 = vsub.f32 0.0, %v5820_v53 }
 0x41b   : > { %4784 = vpow2.f32 %v2028_v11  ;;  %v2030_v25 = vmul.f32 1.442695, %v2003_v62 }
 0x41c   : > { %4786 = vpow2.f32 %v2024_v26  ;;  %v2026_v24 = vmul.f32 1.442695, %v2001_v38 }
 0x41d   : > { %v4769_v18 = vpop.eup %4768  ;;  %4788 = vpow2.f32 %v2030_v25  ;;  %v4177_v31 = vpop.f32.mrb[52].mxu0 }
 0x41e   : > { %v4771_v56 = vpop.eup %4770  ;;  %v2046_v32 = vadd.f32 1.0, %v4769_v18  ;;  %4790 = vpow2.f32 %v2026_v24  ;;  %v5825_v8 = vadd.f32 %v4177_v31, %v5774_v47  ;;  %v1977_v57 = vpop.f32.mrb[53].mxu0 }
 0x41f   : > { %v4773_v17 = vpop.eup %4772  ;;  %v2044_v34 = vadd.f32 1.0, %v4771_v56  ;;  %v5828_v6 = vadd.f32 %v5774_v47, %v1977_v57  ;;  %v4178_v3 = vpop.f32.mrb[54].mxu0 }
 0x420   : > { %v4775_v43 = vpop.eup %4774  ;;  %4792 = vrcp.f32 %v2046_v32  ;;  %v2047_v59 = vadd.f32 1.0, %v4773_v17  ;;  %v2006_v19 = vsub.f32 0.0, %v5825_v8  ;;  %v5832_v41 = vadd.f32 %v4178_v3, %v5774_v47  ;;  %v1980_v45 = vpop.f32.mrb[55].mxu0 }
 0x421   : > { %v4777_v49 = vpop.eup %4776  ;;  %4794 = vrcp.f32 %v2044_v34  ;;  %v2045_v33 = vadd.f32 1.0, %v4775_v43  ;;  %v2004_v4 = vsub.f32 0.0, %v5828_v6  ;;  %v5836_v58 = vadd.f32 %v5774_v47, %v1980_v45 }
 0x422   : > { %v4779_v36 = vpop.eup %4778  ;;  %4796 = vrcp.f32 %v2047_v59  ;;  %v2036_v22 = vmul.f32 1.442695, %v2006_v19  ;;  %v2007_v11 = vsub.f32 0.0, %v5832_v41  ;;  %v2074_v24 = vmul.f32 %v4777_v49, %v5777_v16 }
 0x423   : > { %v4781_v62 = vpop.eup %4780  ;;  %4798 = vrcp.f32 %v2045_v33  ;;  %v2032_v26 = vmul.f32 1.442695, %v2004_v4  ;;  %v2005_v38 = vsub.f32 0.0, %v5836_v58  ;;  %v2072_v47 = vmul.f32 %v4779_v36, %v5780_v9 }
 0x424   : > { %v4783_v25 = vpop.eup %4782  ;;  %v2075_v18 = vmul.f32 %v4781_v62, %v5784_v20  ;;  %4800 = vpow2.f32 %v2036_v22  ;;  %v2038_v31 = vmul.f32 1.442695, %v2007_v11 }
 0x425   : > { %v4785_v56 = vpop.eup %4784  ;;  %v2073_v32 = vmul.f32 %v4783_v25, %v5788_v10  ;;  %4802 = vpow2.f32 %v2032_v26  ;;  %v2034_v57 = vmul.f32 1.442695, %v2005_v38 }
 0x426   : > { %v4787_v17 = vpop.eup %4786  ;;  %v2108_v34 = vpack.c.bf16 %v2075_v18, %v2074_v24  ;;  %v2050_v3 = vadd.f32 1.0, %v4785_v56  ;;  %4804 = vpow2.f32 %v2038_v31 }
 0x427   : > { %v4789_v43 = vpop.eup %4788  ;;  %v2048_v59 = vadd.f32 1.0, %v4787_v17  ;;  %4806 = vpow2.f32 %v2034_v57  ;;  %v2107_v19 = vpack.c.bf16 %v2073_v32, %v2072_v47 }
 0x428   : > { %v4791_v16 = vpop.eup %4790  ;;  %4808 = vrcp.f32 %v2050_v3  ;;  %v2051_v20 = vadd.f32 1.0, %v4789_v43 }
 0x429   : > { %4810 = vrcp.f32 %v2048_v59  ;;  %v2049_v45 = vadd.f32 1.0, %v4791_v16  ;;  %4195 = vmatprep.mubr.bf16.mxu1 %v2107_v19 }
 0x42a   : > { %v4793_v49 = vpop.eup %4792  ;;  %4812 = vrcp.f32 %v2051_v20  ;;  %4196 = vmatmul.mubr.bf16.vlgmr.msra.gmra.mrb[56].mxu1 %v2108_v34 }
 0x42b   : > { %v4795_v9 = vpop.eup %4794  ;;  %4814 = vrcp.f32 %v2049_v45  ;;  %v2078_v4 = vmul.f32 %v4793_v49, %v5793_v0  ;;  %4264 = vmatpush3.bf16.msra.mxu1 %v4480_v50 }
 0x42c   : > { %v4797_v10 = vpop.eup %4796  ;;  %v2076_v11 = vmul.f32 %v4795_v9, %v5796_v40  ;;  %4265 = vmatprep.subr.bf16.mxu1 %v4481_v13 }
 0x42d   : > { %v4799_v33 = vpop.eup %4798  ;;  %v2079_v36 = vmul.f32 %v4797_v10, %v5800_v2 }
 0x42e   : > { %v4801_v22 = vpop.eup %4800  ;;  %v2077_v62 = vmul.f32 %v4799_v33, %v5804_v61  ;;  %v4475_v33 = vld [vmem:[%s6370_s8 + $0x28] sm:$0xff]  }
 0x42f   : > { %v4803_v26 = vpop.eup %4802  ;;  %v2054_v38 = vadd.f32 1.0, %v4801_v22  ;;  %v2110_v25 = vpack.c.bf16 %v2079_v36, %v2078_v4  ;;  %v4476_v4 = vld [vmem:[%s6370_s8 + $0x30] sm:$0xff]   ;;  %v4477_v36 = vld [vmem:[%s6370_s8 + $0x38] sm:$0xff]   ;;  %v5883_v22 = vld [vmem:[%s6369_s7] sm:$0xff]   ;;  %4266 = vmatpush3.bf16.msra.mxu1 %v4481_v13 }
 0x430   : > { %v4805_v24 = vpop.eup %4804  ;;  %v2052_v18 = vadd.f32 1.0, %v4803_v26  ;;  %v2109_v31 = vpack.c.bf16 %v2077_v62, %v2076_v11  ;;  %v5889_v11 = vld [vmem:[%s6368_s6 + $0x2] ss:$0 sm:$0xff]  ;;  %4267 = vmatprep.subr.bf16.mxu1 %v4482_v12 }
 0x431   : > { %v4807_v56 = vpop.eup %4806  ;;  %4816 = vrcp.f32 %v2054_v38  ;;  %v2055_v47 = vadd.f32 1.0, %v4805_v24 }
 0x432   : > { %v4809_v32 = vpop.eup %4808  ;;  %4818 = vrcp.f32 %v2052_v18  ;;  %v2053_v57 = vadd.f32 1.0, %v4807_v56  ;;  %4199 = vmatprep.mubr.bf16.mxu1 %v2109_v31 }
 0x433   : > { %v4811_v0 = vpop.eup %4810  ;;  %4820 = vrcp.f32 %v2055_v47  ;;  %4200 = vmatmul.mubr.bf16.gmra.mrb[60].mxu1 %v2110_v25  ;;  %v2082_v61 = vmul.f32 %v4809_v32, %v5809_v29 }
 0x434   : > { %v4813_v2 = vpop.eup %4812  ;;  %4822 = vrcp.f32 %v2053_v57  ;;  %v2080_v34 = vmul.f32 %v4811_v0, %v5812_v28  ;;  %4268 = vmatpush3.bf16.msra.mxu1 %v4482_v12 }
 0x435   : > { %v4815_v40 = vpop.eup %4814  ;;  %v2083_v17 = vmul.f32 %v4813_v2, %v5816_v27  ;;  %4269 = vmatprep.subr.bf16.mxu1 %v4483_v39 }
 0x436   : > { %v2081_v3 = vmul.f32 %v4815_v40, %v5820_v53  ;;  %v4470_v53 = vld [vmem:[%s6370_s8] sm:$0xff]  }
 0x437   : > { %v2112_v43 = vpack.c.bf16 %v2083_v17, %v2082_v61  ;;  %4211 = vmatprep.subr.bf16.mxu0 %v4470_v53 }
 0x438   : > { %v2111_v59 = vpack.c.bf16 %v2081_v3, %v2080_v34  ;;  %4212 = vmatpush3.bf16.msra.mxu0 %v4470_v53  ;;  %4270 = vmatpush3.bf16.msra.mxu1 %v4483_v39 }
 0x43a   : > { %4203 = vmatprep.mubr.bf16.mxu1 %v2111_v59 }
 0x43b   : > { %v4817_v19 = vpop.eup %4816  ;;  %4204 = vmatmul.mubr.bf16.gmra.mrb[64].mxu1 %v2112_v43 }
 0x43c   : > { %v4819_v16 = vpop.eup %4818  ;;  %v2086_v49 = vmul.f32 %v4817_v19, %v5825_v8  ;;  %v4471_v8 = vld [vmem:[%s6370_s8 + $0x8] sm:$0xff]  }
 0x43d   : > { %v4821_v20 = vpop.eup %4820  ;;  %v2084_v29 = vmul.f32 %v4819_v16, %v5828_v6  ;;  %4213 = vmatprep.subr.bf16.mxu0 %v4471_v8  ;;  %v4472_v6 = vld [vmem:[%s6370_s8 + $0x10] sm:$0xff]  }
 0x43e   : > { %v4823_v45 = vpop.eup %4822  ;;  %v2087_v9 = vmul.f32 %v4821_v20, %v5832_v41  ;;  %4214 = vmatpush3.bf16.msra.mxu0 %v4471_v8  ;;  %v4473_v41 = vld [vmem:[%s6370_s8 + $0x18] sm:$0xff]  }
 0x43f   : > { %v2085_v27 = vmul.f32 %v4823_v45, %v5836_v58  ;;  %4215 = vmatprep.subr.bf16.mxu0 %v4472_v6  ;;  %v4474_v58 = vld [vmem:[%s6370_s8 + $0x20] sm:$0xff]  }
 0x440   : > { %v2114_v10 = vpack.c.bf16 %v2087_v9, %v2086_v49 }
 0x441   : > { %v2113_v28 = vpack.c.bf16 %v2085_v27, %v2084_v29 }
 0x442   : > { %4216 = vmatpush3.bf16.msra.mxu0 %v4472_v6 }
 0x443   : > { %4207 = vmatprep.mubr.bf16.mxu1 %v2113_v28  ;;  %4217 = vmatprep.subr.bf16.mxu0 %v4473_v41 }
 0x444   : > { %4208 = vmatmul.mubr.bf16.gmra.mrb[68].mxu1 %v2114_v10 }
 0x446   : > { %4218 = vmatpush3.bf16.msra.mxu0 %v4473_v41 }
 0x447   : > { %4219 = vmatprep.subr.bf16.mxu0 %v4474_v58 }
 0x44a   : > { %4220 = vmatpush3.bf16.msra.mxu0 %v4474_v58 }
 0x44b   : > { %4221 = vmatprep.subr.bf16.mxu0 %v4475_v33 }
 0x44e   : > { %4222 = vmatpush3.bf16.msra.mxu0 %v4475_v33 }
 0x44f   : > { %4223 = vmatprep.subr.bf16.mxu0 %v4476_v4 }
 0x452   : > { %4224 = vmatpush3.bf16.msra.mxu0 %v4476_v4 }
 0x453   : > { %4225 = vmatprep.subr.bf16.mxu0 %v4477_v36 }
 0x456   : > { %4226 = vmatpush3.bf16.msra.mxu0 %v4477_v36 }
 0x457   : > { %4243 = vmatprep.subr.bf16.mxu0 %v5883_v22 }
 0x4fd   : > { %v4197_v62 = vpop.f32.mrb[56].mxu1 }
 0x4fe   : > { %v5892_v26 = vadd.f32 %v4197_v62, %v5889_v11  ;;  %v2203_v38 = vpop.f32.mrb[57].mxu1 }
 0x4ff   : > { %v5895_v25 = vadd.f32 %v5889_v11, %v2203_v38  ;;  %v4198_v24 = vpop.f32.mrb[58].mxu1 }
 0x500   : > { %v2268_v18 = vsub.f32 0.0, %v5892_v26  ;;  %v5899_v31 = vadd.f32 %v4198_v24, %v5889_v11  ;;  %v2206_v56 = vpop.f32.mrb[59].mxu1 }
 0x501   : > { %v2266_v47 = vsub.f32 0.0, %v5895_v25  ;;  %v5903_v32 = vadd.f32 %v5889_v11, %v2206_v56 }
 0x502   : > { %v2286_v57 = vmul.f32 1.442695, %v2268_v18  ;;  %v2269_v0 = vsub.f32 0.0, %v5899_v31 }
 0x503   : > { %v2282_v2 = vmul.f32 1.442695, %v2266_v47  ;;  %v2267_v40 = vsub.f32 0.0, %v5903_v32 }
 0x504   : > { %4824 = vpow2.f32 %v2286_v57  ;;  %v2288_v61 = vmul.f32 1.442695, %v2269_v0 }
 0x505   : > { %4826 = vpow2.f32 %v2282_v2  ;;  %v2284_v17 = vmul.f32 1.442695, %v2267_v40 }
 0x506   : > { %4828 = vpow2.f32 %v2288_v61  ;;  %v4201_v34 = vpop.f32.mrb[60].mxu1 }
 0x507   : > { %4830 = vpow2.f32 %v2284_v17  ;;  %v5908_v3 = vadd.f32 %v4201_v34, %v5889_v11  ;;  %v2219_v43 = vpop.f32.mrb[61].mxu1 }
 0x508   : > { %v5911_v59 = vadd.f32 %v5889_v11, %v2219_v43  ;;  %v4202_v19 = vpop.f32.mrb[62].mxu1 }
 0x509   : > { %v2272_v16 = vsub.f32 0.0, %v5908_v3  ;;  %v5915_v20 = vadd.f32 %v4202_v19, %v5889_v11  ;;  %v2222_v45 = vpop.f32.mrb[63].mxu1 }
 0x50a   : > { %v2270_v49 = vsub.f32 0.0, %v5911_v59  ;;  %v5919_v9 = vadd.f32 %v5889_v11, %v2222_v45 }
 0x50b   : > { %v2294_v29 = vmul.f32 1.442695, %v2272_v16  ;;  %v2273_v27 = vsub.f32 0.0, %v5915_v20 }
 0x50c   : > { %v2290_v10 = vmul.f32 1.442695, %v2270_v49  ;;  %v2271_v28 = vsub.f32 0.0, %v5919_v9 }
 0x50d   : > { %4832 = vpow2.f32 %v2294_v29  ;;  %v2296_v53 = vmul.f32 1.442695, %v2273_v27 }
 0x50e   : > { %v4825_v8 = vpop.eup %4824  ;;  %4834 = vpow2.f32 %v2290_v10  ;;  %v2292_v6 = vmul.f32 1.442695, %v2271_v28  ;;  %v4205_v41 = vpop.f32.mrb[64].mxu1 }
 0x50f   : > { %v4827_v58 = vpop.eup %4826  ;;  %v2316_v33 = vadd.f32 1.0, %v4825_v8  ;;  %4836 = vpow2.f32 %v2296_v53  ;;  %v5924_v4 = vadd.f32 %v4205_v41, %v5889_v11  ;;  %v2235_v36 = vpop.f32.mrb[65].mxu1 }
 0x510   : > { %v4829_v62 = vpop.eup %4828  ;;  %v2314_v38 = vadd.f32 1.0, %v4827_v58  ;;  %4838 = vpow2.f32 %v2292_v6  ;;  %v5927_v24 = vadd.f32 %v5889_v11, %v2235_v36  ;;  %v4206_v18 = vpop.f32.mrb[66].mxu1 }
 0x511   : > { %v4831_v56 = vpop.eup %4830  ;;  %4840 = vrcp.f32 %v2316_v33  ;;  %v2317_v47 = vadd.f32 1.0, %v4829_v62  ;;  %v2276_v57 = vsub.f32 0.0, %v5924_v4  ;;  %v5931_v0 = vadd.f32 %v4206_v18, %v5889_v11  ;;  %v2238_v2 = vpop.f32.mrb[67].mxu1 }
 0x512   : > { %4842 = vrcp.f32 %v2314_v38  ;;  %v2315_v40 = vadd.f32 1.0, %v4831_v56  ;;  %v2274_v61 = vsub.f32 0.0, %v5927_v24  ;;  %v5935_v17 = vadd.f32 %v5889_v11, %v2238_v2 }
 0x513   : > { %4844 = vrcp.f32 %v2317_v47  ;;  %v2302_v34 = vmul.f32 1.442695, %v2276_v57  ;;  %v2277_v43 = vsub.f32 0.0, %v5931_v0 }
 0x514   : > { %4846 = vrcp.f32 %v2315_v40  ;;  %v2298_v19 = vmul.f32 1.442695, %v2274_v61  ;;  %v2275_v16 = vsub.f32 0.0, %v5935_v17 }
 0x515   : > { %4848 = vpow2.f32 %v2302_v34  ;;  %v2304_v45 = vmul.f32 1.442695, %v2277_v43 }
 0x516   : > { %4850 = vpow2.f32 %v2298_v19  ;;  %v2300_v49 = vmul.f32 1.442695, %v2275_v16 }
 0x517   : > { %v4833_v29 = vpop.eup %4832  ;;  %4852 = vpow2.f32 %v2304_v45  ;;  %v4209_v27 = vpop.f32.mrb[68].mxu1 }
 0x518   : > { %v4835_v10 = vpop.eup %4834  ;;  %v2320_v28 = vadd.f32 1.0, %v4833_v29  ;;  %4854 = vpow2.f32 %v2300_v49  ;;  %v5940_v53 = vadd.f32 %v4209_v27, %v5889_v11  ;;  %v2251_v8 = vpop.f32.mrb[69].mxu1 }
 0x519   : > { %v4837_v6 = vpop.eup %4836  ;;  %v2318_v41 = vadd.f32 1.0, %v4835_v10  ;;  %v5943_v58 = vadd.f32 %v5889_v11, %v2251_v8  ;;  %v4210_v33 = vpop.f32.mrb[70].mxu1 }
 0x51a   : > { %v4839_v36 = vpop.eup %4838  ;;  %4856 = vrcp.f32 %v2320_v28  ;;  %v2321_v62 = vadd.f32 1.0, %v4837_v6  ;;  %v2280_v38 = vsub.f32 0.0, %v5940_v53  ;;  %v5947_v18 = vadd.f32 %v4210_v33, %v5889_v11  ;;  %v2254_v56 = vpop.f32.mrb[71].mxu1 }
 0x51b   : > { %v4841_v47 = vpop.eup %4840  ;;  %4858 = vrcp.f32 %v2318_v41  ;;  %v2319_v57 = vadd.f32 1.0, %v4839_v36  ;;  %v2278_v2 = vsub.f32 0.0, %v5943_v58  ;;  %v5951_v40 = vadd.f32 %v5889_v11, %v2254_v56 }
 0x51c   : > { %v4843_v61 = vpop.eup %4842  ;;  %4860 = vrcp.f32 %v2321_v62  ;;  %v2310_v34 = vmul.f32 1.442695, %v2280_v38  ;;  %v2281_v43 = vsub.f32 0.0, %v5947_v18  ;;  %v2348_v29 = vmul.f32 %v4841_v47, %v5892_v26  ;;  %v4479_v47 = vld [vmem:[%s6369_s7 + $0x8] sm:$0xff]  }
 0x51d   : > { %v4845_v19 = vpop.eup %4844  ;;  %4862 = vrcp.f32 %v2319_v57  ;;  %v2306_v16 = vmul.f32 1.442695, %v2278_v2  ;;  %v2279_v45 = vsub.f32 0.0, %v5951_v40  ;;  %v2346_v11 = vmul.f32 %v4843_v61, %v5895_v25 }
 0x51e   : > { %v4847_v49 = vpop.eup %4846  ;;  %v2349_v27 = vmul.f32 %v4845_v19, %v5899_v31  ;;  %4864 = vpow2.f32 %v2310_v34  ;;  %v2312_v10 = vmul.f32 1.442695, %v2281_v43 }
 0x51f   : > { %v4849_v28 = vpop.eup %4848  ;;  %v2347_v8 = vmul.f32 %v4847_v49, %v5903_v32  ;;  %4866 = vpow2.f32 %v2306_v16  ;;  %v2308_v6 = vmul.f32 1.442695, %v2279_v45 }
 0x520   : > { %v4851_v41 = vpop.eup %4850  ;;  %v2375_v33 = vpack.c.bf16 %v2349_v27, %v2348_v29  ;;  %v2324_v36 = vadd.f32 1.0, %v4849_v28  ;;  %4868 = vpow2.f32 %v2312_v10 }
 0x521   : > { %v4853_v62 = vpop.eup %4852  ;;  %v2322_v38 = vadd.f32 1.0, %v4851_v41  ;;  %4870 = vpow2.f32 %v2308_v6  ;;  %v2374_v56 = vpack.c.bf16 %v2347_v8, %v2346_v11 }
 0x522   : > { %v4855_v26 = vpop.eup %4854  ;;  %4872 = vrcp.f32 %v2324_v36  ;;  %v2325_v31 = vadd.f32 1.0, %v4853_v62 }
 0x523   : > { %4874 = vrcp.f32 %v2322_v38  ;;  %v2323_v25 = vadd.f32 1.0, %v4855_v26  ;;  %4227 = vmatprep.mubr.bf16.mxu0 %v2374_v56 }
 0x524   : > { %v4857_v32 = vpop.eup %4856  ;;  %4876 = vrcp.f32 %v2325_v31  ;;  %4228 = vmatmul.mubr.bf16.vlgmr.msra.gmra.mrb[56].mxu0 %v2375_v33 }
 0x525   : > { %v4859_v57 = vpop.eup %4858  ;;  %4878 = vrcp.f32 %v2323_v25  ;;  %4244 = vmatpush3.bf16.msra.mxu0 %v5883_v22  ;;  %v2352_v34 = vmul.f32 %v4857_v32, %v5908_v3 }
 0x526   : > { %v4861_v2 = vpop.eup %4860  ;;  %4245 = vmatprep.subr.bf16.mxu0 %v4479_v47  ;;  %v2350_v16 = vmul.f32 %v4859_v57, %v5911_v59 }
 0x527   : > { %v4863_v61 = vpop.eup %4862  ;;  %v2353_v43 = vmul.f32 %v4861_v2, %v5915_v20 }
 0x528   : > { %v4865_v19 = vpop.eup %4864  ;;  %v2351_v45 = vmul.f32 %v4863_v61, %v5919_v9 }
 0x529   : > { %v4867_v49 = vpop.eup %4866  ;;  %v2328_v29 = vadd.f32 1.0, %v4865_v19  ;;  %v2377_v27 = vpack.c.bf16 %v2353_v43, %v2352_v34  ;;  %4246 = vmatpush3.bf16.msra.mxu0 %v4479_v47 }
 0x52a   : > { %v4869_v10 = vpop.eup %4868  ;;  %v2326_v28 = vadd.f32 1.0, %v4867_v49  ;;  %v2376_v11 = vpack.c.bf16 %v2351_v45, %v2350_v16 }
 0x52b   : > { %v4871_v22 = vpop.eup %4870  ;;  %4880 = vrcp.f32 %v2328_v29  ;;  %v2329_v8 = vadd.f32 1.0, %v4869_v10 }
 0x52c   : > { %v4873_v6 = vpop.eup %4872  ;;  %4882 = vrcp.f32 %v2326_v28  ;;  %v2327_v3 = vadd.f32 1.0, %v4871_v22  ;;  %4231 = vmatprep.mubr.bf16.mxu0 %v2376_v11 }
 0x52d   : > { %v4875_v20 = vpop.eup %4874  ;;  %4884 = vrcp.f32 %v2329_v8  ;;  %4232 = vmatmul.mubr.bf16.gmra.mrb[60].mxu0 %v2377_v27  ;;  %v2356_v41 = vmul.f32 %v4873_v6, %v5924_v4 }
 0x52e   : > { %v4877_v59 = vpop.eup %4876  ;;  %4886 = vrcp.f32 %v2327_v3  ;;  %v2354_v36 = vmul.f32 %v4875_v20, %v5927_v24 }
 0x52f   : > { %v4879_v9 = vpop.eup %4878  ;;  %v2357_v33 = vmul.f32 %v4877_v59, %v5931_v0 }
 0x530   : > { %v2355_v62 = vmul.f32 %v4879_v9, %v5935_v17 }
 0x531   : > { %v2379_v38 = vpack.c.bf16 %v2357_v33, %v2356_v41 }
 0x532   : > { %v2378_v56 = vpack.c.bf16 %v2355_v62, %v2354_v36 }
 0x534   : > { %4235 = vmatprep.mubr.bf16.mxu0 %v2378_v56 }
 0x535   : > { %v4881_v26 = vpop.eup %4880  ;;  %4236 = vmatmul.mubr.bf16.gmra.mrb[64].mxu0 %v2379_v38 }
 0x536   : > { %v4883_v31 = vpop.eup %4882  ;;  %v2360_v32 = vmul.f32 %v4881_v26, %v5940_v53 }
 0x537   : > { %v4885_v47 = vpop.eup %4884  ;;  %v2358_v4 = vmul.f32 %v4883_v31, %v5943_v58 }
 0x538   : > { %v4887_v25 = vpop.eup %4886  ;;  %v2361_v57 = vmul.f32 %v4885_v47, %v5947_v18 }
 0x539   : > { %v2359_v0 = vmul.f32 %v4887_v25, %v5951_v40 }
 0x53a   : > { %v2381_v2 = vpack.c.bf16 %v2361_v57, %v2360_v32 }
 0x53b   : > { %v2380_v24 = vpack.c.bf16 %v2359_v0, %v2358_v4 }
 0x53d   : > { %4239 = vmatprep.mubr.bf16.mxu0 %v2380_v24 }
 0x53e   : > { %4240 = vmatmul.mubr.bf16.gmra.mrb[68].mxu0 %v2381_v2 }
 0x53f   : > { %4247 = vmatprep.mubr.msk.bf16.mxu0 %vm468_vm0, %v2362_v48  ;;  %v4485_v48 = vld [vmem:[%s6370_s8 + $0x68] sm:$0xff]  }
 0x546   : > { %4248 = vmatmul.mubr.msk.bf16.vlgmr.msra.gmra.mrb[56].mxu0 %vm468_vm0, %v2363_v46  ;;  %v4484_v46 = vld [vmem:[%s6370_s8 + $0x60] sm:$0xff]  }
 0x547   : > { %4251 = vmatprep.mubr.msk.bf16.mxu0 %vm468_vm0, %v2364_v23  ;;  %4271 = vmatprep.subr.bf16.mxu1 %v4484_v46 }
 0x548   : > { %4272 = vmatpush3.bf16.msra.mxu1 %v4484_v46 }
 0x549   : > { %4273 = vmatprep.subr.bf16.mxu1 %v4485_v48 }
 0x54c   : > { %4274 = vmatpush3.bf16.msra.mxu1 %v4485_v48 }
 0x54d   : > { %4275 = vmatprep.subr.bf16.mxu1 %v4486_v51 }
 0x54e   : > { %4252 = vmatmul.mubr.msk.bf16.gmra.mrb[60].mxu0 %vm468_vm0, %v2365_v14 }
 0x54f   : > { %4255 = vmatprep.mubr.msk.bf16.mxu0 %vm468_vm0, %v2366_v21 }
 0x550   : > { %4276 = vmatpush3.bf16.msra.mxu1 %v4486_v51 }
 0x551   : > { %4277 = vmatprep.subr.bf16.mxu1 %v4487_v37 }
 0x554   : > { %4278 = vmatpush3.bf16.msra.mxu1 %v4487_v37 }
 0x556   : > { %4256 = vmatmul.mubr.msk.bf16.gmra.mrb[64].mxu0 %vm468_vm0, %v2367_v15 }
 0x557   : > { %4259 = vmatprep.mubr.msk.bf16.mxu0 %vm468_vm0, %v2368_v35 }
 0x55e   : > { %4260 = vmatmul.mubr.msk.bf16.gmra.mrb[68].mxu0 %vm468_vm0, %v2369_v7 }
 0x619   : > { %v4249_v60 = vpop.f32.mrb[56].mxu0 }
 0x61a   : > { %v6037_v14 = vadd.f32 %v4249_v60, %v6034_v54  ;;  %v2613_v23 = vpop.f32.mrb[57].mxu0 }
 0x61b   : > { %v6040_v42 = vadd.f32 %v6034_v54, %v2613_v23  ;;  %v4250_v52 = vpop.f32.mrb[58].mxu0 }
 0x61c   : > { %v2701_v55 = vsub.f32 0.0, %v6037_v14  ;;  %v6044_v1 = vadd.f32 %v4250_v52, %v6034_v54  ;;  %v2616_v15 = vpop.f32.mrb[59].mxu0 }
 0x61d   : > { %v2699_v21 = vsub.f32 0.0, %v6040_v42  ;;  %v6048_v44 = vadd.f32 %v6034_v54, %v2616_v15 }
 0x61e   : > { %v2719_v30 = vmul.f32 1.442695, %v2701_v55  ;;  %v2702_v5 = vsub.f32 0.0, %v6044_v1 }
 0x61f   : > { %v2715_v63 = vmul.f32 1.442695, %v2699_v21  ;;  %v2700_v7 = vsub.f32 0.0, %v6048_v44 }
 0x620   : > { %4888 = vpow2.f32 %v2719_v30  ;;  %v2721_v35 = vmul.f32 1.442695, %v2702_v5 }
 0x621   : > { %4890 = vpow2.f32 %v2715_v63  ;;  %v2717_v17 = vmul.f32 1.442695, %v2700_v7  ;;  %v4253_v53 = vpop.f32.mrb[60].mxu0 }
 0x622   : > { %4892 = vpow2.f32 %v2721_v35  ;;  %v6053_v58 = vadd.f32 %v4253_v53, %v6034_v54  ;;  %v2629_v18 = vpop.f32.mrb[61].mxu0 }
 0x623   : > { %4894 = vpow2.f32 %v2717_v17  ;;  %v6056_v40 = vadd.f32 %v6034_v54, %v2629_v18  ;;  %v4254_v61 = vpop.f32.mrb[62].mxu0 }
 0x624   : > { %v2705_v34 = vsub.f32 0.0, %v6053_v58  ;;  %v6060_v43 = vadd.f32 %v4254_v61, %v6034_v54  ;;  %v2632_v19 = vpop.f32.mrb[63].mxu0 }
 0x625   : > { %v2703_v16 = vsub.f32 0.0, %v6056_v40  ;;  %v6064_v45 = vadd.f32 %v6034_v54, %v2632_v19 }
 0x626   : > { %v2727_v49 = vmul.f32 1.442695, %v2705_v34  ;;  %v2706_v29 = vsub.f32 0.0, %v6060_v43 }
 0x627   : > { %v2723_v27 = vmul.f32 1.442695, %v2703_v16  ;;  %v2704_v10 = vsub.f32 0.0, %v6064_v45 }
 0x628   : > { %4896 = vpow2.f32 %v2727_v49  ;;  %v2729_v28 = vmul.f32 1.442695, %v2706_v29 }
 0x629   : > { %4898 = vpow2.f32 %v2723_v27  ;;  %v2725_v11 = vmul.f32 1.442695, %v2704_v10  ;;  %v4257_v22 = vpop.f32.mrb[64].mxu0 }
 0x62a   : > { %v4889_v8 = vpop.eup %4888  ;;  %4900 = vpow2.f32 %v2729_v28  ;;  %v6069_v6 = vadd.f32 %v4257_v22, %v6034_v54  ;;  %v2645_v3 = vpop.f32.mrb[65].mxu0 }
 0x62b   : > { %v4891_v20 = vpop.eup %4890  ;;  %v2749_v59 = vadd.f32 1.0, %v4889_v8  ;;  %4902 = vpow2.f32 %v2725_v11  ;;  %v6072_v9 = vadd.f32 %v6034_v54, %v2645_v3  ;;  %v4258_v41 = vpop.f32.mrb[66].mxu0 }
 0x62c   : > { %v4893_v33 = vpop.eup %4892  ;;  %v2747_v36 = vadd.f32 1.0, %v4891_v20  ;;  %v2709_v62 = vsub.f32 0.0, %v6069_v6  ;;  %v6076_v38 = vadd.f32 %v4258_v41, %v6034_v54  ;;  %v2648_v56 = vpop.f32.mrb[67].mxu0 }
 0x62d   : > { %v4895_v26 = vpop.eup %4894  ;;  %4904 = vrcp.f32 %v2749_v59  ;;  %v2750_v31 = vadd.f32 1.0, %v4893_v33  ;;  %v2707_v47 = vsub.f32 0.0, %v6072_v9  ;;  %v6080_v25 = vadd.f32 %v6034_v54, %v2648_v56 }
 0x62e   : > { %4906 = vrcp.f32 %v2747_v36  ;;  %v2748_v32 = vadd.f32 1.0, %v4895_v26  ;;  %v2735_v57 = vmul.f32 1.442695, %v2709_v62  ;;  %v2710_v4 = vsub.f32 0.0, %v6076_v38 }
 0x62f   : > { %4908 = vrcp.f32 %v2750_v31  ;;  %v2731_v0 = vmul.f32 1.442695, %v2707_v47  ;;  %v2708_v2 = vsub.f32 0.0, %v6080_v25 }
 0x630   : > { %4910 = vrcp.f32 %v2748_v32  ;;  %v2737_v24 = vmul.f32 1.442695, %v2710_v4 }
 0x631   : > { %4912 = vpow2.f32 %v2735_v57  ;;  %v2733_v50 = vmul.f32 1.442695, %v2708_v2  ;;  %v4261_v13 = vpop.f32.mrb[68].mxu0 }
 0x632   : > { %v4897_v12 = vpop.eup %4896  ;;  %4914 = vpow2.f32 %v2731_v0  ;;  %v6085_v39 = vadd.f32 %v4261_v13, %v6034_v54  ;;  %v2661_v46 = vpop.f32.mrb[69].mxu0 }
 0x633   : > { %v4899_v48 = vpop.eup %4898  ;;  %v2753_v51 = vadd.f32 1.0, %v4897_v12  ;;  %4916 = vpow2.f32 %v2737_v24  ;;  %v6088_v37 = vadd.f32 %v6034_v54, %v2661_v46  ;;  %v4262_v60 = vpop.f32.mrb[70].mxu0 }
 0x634   : > { %v4901_v23 = vpop.eup %4900  ;;  %v2751_v52 = vadd.f32 1.0, %v4899_v48  ;;  %4918 = vpow2.f32 %v2733_v50  ;;  %v2713_v55 = vsub.f32 0.0, %v6085_v39  ;;  %v6092_v15 = vadd.f32 %v4262_v60, %v6034_v54  ;;  %v2664_v21 = vpop.f32.mrb[71].mxu0 }
 0x635   : > { %v4903_v30 = vpop.eup %4902  ;;  %4920 = vrcp.f32 %v2753_v51  ;;  %v2754_v5 = vadd.f32 1.0, %v4901_v23  ;;  %v2711_v63 = vsub.f32 0.0, %v6088_v37  ;;  %v6096_v7 = vadd.f32 %v6034_v54, %v2664_v21 }
 0x636   : > { %4922 = vrcp.f32 %v2751_v52  ;;  %v2752_v35 = vadd.f32 1.0, %v4903_v30  ;;  %v2743_v17 = vmul.f32 1.442695, %v2713_v55  ;;  %v2714_v53 = vsub.f32 0.0, %v6092_v15 }
 0x637   : > { %v4905_v18 = vpop.eup %4904  ;;  %4924 = vrcp.f32 %v2754_v5  ;;  %v2739_v61 = vmul.f32 1.442695, %v2711_v63  ;;  %v2712_v34 = vsub.f32 0.0, %v6096_v7 }
 0x638   : > { %v4907_v19 = vpop.eup %4906  ;;  %4926 = vrcp.f32 %v2752_v35  ;;  %v2745_v16 = vmul.f32 1.442695, %v2714_v53  ;;  %v2781_v54 = vmul.f32 %v4905_v18, %v6037_v14 }
 0x639   : > { %v4909_v49 = vpop.eup %4908  ;;  %4928 = vpow2.f32 %v2743_v17  ;;  %v2741_v29 = vmul.f32 1.442695, %v2712_v34  ;;  %v2779_v11 = vmul.f32 %v4907_v19, %v6040_v42  ;;  %v4494_v34 = vld [vmem:[%s6370_s8 + $0xb0] sm:$0xff]   ;;  %v4495_v19 = vld [vmem:[%s6370_s8 + $0xb8] sm:$0xff]  }
 0x63a   : > { %v4911_v27 = vpop.eup %4910  ;;  %v2782_v10 = vmul.f32 %v4909_v49, %v6044_v1  ;;  %4930 = vpow2.f32 %v2739_v61  ;;  %v4493_v61 = vld [vmem:[%s6370_s8 + $0xa8] sm:$0xff]  }
 0x63b   : > { %v4913_v28 = vpop.eup %4912  ;;  %v2780_v22 = vmul.f32 %v4911_v27, %v6048_v44  ;;  %4932 = vpow2.f32 %v2745_v16  ;;  %v6143_v16 = vld [vmem:[%s6371_s9 + $0x1] ss:$0 sm:$0xff] }
 0x63c   : > { %v4915_v8 = vpop.eup %4914  ;;  %v2815_v3 = vpack.c.bf16 %v2782_v10, %v2781_v54  ;;  %v2757_v20 = vadd.f32 1.0, %v4913_v28  ;;  %4934 = vpow2.f32 %v2741_v29 }
 0x63d   : > { %v4917_v59 = vpop.eup %4916  ;;  %v2755_v41 = vadd.f32 1.0, %v4915_v8  ;;  %v2814_v33 = vpack.c.bf16 %v2780_v22, %v2779_v11 }
 0x63e   : > { %v4919_v36 = vpop.eup %4918  ;;  %4936 = vrcp.f32 %v2757_v20  ;;  %v2758_v62 = vadd.f32 1.0, %v4917_v59 }
 0x63f   : > { %v4921_v14 = vpop.eup %4920  ;;  %4938 = vrcp.f32 %v2755_v41  ;;  %v2756_v1 = vadd.f32 1.0, %v4919_v36  ;;  %4279 = vmatprep.mubr.bf16.mxu1 %v2814_v33 }
 0x640   : > { %v4923_v56 = vpop.eup %4922  ;;  %4940 = vrcp.f32 %v2758_v62  ;;  %4280 = vmatmul.mubr.bf16.vlgmr.msra.gmra.mrb[72].mxu1 %v2815_v3  ;;  %v2785_v26 = vmul.f32 %v4921_v14, %v6053_v58 }
 0x641   : > { %v4925_v42 = vpop.eup %4924  ;;  %4942 = vrcp.f32 %v2756_v1  ;;  %v2783_v32 = vmul.f32 %v4923_v56, %v6056_v40 }
 0x642   : > { %v4927_v44 = vpop.eup %4926  ;;  %v2786_v31 = vmul.f32 %v4925_v42, %v6060_v43 }
 0x643   : > { %v4929_v47 = vpop.eup %4928  ;;  %v2784_v57 = vmul.f32 %v4927_v44, %v6064_v45 }
 0x644   : > { %v4931_v4 = vpop.eup %4930  ;;  %v2761_v0 = vadd.f32 1.0, %v4929_v47  ;;  %v2817_v2 = vpack.c.bf16 %v2786_v31, %v2785_v26 }
 0x645   : > { %v4933_v24 = vpop.eup %4932  ;;  %v2759_v50 = vadd.f32 1.0, %v4931_v4  ;;  %v2816_v13 = vpack.c.bf16 %v2784_v57, %v2783_v32 }
 0x646   : > { %v4935_v12 = vpop.eup %4934  ;;  %4944 = vrcp.f32 %v2761_v0  ;;  %v2762_v46 = vadd.f32 1.0, %v4933_v24 }
 0x647   : > { %4946 = vrcp.f32 %v2759_v50  ;;  %v2760_v48 = vadd.f32 1.0, %v4935_v12  ;;  %4283 = vmatprep.mubr.bf16.mxu1 %v2816_v13 }
 0x648   : > { %v4937_v58 = vpop.eup %4936  ;;  %4948 = vrcp.f32 %v2762_v46  ;;  %4284 = vmatmul.mubr.bf16.gmra.mrb[76].mxu1 %v2817_v2 }
 0x649   : > { %v4939_v43 = vpop.eup %4938  ;;  %4950 = vrcp.f32 %v2760_v48  ;;  %v2789_v45 = vmul.f32 %v4937_v58, %v6069_v6 }
 0x64a   : > { %v4941_v40 = vpop.eup %4940  ;;  %v2787_v23 = vmul.f32 %v4939_v43, %v6072_v9 }
 0x64b   : > { %v4943_v51 = vpop.eup %4942  ;;  %v2790_v60 = vmul.f32 %v4941_v40, %v6076_v38 }
 0x64c   : > { %v2788_v52 = vmul.f32 %v4943_v51, %v6080_v25  ;;  %v4488_v25 = vld [vmem:[%s6370_s8 + $0x80] sm:$0xff]  }
 0x64d   : > { %v2819_v55 = vpack.c.bf16 %v2790_v60, %v2789_v45  ;;  %4295 = vmatprep.subr.bf16.mxu1 %v4488_v25 }
 0x64e   : > { %v2818_v21 = vpack.c.bf16 %v2788_v52, %v2787_v23  ;;  %4296 = vmatpush3.bf16.msra.mxu1 %v4488_v25 }
 0x650   : > { %v4945_v30 = vpop.eup %4944  ;;  %4287 = vmatprep.mubr.bf16.mxu1 %v2818_v21 }
 0x651   : > { %v4947_v5 = vpop.eup %4946  ;;  %4288 = vmatmul.mubr.bf16.gmra.mrb[80].mxu1 %v2819_v55  ;;  %v2793_v17 = vmul.f32 %v4945_v30, %v6085_v39  ;;  %v4489_v39 = vld [vmem:[%s6370_s8 + $0x88] sm:$0xff]  }
 0x652   : > { %v4949_v63 = vpop.eup %4948  ;;  %v2791_v6 = vmul.f32 %v4947_v5, %v6088_v37  ;;  %4297 = vmatprep.subr.bf16.mxu1 %v4489_v39  ;;  %v4490_v37 = vld [vmem:[%s6370_s8 + $0x90] sm:$0xff]  }
 0x653   : > { %v4951_v35 = vpop.eup %4950  ;;  %v2794_v53 = vmul.f32 %v4949_v63, %v6092_v15  ;;  %4298 = vmatpush3.bf16.msra.mxu1 %v4489_v39  ;;  %v4491_v15 = vld [vmem:[%s6370_s8 + $0x98] sm:$0xff]  }
 0x654   : > { %v2792_v38 = vmul.f32 %v4951_v35, %v6096_v7  ;;  %4299 = vmatprep.subr.bf16.mxu1 %v4490_v37  ;;  %v4492_v7 = vld [vmem:[%s6370_s8 + $0xa0] sm:$0xff]  }
 0x655   : > { %v2821_v18 = vpack.c.bf16 %v2794_v53, %v2793_v17 }
 0x656   : > { %v2820_v9 = vpack.c.bf16 %v2792_v38, %v2791_v6 }
 0x657   : > { %4300 = vmatpush3.bf16.msra.mxu1 %v4490_v37 }
 0x658   : > { %4291 = vmatprep.mubr.bf16.mxu1 %v2820_v9  ;;  %4301 = vmatprep.subr.bf16.mxu1 %v4491_v15 }
 0x659   : > { %4292 = vmatmul.mubr.bf16.gmra.mrb[84].mxu1 %v2821_v18 }
 0x65b   : > { %4302 = vmatpush3.bf16.msra.mxu1 %v4491_v15 }
 0x65c   : > { %4303 = vmatprep.subr.bf16.mxu1 %v4492_v7 }
 0x65f   : > { %4304 = vmatpush3.bf16.msra.mxu1 %v4492_v7 }
 0x660   : > { %4305 = vmatprep.subr.bf16.mxu1 %v4493_v61 }
 0x663   : > { %4306 = vmatpush3.bf16.msra.mxu1 %v4493_v61 }
 0x664   : > { %4307 = vmatprep.subr.bf16.mxu1 %v4494_v34 }
 0x667   : > { %4308 = vmatpush3.bf16.msra.mxu1 %v4494_v34 }
 0x668   : > { %4309 = vmatprep.subr.bf16.mxu1 %v4495_v19 }
 0x66b   : > { %4310 = vmatpush3.bf16.msra.mxu1 %v4495_v19 }
 0x713   : > { %v4281_v49 = vpop.f32.mrb[72].mxu1 }
 0x714   : > { %v6146_v29 = vadd.f32 %v4281_v49, %v6143_v16  ;;  %v2910_v27 = vpop.f32.mrb[73].mxu1 }
 0x715   : > { %v6149_v54 = vadd.f32 %v6143_v16, %v2910_v27  ;;  %v4282_v10 = vpop.f32.mrb[74].mxu1 }
 0x716   : > { %v2975_v28 = vsub.f32 0.0, %v6146_v29  ;;  %v6153_v11 = vadd.f32 %v4282_v10, %v6143_v16  ;;  %v2913_v22 = vpop.f32.mrb[75].mxu1 }
 0x717   : > { %v2973_v8 = vsub.f32 0.0, %v6149_v54  ;;  %v6157_v3 = vadd.f32 %v6143_v16, %v2913_v22 }
 0x718   : > { %v2993_v20 = vmul.f32 1.442695, %v2975_v28  ;;  %v2976_v59 = vsub.f32 0.0, %v6153_v11 }
 0x719   : > { %v2989_v41 = vmul.f32 1.442695, %v2973_v8  ;;  %v2974_v33 = vsub.f32 0.0, %v6157_v3 }
 0x71a   : > { %4952 = vpow2.f32 %v2993_v20  ;;  %v2995_v36 = vmul.f32 1.442695, %v2976_v59 }
 0x71b   : > { %4954 = vpow2.f32 %v2989_v41  ;;  %v2991_v62 = vmul.f32 1.442695, %v2974_v33  ;;  %v4285_v14 = vpop.f32.mrb[76].mxu1 }
 0x71c   : > { %4956 = vpow2.f32 %v2995_v36  ;;  %v6162_v1 = vadd.f32 %v4285_v14, %v6143_v16  ;;  %v2926_v56 = vpop.f32.mrb[77].mxu1 }
 0x71d   : > { %4958 = vpow2.f32 %v2991_v62  ;;  %v6165_v42 = vadd.f32 %v6143_v16, %v2926_v56  ;;  %v4286_v44 = vpop.f32.mrb[78].mxu1 }
 0x71e   : > { %v2979_v26 = vsub.f32 0.0, %v6162_v1  ;;  %v6169_v31 = vadd.f32 %v4286_v44, %v6143_v16  ;;  %v2929_v47 = vpop.f32.mrb[79].mxu1 }
 0x71f   : > { %v2977_v32 = vsub.f32 0.0, %v6165_v42  ;;  %v6173_v57 = vadd.f32 %v6143_v16, %v2929_v47 }
 0x720   : > { %v3001_v4 = vmul.f32 1.442695, %v2979_v26  ;;  %v2980_v0 = vsub.f32 0.0, %v6169_v31 }
 0x721   : > { %v2997_v2 = vmul.f32 1.442695, %v2977_v32  ;;  %v2978_v24 = vsub.f32 0.0, %v6173_v57 }
 0x722   : > { %4960 = vpow2.f32 %v3001_v4  ;;  %v3003_v50 = vmul.f32 1.442695, %v2980_v0 }
 0x723   : > { %4962 = vpow2.f32 %v2997_v2  ;;  %v2999_v13 = vmul.f32 1.442695, %v2978_v24 }
 0x724   : > { %v4953_v12 = vpop.eup %4952  ;;  %4964 = vpow2.f32 %v3003_v50  ;;  %v4289_v46 = vpop.f32.mrb[80].mxu1 }
 0x725   : > { %v4955_v48 = vpop.eup %4954  ;;  %v3023_v58 = vadd.f32 1.0, %v4953_v12  ;;  %4966 = vpow2.f32 %v2999_v13  ;;  %v6178_v43 = vadd.f32 %v4289_v46, %v6143_v16  ;;  %v2942_v40 = vpop.f32.mrb[81].mxu1 }
 0x726   : > { %v4957_v51 = vpop.eup %4956  ;;  %v3021_v45 = vadd.f32 1.0, %v4955_v48  ;;  %v6181_v60 = vadd.f32 %v6143_v16, %v2942_v40  ;;  %v4290_v23 = vpop.f32.mrb[82].mxu1 }
 0x727   : > { %v4959_v52 = vpop.eup %4958  ;;  %4968 = vrcp.f32 %v3023_v58  ;;  %v3024_v55 = vadd.f32 1.0, %v4957_v51  ;;  %v2983_v21 = vsub.f32 0.0, %v6178_v43  ;;  %v6185_v30 = vadd.f32 %v4290_v23, %v6143_v16  ;;  %v2945_v5 = vpop.f32.mrb[83].mxu1 }
 0x728   : > { %4970 = vrcp.f32 %v3021_v45  ;;  %v3022_v63 = vadd.f32 1.0, %v4959_v52  ;;  %v2981_v35 = vsub.f32 0.0, %v6181_v60  ;;  %v6189_v17 = vadd.f32 %v6143_v16, %v2945_v5 }
 0x729   : > { %4972 = vrcp.f32 %v3024_v55  ;;  %v3009_v53 = vmul.f32 1.442695, %v2983_v21  ;;  %v2984_v6 = vsub.f32 0.0, %v6185_v30 }
 0x72a   : > { %4974 = vrcp.f32 %v3022_v63  ;;  %v3005_v38 = vmul.f32 1.442695, %v2981_v35  ;;  %v2982_v18 = vsub.f32 0.0, %v6189_v17 }
 0x72b   : > { %4976 = vpow2.f32 %v3009_v53  ;;  %v3011_v9 = vmul.f32 1.442695, %v2984_v6 }
 0x72c   : > { %v4961_v25 = vpop.eup %4960  ;;  %4978 = vpow2.f32 %v3005_v38  ;;  %v3007_v39 = vmul.f32 1.442695, %v2982_v18  ;;  %v4293_v37 = vpop.f32.mrb[84].mxu1 }
 0x72d   : > { %v4963_v15 = vpop.eup %4962  ;;  %v3027_v7 = vadd.f32 1.0, %v4961_v25  ;;  %4980 = vpow2.f32 %v3011_v9  ;;  %v6194_v61 = vadd.f32 %v4293_v37, %v6143_v16  ;;  %v2958_v34 = vpop.f32.mrb[85].mxu1 }
 0x72e   : > { %v4965_v19 = vpop.eup %4964  ;;  %v3025_v49 = vadd.f32 1.0, %v4963_v15  ;;  %4982 = vpow2.f32 %v3007_v39  ;;  %v6197_v27 = vadd.f32 %v6143_v16, %v2958_v34  ;;  %v4294_v10 = vpop.f32.mrb[86].mxu1 }
 0x72f   : > { %v4967_v28 = vpop.eup %4966  ;;  %4984 = vrcp.f32 %v3027_v7  ;;  %v3028_v22 = vadd.f32 1.0, %v4965_v19  ;;  %v2987_v8 = vsub.f32 0.0, %v6194_v61  ;;  %v6201_v20 = vadd.f32 %v4294_v10, %v6143_v16  ;;  %v2961_v59 = vpop.f32.mrb[87].mxu1 }
 0x730   : > { %4986 = vrcp.f32 %v3025_v49  ;;  %v3026_v41 = vadd.f32 1.0, %v4967_v28  ;;  %v2985_v33 = vsub.f32 0.0, %v6197_v27  ;;  %v6205_v36 = vadd.f32 %v6143_v16, %v2961_v59 }
 0x731   : > { %v4969_v62 = vpop.eup %4968  ;;  %4988 = vrcp.f32 %v3028_v22  ;;  %v3017_v14 = vmul.f32 1.442695, %v2987_v8  ;;  %v2988_v56 = vsub.f32 0.0, %v6201_v20 }
 0x732   : > { %v4971_v44 = vpop.eup %4970  ;;  %4990 = vrcp.f32 %v3026_v41  ;;  %v3013_v26 = vmul.f32 1.442695, %v2985_v33  ;;  %v2986_v47 = vsub.f32 0.0, %v6205_v36  ;;  %v3055_v2 = vmul.f32 %v4969_v62, %v6146_v29 }
 0x733   : > { %v4973_v32 = vpop.eup %4972  ;;  %4992 = vpow2.f32 %v3017_v14  ;;  %v3019_v4 = vmul.f32 1.442695, %v2988_v56  ;;  %v3053_v13 = vmul.f32 %v4971_v44, %v6149_v54  ;;  %v4501_v44 = vld [vmem:[%s6370_s8 + $0xe8] sm:$0xff]  }
 0x734   : > { %v4975_v0 = vpop.eup %4974  ;;  %v3056_v24 = vmul.f32 %v4973_v32, %v6153_v11  ;;  %4994 = vpow2.f32 %v3013_v26  ;;  %v3015_v16 = vmul.f32 1.442695, %v2986_v47  ;;  %v4502_v26 = vld [vmem:[%s6370_s8 + $0xf0] sm:$0xff]   ;;  %v4503_v47 = vld [vmem:[%s6370_s8 + $0xf8] sm:$0xff]   ;;  %v6252_v32 = vld [vmem:[%s6371_s9 + $0x2] ss:$0 sm:$0xff] }
 0x735   : > { %v4977_v50 = vpop.eup %4976  ;;  %v3054_v12 = vmul.f32 %v4975_v0, %v6157_v3  ;;  %4996 = vpow2.f32 %v3019_v4 }
 0x736   : > { %v4979_v46 = vpop.eup %4978  ;;  %v3089_v48 = vpack.c.bf16 %v3056_v24, %v3055_v2  ;;  %v3031_v58 = vadd.f32 1.0, %v4977_v50  ;;  %4998 = vpow2.f32 %v3015_v16 }
 0x737   : > { %v4981_v40 = vpop.eup %4980  ;;  %v3029_v51 = vadd.f32 1.0, %v4979_v46  ;;  %v3088_v45 = vpack.c.bf16 %v3054_v12, %v3053_v13 }
 0x738   : > { %v4983_v23 = vpop.eup %4982  ;;  %5000 = vrcp.f32 %v3031_v58  ;;  %v3032_v29 = vadd.f32 1.0, %v4981_v40 }
 0x739   : > { %v4985_v52 = vpop.eup %4984  ;;  %5002 = vrcp.f32 %v3029_v51  ;;  %v3030_v11 = vadd.f32 1.0, %v4983_v23  ;;  %4311 = vmatprep.mubr.bf16.mxu1 %v3088_v45 }
 0x73a   : > { %v4987_v55 = vpop.eup %4986  ;;  %5004 = vrcp.f32 %v3032_v29  ;;  %4312 = vmatmul.mubr.bf16.vlgmr.msra.gmra.mrb[88].mxu1 %v3089_v48  ;;  %v3059_v21 = vmul.f32 %v4985_v52, %v6162_v1 }
 0x73b   : > { %v4989_v54 = vpop.eup %4988  ;;  %5006 = vrcp.f32 %v3030_v11  ;;  %v3057_v35 = vmul.f32 %v4987_v55, %v6165_v42 }
 0x73c   : > { %v4991_v3 = vpop.eup %4990  ;;  %v3060_v5 = vmul.f32 %v4989_v54, %v6169_v31 }
 0x73d   : > { %v4993_v63 = vpop.eup %4992  ;;  %v3058_v53 = vmul.f32 %v4991_v3, %v6173_v57 }
 0x73e   : > { %v4995_v6 = vpop.eup %4994  ;;  %v3035_v38 = vadd.f32 1.0, %v4993_v63  ;;  %v3091_v18 = vpack.c.bf16 %v3060_v5, %v3059_v21 }
 0x73f   : > { %v4997_v9 = vpop.eup %4996  ;;  %v3033_v25 = vadd.f32 1.0, %v4995_v6  ;;  %v3090_v39 = vpack.c.bf16 %v3058_v53, %v3057_v35 }
 0x740   : > { %v4999_v37 = vpop.eup %4998  ;;  %5008 = vrcp.f32 %v3035_v38  ;;  %v3036_v15 = vadd.f32 1.0, %v4997_v9 }
 0x741   : > { %5010 = vrcp.f32 %v3033_v25  ;;  %v3034_v7 = vadd.f32 1.0, %v4999_v37  ;;  %4315 = vmatprep.mubr.bf16.mxu1 %v3090_v39 }
 0x742   : > { %v5001_v1 = vpop.eup %5000  ;;  %5012 = vrcp.f32 %v3036_v15  ;;  %4316 = vmatmul.mubr.bf16.gmra.mrb[92].mxu1 %v3091_v18 }
 0x743   : > { %v5003_v31 = vpop.eup %5002  ;;  %5014 = vrcp.f32 %v3034_v7  ;;  %v3063_v57 = vmul.f32 %v5001_v1, %v6178_v43 }
 0x744   : > { %v5005_v42 = vpop.eup %5004  ;;  %v3061_v49 = vmul.f32 %v5003_v31, %v6181_v60 }
 0x745   : > { %v5007_v34 = vpop.eup %5006  ;;  %v3064_v19 = vmul.f32 %v5005_v42, %v6185_v30 }
 0x746   : > { %v3062_v10 = vmul.f32 %v5007_v34, %v6189_v17  ;;  %v4496_v17 = vld [vmem:[%s6370_s8 + $0xc0] sm:$0xff]  }
 0x747   : > { %v3093_v28 = vpack.c.bf16 %v3064_v19, %v3063_v57  ;;  %4327 = vmatprep.subr.bf16.mxu0 %v4496_v17 }
 0x748   : > { %v3092_v22 = vpack.c.bf16 %v3062_v10, %v3061_v49  ;;  %4328 = vmatpush3.bf16.msra.mxu0 %v4496_v17 }
 0x74a   : > { %v5009_v8 = vpop.eup %5008  ;;  %4319 = vmatprep.mubr.bf16.mxu1 %v3092_v22 }
 0x74b   : > { %v5011_v59 = vpop.eup %5010  ;;  %4320 = vmatmul.mubr.bf16.gmra.mrb[96].mxu1 %v3093_v28  ;;  %v3067_v62 = vmul.f32 %v5009_v8, %v6194_v61  ;;  %v4497_v61 = vld [vmem:[%s6370_s8 + $0xc8] sm:$0xff]  }
 0x74c   : > { %v5013_v41 = vpop.eup %5012  ;;  %v3065_v43 = vmul.f32 %v5011_v59, %v6197_v27  ;;  %4329 = vmatprep.subr.bf16.mxu0 %v4497_v61  ;;  %v4498_v27 = vld [vmem:[%s6370_s8 + $0xd0] sm:$0xff]  }
 0x74d   : > { %v5015_v33 = vpop.eup %5014  ;;  %v3068_v14 = vmul.f32 %v5013_v41, %v6201_v20  ;;  %4330 = vmatpush3.bf16.msra.mxu0 %v4497_v61  ;;  %v4499_v20 = vld [vmem:[%s6370_s8 + $0xd8] sm:$0xff]  }
 0x74e   : > { %v3066_v30 = vmul.f32 %v5015_v33, %v6205_v36  ;;  %4331 = vmatprep.subr.bf16.mxu0 %v4498_v27  ;;  %v4500_v36 = vld [vmem:[%s6370_s8 + $0xe0] sm:$0xff]  }
 0x74f   : > { %v3095_v56 = vpack.c.bf16 %v3068_v14, %v3067_v62 }
 0x750   : > { %v3094_v60 = vpack.c.bf16 %v3066_v30, %v3065_v43 }
 0x751   : > { %4332 = vmatpush3.bf16.msra.mxu0 %v4498_v27 }
 0x752   : > { %4323 = vmatprep.mubr.bf16.mxu1 %v3094_v60  ;;  %4333 = vmatprep.subr.bf16.mxu0 %v4499_v20 }
 0x753   : > { %4324 = vmatmul.mubr.bf16.gmra.mrb[100].mxu1 %v3095_v56 }
 0x755   : > { %4334 = vmatpush3.bf16.msra.mxu0 %v4499_v20 }
 0x756   : > { %4335 = vmatprep.subr.bf16.mxu0 %v4500_v36 }
 0x759   : > { %4336 = vmatpush3.bf16.msra.mxu0 %v4500_v36 }
 0x75a   : > { %4337 = vmatprep.subr.bf16.mxu0 %v4501_v44 }
 0x75d   : > { %4338 = vmatpush3.bf16.msra.mxu0 %v4501_v44 }
 0x75e   : > { %4339 = vmatprep.subr.bf16.mxu0 %v4502_v26 }
 0x761   : > { %4340 = vmatpush3.bf16.msra.mxu0 %v4502_v26 }
 0x762   : > { %4341 = vmatprep.subr.bf16.mxu0 %v4503_v47 }
 0x765   : > { %4342 = vmatpush3.bf16.msra.mxu0 %v4503_v47 }
 0x80d   : > { %v4313_v4 = vpop.f32.mrb[88].mxu1 }
 0x80e   : > { %v6255_v0 = vadd.f32 %v4313_v4, %v6252_v32  ;;  %v3184_v2 = vpop.f32.mrb[89].mxu1 }
 0x80f   : > { %v6258_v24 = vadd.f32 %v6252_v32, %v3184_v2  ;;  %v4314_v16 = vpop.f32.mrb[90].mxu1 }
 0x810   : > { %v3249_v50 = vsub.f32 0.0, %v6255_v0  ;;  %v6262_v13 = vadd.f32 %v4314_v16, %v6252_v32  ;;  %v3187_v12 = vpop.f32.mrb[91].mxu1 }
 0x811   : > { %v3247_v46 = vsub.f32 0.0, %v6258_v24  ;;  %v6266_v48 = vadd.f32 %v6252_v32, %v3187_v12 }
 0x812   : > { %v3267_v58 = vmul.f32 1.442695, %v3249_v50  ;;  %v3250_v40 = vsub.f32 0.0, %v6262_v13 }
 0x813   : > { %v3263_v51 = vmul.f32 1.442695, %v3247_v46  ;;  %v3248_v45 = vsub.f32 0.0, %v6266_v48 }
 0x814   : > { %5016 = vpow2.f32 %v3267_v58  ;;  %v3269_v23 = vmul.f32 1.442695, %v3250_v40 }
 0x815   : > { %5018 = vpow2.f32 %v3263_v51  ;;  %v3265_v29 = vmul.f32 1.442695, %v3248_v45  ;;  %v4317_v52 = vpop.f32.mrb[92].mxu1 }
 0x816   : > { %5020 = vpow2.f32 %v3269_v23  ;;  %v6271_v11 = vadd.f32 %v4317_v52, %v6252_v32  ;;  %v3200_v55 = vpop.f32.mrb[93].mxu1 }
 0x817   : > { %5022 = vpow2.f32 %v3265_v29  ;;  %v6274_v54 = vadd.f32 %v6252_v32, %v3200_v55  ;;  %v4318_v3 = vpop.f32.mrb[94].mxu1 }
 0x818   : > { %v3253_v21 = vsub.f32 0.0, %v6271_v11  ;;  %v6278_v5 = vadd.f32 %v4318_v3, %v6252_v32  ;;  %v3203_v63 = vpop.f32.mrb[95].mxu1 }
 0x819   : > { %v3251_v35 = vsub.f32 0.0, %v6274_v54  ;;  %v6282_v53 = vadd.f32 %v6252_v32, %v3203_v63 }
 0x81a   : > { %v3275_v6 = vmul.f32 1.442695, %v3253_v21  ;;  %v3254_v38 = vsub.f32 0.0, %v6278_v5 }
 0x81b   : > { %v3271_v18 = vmul.f32 1.442695, %v3251_v35  ;;  %v3252_v9 = vsub.f32 0.0, %v6282_v53 }
 0x81c   : > { %5024 = vpow2.f32 %v3275_v6  ;;  %v3277_v25 = vmul.f32 1.442695, %v3254_v38 }
 0x81d   : > { %5026 = vpow2.f32 %v3271_v18  ;;  %v3273_v39 = vmul.f32 1.442695, %v3252_v9 }
 0x81e   : > { %v5017_v37 = vpop.eup %5016  ;;  %5028 = vpow2.f32 %v3277_v25  ;;  %v4321_v15 = vpop.f32.mrb[96].mxu1 }
 0x81f   : > { %v5019_v7 = vpop.eup %5018  ;;  %v3297_v1 = vadd.f32 1.0, %v5017_v37  ;;  %5030 = vpow2.f32 %v3273_v39  ;;  %v6287_v31 = vadd.f32 %v4321_v15, %v6252_v32  ;;  %v3216_v42 = vpop.f32.mrb[97].mxu1 }
 0x820   : > { %v5021_v34 = vpop.eup %5020  ;;  %v3295_v57 = vadd.f32 1.0, %v5019_v7  ;;  %v6290_v19 = vadd.f32 %v6252_v32, %v3216_v42  ;;  %v4322_v49 = vpop.f32.mrb[98].mxu1 }
 0x821   : > { %v5023_v10 = vpop.eup %5022  ;;  %5032 = vrcp.f32 %v3297_v1  ;;  %v3298_v28 = vadd.f32 1.0, %v5021_v34  ;;  %v3257_v22 = vsub.f32 0.0, %v6287_v31  ;;  %v6294_v8 = vadd.f32 %v4322_v49, %v6252_v32  ;;  %v3219_v59 = vpop.f32.mrb[99].mxu1 }
 0x822   : > { %5034 = vrcp.f32 %v3295_v57  ;;  %v3296_v41 = vadd.f32 1.0, %v5023_v10  ;;  %v3255_v33 = vsub.f32 0.0, %v6290_v19  ;;  %v6298_v62 = vadd.f32 %v6252_v32, %v3219_v59 }
 0x823   : > { %5036 = vrcp.f32 %v3298_v28  ;;  %v3283_v14 = vmul.f32 1.442695, %v3257_v22  ;;  %v3258_v43 = vsub.f32 0.0, %v6294_v8 }
 0x824   : > { %5038 = vrcp.f32 %v3296_v41  ;;  %v3279_v30 = vmul.f32 1.442695, %v3255_v33  ;;  %v3256_v56 = vsub.f32 0.0, %v6298_v62 }
 0x825   : > { %5040 = vpow2.f32 %v3283_v14  ;;  %v3285_v60 = vmul.f32 1.442695, %v3258_v43 }
 0x826   : > { %v5025_v17 = vpop.eup %5024  ;;  %5042 = vpow2.f32 %v3279_v30  ;;  %v3281_v61 = vmul.f32 1.442695, %v3256_v56  ;;  %v4325_v27 = vpop.f32.mrb[100].mxu1 }
 0x827   : > { %v5027_v20 = vpop.eup %5026  ;;  %v3301_v36 = vadd.f32 1.0, %v5025_v17  ;;  %5044 = vpow2.f32 %v3285_v60  ;;  %v6303_v44 = vadd.f32 %v4325_v27, %v6252_v32  ;;  %v3232_v26 = vpop.f32.mrb[101].mxu1 }
 0x828   : > { %v5029_v47 = vpop.eup %5028  ;;  %v3299_v4 = vadd.f32 1.0, %v5027_v20  ;;  %5046 = vpow2.f32 %v3281_v61  ;;  %v6306_v2 = vadd.f32 %v6252_v32, %v3232_v26  ;;  %v4326_v16 = vpop.f32.mrb[102].mxu1 }
 0x829   : > { %v5031_v50 = vpop.eup %5030  ;;  %5048 = vrcp.f32 %v3301_v36  ;;  %v3302_v12 = vadd.f32 1.0, %v5029_v47  ;;  %v3261_v46 = vsub.f32 0.0, %v6303_v44  ;;  %v6310_v58 = vadd.f32 %v4326_v16, %v6252_v32  ;;  %v3235_v40 = vpop.f32.mrb[103].mxu1 }
 0x82a   : > { %5050 = vrcp.f32 %v3299_v4  ;;  %v3300_v51 = vadd.f32 1.0, %v5031_v50  ;;  %v3259_v45 = vsub.f32 0.0, %v6306_v2  ;;  %v6314_v23 = vadd.f32 %v6252_v32, %v3235_v40 }
 0x82b   : > { %v5033_v29 = vpop.eup %5032  ;;  %5052 = vrcp.f32 %v3302_v12  ;;  %v3291_v52 = vmul.f32 1.442695, %v3261_v46  ;;  %v3262_v55 = vsub.f32 0.0, %v6310_v58 }
 0x82c   : > { %v5035_v3 = vpop.eup %5034  ;;  %5054 = vrcp.f32 %v3300_v51  ;;  %v3287_v21 = vmul.f32 1.442695, %v3259_v45  ;;  %v3260_v63 = vsub.f32 0.0, %v6314_v23  ;;  %v3329_v18 = vmul.f32 %v5033_v29, %v6255_v0 }
 0x82d   : > { %v5037_v35 = vpop.eup %5036  ;;  %5056 = vpow2.f32 %v3291_v52  ;;  %v3293_v6 = vmul.f32 1.442695, %v3262_v55  ;;  %v3327_v39 = vmul.f32 %v5035_v3, %v6258_v24 }
 0x82e   : > { %v5039_v38 = vpop.eup %5038  ;;  %v3330_v9 = vmul.f32 %v5037_v35, %v6262_v13  ;;  %5058 = vpow2.f32 %v3287_v21  ;;  %v3289_v32 = vmul.f32 1.442695, %v3260_v63 }
 0x82f   : > { %v5041_v25 = vpop.eup %5040  ;;  %v3328_v37 = vmul.f32 %v5039_v38, %v6266_v48  ;;  %5060 = vpow2.f32 %v3293_v6 }
 0x830   : > { %v5043_v15 = vpop.eup %5042  ;;  %v3363_v7 = vpack.c.bf16 %v3330_v9, %v3329_v18  ;;  %v3305_v1 = vadd.f32 1.0, %v5041_v25  ;;  %5062 = vpow2.f32 %v3289_v32 }
 0x831   : > { %v5045_v42 = vpop.eup %5044  ;;  %v3303_v34 = vadd.f32 1.0, %v5043_v15  ;;  %v3362_v57 = vpack.c.bf16 %v3328_v37, %v3327_v39 }
 0x832   : > { %v5047_v49 = vpop.eup %5046  ;;  %5064 = vrcp.f32 %v3305_v1  ;;  %v3306_v0 = vadd.f32 1.0, %v5045_v42 }
 0x833   : > { %v5049_v10 = vpop.eup %5048  ;;  %5066 = vrcp.f32 %v3303_v34  ;;  %v3304_v13 = vadd.f32 1.0, %v5047_v49  ;;  %4343 = vmatprep.mubr.bf16.mxu0 %v3362_v57 }
 0x834   : > { %v5051_v28 = vpop.eup %5050  ;;  %5068 = vrcp.f32 %v3306_v0  ;;  %4344 = vmatmul.mubr.bf16.vlgmr.msra.gmra.mrb[72].mxu0 %v3363_v7  ;;  %v3333_v22 = vmul.f32 %v5049_v10, %v6271_v11 }
 0x835   : > { %v5053_v24 = vpop.eup %5052  ;;  %5070 = vrcp.f32 %v3304_v13  ;;  %v3331_v33 = vmul.f32 %v5051_v28, %v6274_v54 }
 0x836   : > { %v5055_v48 = vpop.eup %5054  ;;  %v3334_v59 = vmul.f32 %v5053_v24, %v6278_v5 }
 0x837   : > { %v5057_v41 = vpop.eup %5056  ;;  %v3332_v14 = vmul.f32 %v5055_v48, %v6282_v53 }
 0x838   : > { %v5059_v43 = vpop.eup %5058  ;;  %v3309_v30 = vadd.f32 1.0, %v5057_v41  ;;  %v3365_v56 = vpack.c.bf16 %v3334_v59, %v3333_v22 }
 0x839   : > { %v5061_v60 = vpop.eup %5060  ;;  %v3307_v17 = vadd.f32 1.0, %v5059_v43  ;;  %v3364_v61 = vpack.c.bf16 %v3332_v14, %v3331_v33 }
 0x83a   : > { %v5063_v27 = vpop.eup %5062  ;;  %5072 = vrcp.f32 %v3309_v30  ;;  %v3310_v20 = vadd.f32 1.0, %v5061_v60 }
 0x83b   : > { %5074 = vrcp.f32 %v3307_v17  ;;  %v3308_v36 = vadd.f32 1.0, %v5063_v27  ;;  %4347 = vmatprep.mubr.bf16.mxu0 %v3364_v61 }
 0x83c   : > { %v5065_v11 = vpop.eup %5064  ;;  %5076 = vrcp.f32 %v3310_v20  ;;  %4348 = vmatmul.mubr.bf16.gmra.mrb[76].mxu0 %v3365_v56 }
 0x83d   : > { %v5067_v5 = vpop.eup %5066  ;;  %5078 = vrcp.f32 %v3308_v36  ;;  %v3337_v53 = vmul.f32 %v5065_v11, %v6287_v31 }
 0x83e   : > { %v5069_v54 = vpop.eup %5068  ;;  %v3335_v4 = vmul.f32 %v5067_v5, %v6290_v19 }
 0x83f   : > { %v5071_v26 = vpop.eup %5070  ;;  %v3338_v47 = vmul.f32 %v5069_v54, %v6294_v8 }
 0x840   : > { %v3336_v16 = vmul.f32 %v5071_v26, %v6298_v62  ;;  %v3843_v62 = vld [vmem:[%s6371_s9 + $0x3] ss:$0 sm:$0xff] }
 0x841   : > { %v3367_v50 = vpack.c.bf16 %v3338_v47, %v3337_v53 }
 0x842   : > { %v3366_v12 = vpack.c.bf16 %v3336_v16, %v3335_v4 }
 0x844   : > { %v5073_v46 = vpop.eup %5072  ;;  %4351 = vmatprep.mubr.bf16.mxu0 %v3366_v12 }
 0x845   : > { %v5075_v40 = vpop.eup %5074  ;;  %4352 = vmatmul.mubr.bf16.gmra.mrb[80].mxu0 %v3367_v50  ;;  %v3341_v29 = vmul.f32 %v5073_v46, %v6303_v44 }
 0x846   : > { %v5077_v51 = vpop.eup %5076  ;;  %v3339_v31 = vmul.f32 %v5075_v40, %v6306_v2 }
 0x847   : > { %v5079_v45 = vpop.eup %5078  ;;  %v3342_v52 = vmul.f32 %v5077_v51, %v6310_v58 }
 0x848   : > { %v3340_v8 = vmul.f32 %v5079_v45, %v6314_v23 }
 0x849   : > { %v3369_v19 = vpack.c.bf16 %v3342_v52, %v3341_v29 }
 0x84a   : > { %v3368_v55 = vpack.c.bf16 %v3340_v8, %v3339_v31 }
 0x84c   : > { %4355 = vmatprep.mubr.bf16.mxu0 %v3368_v55 }
 0x84d   : > { %4356 = vmatmul.mubr.bf16.gmra.mrb[84].mxu0 %v3369_v19 }
 0x907   : > { %v4345_v44 = vpop.f32.mrb[72].mxu0 }
 0x908   : > { %v3467_v2 = vadd.f32 %v4345_v44, %v3843_v62  ;;  %v3458_v58 = vpop.f32.mrb[73].mxu0 }
 0x909   : > { %v3459_v23 = vadd.f32 %v3843_v62, %v3458_v58  ;;  %v4346_v3 = vpop.f32.mrb[74].mxu0 }
 0x90a   : > { %3523 = vst [vmem:[%s6341_s19 + $0x10] sm:$0xff] %v3467_v2  ;;  %v3470_v21 = vadd.f32 %v4346_v3, %v3843_v62  ;;  %v3461_v63 = vpop.f32.mrb[75].mxu0 }
 0x90b   : > { %3521 = vst [vmem:[%s6341_s19] sm:$0xff] %v3459_v23  ;;  %v3462_v35 = vadd.f32 %v3843_v62, %v3461_v63 }
 0x90c   : > { %3524 = vst [vmem:[%s6341_s19 + $0x18] sm:$0xff] %v3470_v21 }
 0x90d   : > { %3522 = vst [vmem:[%s6341_s19 + $0x8] sm:$0xff] %v3462_v35 }
 0x90f   : > { %v4349_v6 = vpop.f32.mrb[76].mxu0 }
 0x910   : > { %v3483_v38 = vadd.f32 %v4349_v6, %v3843_v62  ;;  %v3474_v18 = vpop.f32.mrb[77].mxu0 }
 0x911   : > { %v3475_v9 = vadd.f32 %v3843_v62, %v3474_v18  ;;  %v4350_v32 = vpop.f32.mrb[78].mxu0 }
 0x912   : > { %3527 = vst [vmem:[%s6341_s19 + $0x30] sm:$0xff] %v3483_v38  ;;  %v3486_v25 = vadd.f32 %v4350_v32, %v3843_v62  ;;  %v3477_v39 = vpop.f32.mrb[79].mxu0 }
 0x913   : > { %3525 = vst [vmem:[%s6341_s19 + $0x20] sm:$0xff] %v3475_v9  ;;  %v3478_v37 = vadd.f32 %v3843_v62, %v3477_v39 }
 0x914   : > { %3528 = vst [vmem:[%s6341_s19 + $0x38] sm:$0xff] %v3486_v25 }
 0x915   : > { %3526 = vst [vmem:[%s6341_s19 + $0x28] sm:$0xff] %v3478_v37 }
 0x918   : > { %v4353_v15 = vpop.f32.mrb[80].mxu0 }
 0x919   : > { %v3499_v7 = vadd.f32 %v4353_v15, %v3843_v62  ;;  %v3490_v1 = vpop.f32.mrb[81].mxu0 }
 0x91a   : > { %v3491_v42 = vadd.f32 %v3843_v62, %v3490_v1  ;;  %v4354_v34 = vpop.f32.mrb[82].mxu0 }
 0x91b   : > { %3531 = vst [vmem:[%s6341_s19 + $0x50] sm:$0xff] %v3499_v7  ;;  %v3502_v57 = vadd.f32 %v4354_v34, %v3843_v62  ;;  %v3493_v49 = vpop.f32.mrb[83].mxu0 }
 0x91c   : > { %3529 = vst [vmem:[%s6341_s19 + $0x40] sm:$0xff] %v3491_v42  ;;  %v3494_v0 = vadd.f32 %v3843_v62, %v3493_v49 }
 0x91d   : > { %3532 = vst [vmem:[%s6341_s19 + $0x58] sm:$0xff] %v3502_v57 }
 0x91e   : > { %3530 = vst [vmem:[%s6341_s19 + $0x48] sm:$0xff] %v3494_v0 }
 0x920   : > { %v4357_v10 = vpop.f32.mrb[84].mxu0 }
 0x921   : > { %v3515_v13 = vadd.f32 %v4357_v10, %v3843_v62  ;;  %v3506_v28 = vpop.f32.mrb[85].mxu0 }
 0x922   : > { %v3507_v24 = vadd.f32 %v3843_v62, %v3506_v28  ;;  %v4358_v48 = vpop.f32.mrb[86].mxu0 }
 0x923   : > { %3535 = vst [vmem:[%s6341_s19 + $0x70] sm:$0xff] %v3515_v13  ;;  %v3518_v22 = vadd.f32 %v4358_v48, %v3843_v62  ;;  %v3509_v59 = vpop.f32.mrb[87].mxu0 }
 0x924   : > { %3533 = vst [vmem:[%s6341_s19 + $0x60] sm:$0xff] %v3507_v24  ;;  %v3510_v41 = vadd.f32 %v3843_v62, %v3509_v59 }
 0x925   : > { %3536 = vst [vmem:[%s6341_s19 + $0x78] sm:$0xff] %v3518_v22 }
 0x926   : > { %3534 = vst [vmem:[%s6341_s19 + $0x68] sm:$0xff] %v3510_v41 }
 0x927 PF: > { %s20_s13 = sadd.s32 1, %s5086_s13  }
 0x928   : > { %p17_p4 = scmp.ge.s32.totalorder %s20_s13, 4  }
 0x92a   :  { %19 = sbr.rel (!%p17_p4) target bundleno = 1 (0x1), region = 106 }

</bundles_post_ra>
